<compile_context>
chip_gen: v6e
topology: v6e:2x2x1
jax: 0.10.0
libtpu: 0.0.40
codegen_flags: <defaults>
</compile_context>

<pallas_src>
import functools
import math

import jax
import jax.numpy as jnp
from jax.experimental import pallas as pl
from jax.experimental.pallas import tpu as pltpu


_VMEM_LIMIT_BYTES = 48 * 1024 * 1024     # safe on v7x (64 MiB), plenty on v5e/v6e
_MAX_LANES = 4096                        # max flattened lane width
_TARGET_BLOCK_ELEMS = 512 * 1024         # ~2 MiB f32 per stream per buffer


# ---------------------------------------------------------------------------
# Shared elementwise focal-loss math (f32, VPU/EUP work).
# ---------------------------------------------------------------------------
def _focal_math(x, t, w, *, alpha, gamma):
    # One shared exp(-|x|) feeds both the sigmoid and the BCE log term.
    u = jnp.exp(-jnp.abs(x))                     # exp(-|x|)
    s = 1.0 + u
    d = 1.0 / s                                  # sigmoid(|x|); exact (2e-5 tol)
    pred = jnp.where(x >= 0.0, d, u * d)         # sigmoid(x)

    # pt = t*(1-pred) + (1-t)*pred  ==  pred + t*(1 - 2*pred)
    pt = pred + t * (1.0 - 2.0 * pred)
    # alpha_weight = t*alpha + (1-t)*(1-alpha)  ==  (1-alpha) + t*(2*alpha-1)
    alpha_weight = (1.0 - alpha) + t * (2.0 * alpha - 1.0)

    # Integer gamma -> repeated multiplies on the VPU (no exp/log on the EUP).
    g = float(gamma)
    if g == 0.0:
        pw = jnp.ones_like(pt)
    elif g.is_integer() and 0.0 < g <= 8.0:
        pw = pt
        for _ in range(int(g) - 1):
            pw = pw * pt
    else:
        # TODO(synk): non-integer gamma keeps jnp.power (exp/log on the EUP).
        pw = jnp.power(pt, g)

    focal_weight = alpha_weight * pw

    # sigmoid_cross_entropy_with_logits: max(x,0) - x*t + log1p(exp(-|x|));
    # log1p(u) == log(1+u) == log(s), reusing s.
    bce = jnp.maximum(x, 0.0) - x * t + jnp.log(s)

    return focal_weight * bce * w


# ---------------------------------------------------------------------------
# Kernels.
# ---------------------------------------------------------------------------
def _focal_kernel_compact_w(x_ref, t_ref, w_ref, rmat_ref, o_ref, *, alpha, gamma):
    x = x_ref[...].astype(jnp.float32)           # (TR, L)
    t = t_ref[...].astype(jnp.float32)           # (TR, L)
    # Expand per-anchor weights (TR, L//C) -> (TR, L) on the idle MXU:
    # rmat[q, l] = 1 iff l // C == q, so (w @ rmat)[r, l] == w[r, l // C].
    # precision=HIGHEST so f32 weights are not truncated to bf16 on the MXU.
    w = jnp.dot(w_ref[...].astype(jnp.float32), rmat_ref[...],
                preferred_element_type=jnp.float32,
                precision=jax.lax.Precision.HIGHEST)
    o_ref[...] = _focal_math(x, t, w, alpha=alpha, gamma=gamma).astype(o_ref.dtype)


def _focal_kernel_full_w(x_ref, t_ref, w_ref, o_ref, *, alpha, gamma):
    x = x_ref[...].astype(jnp.float32)           # (TR, L)
    t = t_ref[...].astype(jnp.float32)           # (TR, L)
    w = w_ref[...].astype(jnp.float32)           # (TR, L) pre-expanded weights
    o_ref[...] = _focal_math(x, t, w, alpha=alpha, gamma=gamma).astype(o_ref.dtype)


# ---------------------------------------------------------------------------
# Wrapper helpers.
# ---------------------------------------------------------------------------
def _pick_lane_width(n_classes):
    """Lane width (multiple of both 128 and C) for the flattened 2-D view."""
    # Prefer lanes = 128*C so the weight block (lanes // C cols) is 128-wide.
    if 128 * n_classes <= _MAX_LANES:
        return 128 * n_classes
    base = 128 * n_classes // math.gcd(128, n_classes)   # lcm(128, C)
    if base <= _MAX_LANES:
        return (_MAX_LANES // base) * base
    return None


def _pick_tile_rows(rows, lanes):
    """Row tile: ~2 MiB/stream/buffer, >=4 grid steps when rows permit."""
    tile = (_TARGET_BLOCK_ELEMS // lanes) // 8 * 8
    tile = max(8, min(512, tile))
    if rows <= tile:
        return rows                       # single full-extent block (legal)
    # Ensure the single "parallel" axis has >=4 steps so v7x's two TensorCores
    # both get work and the pipeline has something to overlap.
    if -(-rows // tile) < 4:
        alt = (rows // 4) // 8 * 8
        if alt >= 8:
            tile = alt
    return tile


def _compiler_params():
    return pltpu.CompilerParams(
        dimension_semantics=("parallel",),
        vmem_limit_bytes=_VMEM_LIMIT_BYTES,
    )


# ---------------------------------------------------------------------------
# Public wrapper.
# ---------------------------------------------------------------------------
def sigmoid_focal_classification_loss(logits, targets, weights,
                                      *, gamma=2.0, alpha=0.25):
    """Pallas TPU implementation of SigmoidFocalClassificationLoss.forward.

    Args:
      logits:  (B, P, C) float tensor of predicted logits.
      targets: (B, P, C) float one-hot targets.
      weights: (B, P)    float anchor-wise weights.

    Returns:
      (B, P, C) weighted focal loss (no reduction), dtype of `logits`.
    """
    B, P, C = logits.shape
    assert targets.shape == (B, P, C)
    assert weights.shape == (B, P)

    lanes = _pick_lane_width(C)
    compiler_params = _compiler_params()
    kernel_kwargs = dict(alpha=alpha, gamma=gamma)

    if lanes is not None:
        # ---- Fast path: lane-dense flattened layout, compact weight stream --
        q = lanes // C                       # anchors per flattened row
        # Pad anchors so B * P_pad * C is divisible by the lane width.
        if (B * P) % q == 0:
            P_pad = P
        else:
            step = q // math.gcd(B, q)
            P_pad = -(-P // step) * step
        if P_pad != P:
            pad = P_pad - P
            logits_p = jnp.pad(logits, ((0, 0), (0, pad), (0, 0)))
            targets_p = jnp.pad(targets, ((0, 0), (0, pad), (0, 0)))
            weights_p = jnp.pad(weights, ((0, 0), (0, pad)))
        else:
            logits_p, targets_p, weights_p = logits, targets, weights

        rows = (B * P_pad * C) // lanes
        x2 = logits_p.reshape(rows, lanes)        # contiguous reshape
        t2 = targets_p.reshape(rows, lanes)
        w2 = weights_p.reshape(rows, q)

        # Constant 0/1 expansion matrix; constant index_map -> fetched once.
        rmat = (jnp.arange(q, dtype=jnp.int32)[:, None]
                == (jnp.arange(lanes, dtype=jnp.int32) // C)[None, :]
                ).astype(jnp.float32)             # (q, lanes)

        tile_rows = _pick_tile_rows(rows, lanes)
        grid = (pl.cdiv(rows, tile_rows),)

        kernel = functools.partial(_focal_kernel_compact_w, **kernel_kwargs)
        out2 = pl.pallas_call(
            kernel,
            out_shape=jax.ShapeDtypeStruct((rows, lanes), logits.dtype),
            grid=grid,
            in_specs=[
                pl.BlockSpec((tile_rows, lanes), lambda i: (i, 0)),
                pl.BlockSpec((tile_rows, lanes), lambda i: (i, 0)),
                pl.BlockSpec((tile_rows, q), lambda i: (i, 0)),
                pl.BlockSpec((q, lanes), lambda i: (0, 0)),
            ],
            out_specs=pl.BlockSpec((tile_rows, lanes), lambda i: (i, 0)),
            compiler_params=compiler_params,
        )(x2, t2, w2, rmat)

        out = out2.reshape(B, P_pad, C)
        if P_pad != P:
            out = out[:, :P, :]
        return out

    # ---- Last resort (huge/odd C where no aligned lane width <= _MAX_LANES):
    # pre-expand weights and flatten to a padded lane-dense 1-D view so stores
    # stay fully lane-utilized (no masked C-wide vst).  Costs 4/3x the minimal
    # HBM traffic for the weight stream only.
    n = B * P * C
    lanes = 1024 if n >= 1024 else -(-n // 128) * 128
    n_pad = -(-n // lanes) * lanes
    rows = n_pad // lanes

    w_full = jnp.broadcast_to(weights[..., None], (B, P, C)).reshape(-1)
    xf = logits.reshape(-1)
    tf = targets.reshape(-1)
    if n_pad != n:
        pad = n_pad - n
        xf = jnp.pad(xf, (0, pad))
        tf = jnp.pad(tf, (0, pad))
        w_full = jnp.pad(w_full, (0, pad))
    x2 = xf.reshape(rows, lanes)
    t2 = tf.reshape(rows, lanes)
    w2 = w_full.reshape(rows, lanes)

    tile_rows = _pick_tile_rows(rows, lanes)
    grid = (pl.cdiv(rows, tile_rows),)

    kernel = functools.partial(_focal_kernel_full_w, **kernel_kwargs)
    out2 = pl.pallas_call(
        kernel,
        out_shape=jax.ShapeDtypeStruct((rows, lanes), logits.dtype),
        grid=grid,
        in_specs=[
            pl.BlockSpec((tile_rows, lanes), lambda i: (i, 0)),
            pl.BlockSpec((tile_rows, lanes), lambda i: (i, 0)),
            pl.BlockSpec((tile_rows, lanes), lambda i: (i, 0)),
        ],
        out_specs=pl.BlockSpec((tile_rows, lanes), lambda i: (i, 0)),
        compiler_params=compiler_params,
    )(x2, t2, w2)
    return out2.reshape(-1)[:n].reshape(B, P, C)


# ---------------------------------------------------------------------------
# Pure-JAX reference (faithful port of the PyTorch module).
# ---------------------------------------------------------------------------
def _reference(logits, targets, weights, *, gamma=2.0, alpha=0.25):
    pred_sigmoid = jax.nn.sigmoid(logits)
    alpha_weight = targets * alpha + (1.0 - targets) * (1.0 - alpha)
    pt = targets * (1.0 - pred_sigmoid) + (1.0 - targets) * pred_sigmoid
    focal_weight = alpha_weight * jnp.power(pt, gamma)
    bce = (jnp.maximum(logits, 0.0) - logits * targets
           + jnp.log1p(jnp.exp(-jnp.abs(logits))))
    return focal_weight * bce * weights[..., None]


if __name__ == "__main__":
    key = jax.random.PRNGKey(0)

    def run_case(B, P, C):
        k1, k2, k3 = jax.random.split(jax.random.fold_in(key, P * 131 + C), 3)
        logits = jax.random.normal(k1, (B, P, C), dtype=jnp.float32) * 3.0
        cls_ids = jax.random.randint(k2, (B, P), 0, C)
        targets = jax.nn.one_hot(cls_ids, C, dtype=jnp.float32)
        weights = jax.random.uniform(k3, (B, P), dtype=jnp.float32)

        out = sigmoid_focal_classification_loss(
            logits, targets, weights, gamma=2.0, alpha=0.25)
        out = jax.block_until_ready(out)

        ref = _reference(logits, targets, weights, gamma=2.0, alpha=0.25)
        assert out.shape == (B, P, C)
        max_err = float(jnp.max(jnp.abs(out - ref)))
        assert jnp.allclose(out, ref, atol=2e-5, rtol=2e-5), max_err

    run_case(2, 128, 8)   # naturally lane-aligned fast path
    run_case(2, 37, 8)    # unaligned anchor count -> padded fast path
    print("KERNEL_OK")
</pallas_src>

<mosaic_0001>
module attributes {stable_mosaic.version = 11 : i64} {
  func.func @_focal_kernel_compact_w(%arg0: i32, %arg1: memref<2x1024xf32, #tpu.memory_space<vmem>>, %arg2: memref<2x1024xf32, #tpu.memory_space<vmem>>, %arg3: memref<2x128xf32, #tpu.memory_space<vmem>>, %arg4: memref<128x1024xf32, #tpu.memory_space<vmem>>, %arg5: memref<2x1024xf32, #tpu.memory_space<vmem>>) attributes {dimension_semantics = [#tpu.dimension_semantics<parallel>], iteration_bounds = array<i64: 1>, scalar_prefetch = 0 : i64, scratch_operands = 0 : i64, tpu.core_type = #tpu.core_type<tc>, window_params = [{transform_indices = @transform_0, window_bounds = array<i64: 2, 1024>}, {transform_indices = @transform_1, window_bounds = array<i64: 2, 1024>}, {transform_indices = @transform_2, window_bounds = array<i64: 2, 128>}, {pipeline_mode = #tpu.pipeline_mode<synchronous>, transform_indices = @transform_3, window_bounds = array<i64: 128, 1024>}, {transform_indices = @transform_4, window_bounds = array<i64: 2, 1024>}]} {
    %c0 = arith.constant 0 : index
    %c0_0 = arith.constant 0 : index
    %0 = vector.load %arg1[%c0, %c0_0] : memref<2x1024xf32, #tpu.memory_space<vmem>>, vector<2x1024xf32>
    %c0_1 = arith.constant 0 : index
    %c0_2 = arith.constant 0 : index
    %1 = vector.load %arg2[%c0_1, %c0_2] : memref<2x1024xf32, #tpu.memory_space<vmem>>, vector<2x1024xf32>
    %c0_3 = arith.constant 0 : index
    %c0_4 = arith.constant 0 : index
    %2 = vector.load %arg3[%c0_3, %c0_4] : memref<2x128xf32, #tpu.memory_space<vmem>>, vector<2x128xf32>
    %c0_5 = arith.constant 0 : index
    %c0_6 = arith.constant 0 : index
    %3 = vector.load %arg4[%c0_5, %c0_6] : memref<128x1024xf32, #tpu.memory_space<vmem>>, vector<128x1024xf32>
    %cst = arith.constant dense<0.000000e+00> : vector<2x1024xf32>
    %4 = tpu.matmul %2, %3, %cst {dimension_numbers = #tpu.dot_dimension_numbers<[1], [0], [0], [1], [0, 0, 1, 1], [], []>, precision = #tpu.contract_precision<fp32>} : vector<2x128xf32>, vector<128x1024xf32>, vector<2x1024xf32> -> vector<2x1024xf32>
    %5 = math.absf %0 : vector<2x1024xf32>
    %cst_7 = arith.constant 0.000000e+00 : f32
    %6 = vector.broadcast %cst_7 : f32 to vector<2x1024xf32>
    %7 = arith.subf %6, %5 : vector<2x1024xf32>
    %8 = math.exp %7 : vector<2x1024xf32>
    %cst_8 = arith.constant 1.000000e+00 : f32
    %9 = vector.broadcast %cst_8 : f32 to vector<2x1024xf32>
    %10 = arith.addf %9, %8 : vector<2x1024xf32>
    %cst_9 = arith.constant 1.000000e+00 : f32
    %11 = vector.broadcast %cst_9 : f32 to vector<2x1024xf32>
    %12 = arith.divf %11, %10 : vector<2x1024xf32>
    %cst_10 = arith.constant 0.000000e+00 : f32
    %13 = vector.broadcast %cst_10 : f32 to vector<2x1024xf32>
    %14 = arith.cmpf oge, %0, %13 : vector<2x1024xf32>
    %15 = arith.mulf %8, %12 : vector<2x1024xf32>
    %16 = arith.select %14, %12, %15 : vector<2x1024xi1>, vector<2x1024xf32>
    %cst_11 = arith.constant 2.000000e+00 : f32
    %17 = vector.broadcast %cst_11 : f32 to vector<2x1024xf32>
    %18 = arith.mulf %17, %16 : vector<2x1024xf32>
    %cst_12 = arith.constant 1.000000e+00 : f32
    %19 = vector.broadcast %cst_12 : f32 to vector<2x1024xf32>
    %20 = arith.subf %19, %18 : vector<2x1024xf32>
    %21 = arith.mulf %1, %20 : vector<2x1024xf32>
    %22 = arith.addf %16, %21 : vector<2x1024xf32>
    %cst_13 = arith.constant -5.000000e-01 : f32
    %23 = vector.broadcast %cst_13 : f32 to vector<2x1024xf32>
    %24 = arith.mulf %1, %23 : vector<2x1024xf32>
    %cst_14 = arith.constant 7.500000e-01 : f32
    %25 = vector.broadcast %cst_14 : f32 to vector<2x1024xf32>
    %26 = arith.addf %25, %24 : vector<2x1024xf32>
    %27 = arith.mulf %22, %22 : vector<2x1024xf32>
    %28 = arith.mulf %26, %27 : vector<2x1024xf32>
    %cst_15 = arith.constant 0.000000e+00 : f32
    %29 = vector.broadcast %cst_15 : f32 to vector<2x1024xf32>
    %30 = arith.maximumf %0, %29 : vector<2x1024xf32>
    %31 = arith.mulf %0, %1 : vector<2x1024xf32>
    %32 = arith.subf %30, %31 : vector<2x1024xf32>
    %33 = math.log %10 : vector<2x1024xf32>
    %34 = arith.addf %32, %33 : vector<2x1024xf32>
    %35 = arith.mulf %28, %34 : vector<2x1024xf32>
    %36 = arith.mulf %35, %4 : vector<2x1024xf32>
    %c0_16 = arith.constant 0 : index
    %c0_17 = arith.constant 0 : index
    %37 = vector.load %arg5[%c0_16, %c0_17] : memref<2x1024xf32, #tpu.memory_space<vmem>>, vector<2x1024xf32>
    tpu.vector_store %arg5[%c0_16, %c0_17], %36 {strides = array<i32>} : memref<2x1024xf32, #tpu.memory_space<vmem>>, vector<2x1024xf32>,
    return
  }
  func.func @transform_0(%arg0: i32) -> (i32, i32) {
    %c0_i32 = arith.constant 0 : i32
    %c0_i32_0 = arith.constant 0 : i32
    return %arg0, %c0_i32 : i32, i32
  }
  func.func @transform_1(%arg0: i32) -> (i32, i32) {
    %c0_i32 = arith.constant 0 : i32
    %c0_i32_0 = arith.constant 0 : i32
    return %arg0, %c0_i32 : i32, i32
  }
  func.func @transform_2(%arg0: i32) -> (i32, i32) {
    %c0_i32 = arith.constant 0 : i32
    %c0_i32_0 = arith.constant 0 : i32
    return %arg0, %c0_i32 : i32, i32
  }
  func.func @transform_3(%arg0: i32) -> (i32, i32) {
    %c0_i32 = arith.constant 0 : i32
    %c0_i32_0 = arith.constant 0 : i32
    %c0_i32_1 = arith.constant 0 : i32
    return %c0_i32, %c0_i32_0 : i32, i32
  }
  func.func @transform_4(%arg0: i32) -> (i32, i32) {
    %c0_i32 = arith.constant 0 : i32
    %c0_i32_0 = arith.constant 0 : i32
    return %arg0, %c0_i32 : i32, i32
  }
}

</mosaic_0001>

<bundles_post_ra>
// kernel: tpu_custom_call.1
= control target key start
LH: loop header
LB: loop body
LE: loop exit
PB: predicated region body
PF: predicated region fallthrough
CT: control target
= control target key end

     0   :  { %9 = vsyncpa [#allocation3], 0  ;;  %s6133_s0 = inlined_call_operand.hbm [shape: f32[2,1024], index: 0, kind: input, shape index: {}]   ;;  %s6134_s1 = inlined_call_operand.hbm [shape: f32[2,1024], index: 1, kind: input, shape index: {}]   ;;  %s6135_s2 = inlined_call_operand.vmem [shape: f32[2,128], index: 2, kind: input, shape index: {}]   ;;  %s6136_s3 = inlined_call_operand.hbm [shape: f32[128,1024], index: 3, kind: input, shape index: {}]   ;;  %s6137_s4 = inlined_call_operand.hbm [shape: f32[2,1024], index: 4, kind: output, shape index: {}]  }
   0x1   :  { %10 = vsyncpa [#allocation6], 0 }
   0x2   :  { %11 = vsyncpa [#allocation4], 0  ;;  %s3828_s15 = smov [#allocation5]   ;;  %s3829_s17 = smov [#allocation2]  }
   0x3   :  { %s28_s16 = sshll.u32 %s3828_s15, 4  ;;  %s18_s18 = sshll.u32 %s3829_s17, 4  ;;  %s29_s16 = int_to_ptr.vmem [resolvable:$true] %s28_s16  ;;  %s19_s18 = int_to_ptr.vmem [resolvable:$true] %s18_s18 }
   0x4   :  { %s3750_s19 = scalar_lea.vmem %s29_s16, 256  ;;  %p3755_p1 = scmp.lt.s32.totalorder %s29_s16, %s29_s16 }
   0x5   :  { %p3751_p0 = scmp.ne.s32.totalorder %s29_s16, %s3750_s19  ;;  %p3756_p2 = scmp.lt.s32.totalorder %s3750_s19, %s3750_s19 }
   0x7   :  { %p3757_p3 = por %p3756_p2, %p3755_p1 }
   0x9   :  { %p3758_p4 = pnand %p3757_p3, %p3751_p0 }
   0xb   :  { %3761 = shalt.err (!%p3758_p4)
}
   0xc   :  { %31 = dma.hbm_to_vmem [thread:$0]  %s6134_s1, 256, %s29_s16, [#allocation6]  }
   0xd   :  { %s3770_s22 = scalar_lea.vmem %s19_s18, 256  ;;  %p3775_p6 = scmp.lt.s32.totalorder %s19_s18, %s19_s18 }
   0xe   :  { %p3771_p5 = scmp.ne.s32.totalorder %s19_s18, %s3770_s22  ;;  %p3776_p7 = scmp.lt.s32.totalorder %s3770_s22, %s3770_s22 }
  0x10   :  { %p3777_p8 = por %p3776_p7, %p3775_p6 }
  0x12   :  { %p3778_p9 = pnand %p3777_p8, %p3771_p5 }
  0x14   :  { %3781 = shalt.err (!%p3778_p9)
}
  0x15   :  { %21 = dma.hbm_to_vmem [thread:$0]  %s6133_s0, 256, %s19_s18, [#allocation3]  }
  0x16   :  { %s3830_s25 = smov [#allocation7]  }
  0x17   :  { %s39_s26 = sshll.u32 %s3830_s25, 4  ;;  %s40_s26 = int_to_ptr.vmem [resolvable:$true] %s39_s26 }
  0x18   :  { %s3790_s27 = scalar_lea.vmem %s40_s26, 16384  ;;  %p3795_p11 = scmp.lt.s32.totalorder %s40_s26, %s40_s26 }
  0x19   :  { %p3791_p10 = scmp.ne.s32.totalorder %s40_s26, %s3790_s27  ;;  %p3796_p12 = scmp.lt.s32.totalorder %s3790_s27, %s3790_s27 }
  0x1b   :  { %p3797_p13 = por %p3796_p12, %p3795_p11 }
  0x1d   :  { %p3798_p0 = pnand %p3797_p13, %p3791_p10 }
  0x1f   :  { %3801 = shalt.err (!%p3798_p0)
}
  0x20   :  { %s3831_s1 = smov 1024   ;;  %s3832_s28 = smov 64  }
  0x21   :  { %45 = dma.hbm_to_vmem [thread:$0]  %s6136_s3, 16384, %s40_s26, [#allocation6], %s3831_s1, %s3831_s1, %s3832_s28  }
  0x22   :  { %3822 = dma.done.wait [#allocation3], 256  }
  0x23   :  { %3823 = vsyncadd [#allocation3], 4294967040 }
  0x24   :  { %3824 = dma.done.wait [#allocation6], 16640  }
  0x25   :  { %3825 = vsyncadd [#allocation6], 4294950656  ;;  %v6152_v0 = vmov 0.0   ;;  %v181_v1 = vld [vmem:[#allocation7 + $0x3c8] sm:$0xff]  ;;  %v180_v2 = vld [vmem:[#allocation7 + $0x3c0] sm:$0xff] }
  0x26   :  { %284 = vmatprep.mubr.f32.mxu0 %v6152_v0  ;;  %520 = vmatprep.mubr.f32.mxu1 %v6152_v0  ;;  %v173_v3 = vld [vmem:[#allocation7 + $0x388] sm:$0xff]  ;;  %v3872_v4 = vand.u32 4294901760, %v181_v1  ;;  %v3874_v5 = vand.u32 4294901760, %v180_v2  ;;  %v172_v7 = vld [vmem:[#allocation7 + $0x380] sm:$0xff] }
  0x27   :  { %v3876_v6 = vand.u32 4294901760, %v173_v3  ;;  %v165_v8 = vld [vmem:[#allocation7 + $0x348] sm:$0xff]  ;;  %v164_v9 = vld [vmem:[#allocation7 + $0x340] sm:$0xff]  ;;  %v3878_v10 = vand.u32 4294901760, %v172_v7 }
  0x28   :  { %v3880_v11 = vand.u32 4294901760, %v165_v8  ;;  %v3882_v12 = vand.u32 4294901760, %v164_v9  ;;  %v157_v13 = vld [vmem:[#allocation7 + $0x308] sm:$0xff]  ;;  %v156_v14 = vld [vmem:[#allocation7 + $0x300] sm:$0xff]  ;;  %189 = vmatprep.subr.mxu0 %v3872_v4  ;;  %v3892_v19 = vsub.f32 %v181_v1, %v3872_v4  ;;  %v3905_v24 = vsub.f32 %v180_v2, %v3874_v5 }
  0x29   :  { %v149_v15 = vld [vmem:[#allocation7 + $0x2c8] sm:$0xff]  ;;  %v3885_v16 = vand.u32 4294901760, %v157_v13  ;;  %v3887_v17 = vand.u32 4294901760, %v156_v14  ;;  %v3894_v20 = vld [vmem:[#allocation7 + $0x2c0] sm:$0xff]  ;;  %191 = vmatpush1.msra.mxu0 %v3874_v5  ;;  %v3911_v26 = vsub.f32 %v173_v3, %v3876_v6  ;;  %v3925_v32 = vsub.f32 %v172_v7, %v3878_v10 }
  0x2a   :  { %v3889_v18 = vand.u32 4294901760, %v149_v15  ;;  %v3896_v21 = vld [vmem:[#allocation7 + $0x288] sm:$0xff]  ;;  %v3898_v22 = vld [vmem:[#allocation7 + $0x280] sm:$0xff]  ;;  %v3902_v23 = vand.u32 4294901760, %v3894_v20  ;;  %193 = vmatprep.subr.mxu0 %v3876_v6  ;;  %v6150_v30 = vand.u32 4294901760, %v3892_v19  ;;  %v6149_v34 = vand.u32 4294901760, %v3905_v24 }
  0x2b   :  { %v3908_v25 = vand.u32 4294901760, %v3896_v21  ;;  %v3913_v27 = vld [vmem:[#allocation7 + $0x248] sm:$0xff]  ;;  %v3915_v28 = vld [vmem:[#allocation7 + $0x240] sm:$0xff]  ;;  %v3922_v31 = vand.u32 4294901760, %v3898_v22  ;;  %195 = vmatpush1.msra.mxu0 %v3878_v10  ;;  %v6147_v35 = vand.u32 4294901760, %v3911_v26  ;;  %v3934_v36 = vsub.f32 %v165_v8, %v3880_v11 }
  0x2c   :  { %v3917_v29 = vld [vmem:[#allocation7 + $0x208] sm:$0xff]  ;;  %v3928_v33 = vand.u32 4294901760, %v3913_v27  ;;  %v3937_v37 = vand.u32 4294901760, %v3915_v28  ;;  %v3939_v38 = vld [vmem:[#allocation7 + $0x200] sm:$0xff]  ;;  %197 = vmatprep.subr.mxu0 %v3880_v11  ;;  %v299_v39 = vsub.f32 %v3892_v19, %v6150_v30  ;;  %v6145_v40 = vand.u32 4294901760, %v3925_v32 }
  0x2d   :  { %v3947_v41 = vsub.f32 %v164_v9, %v3882_v12  ;;  %v3950_v42 = vand.u32 4294901760, %v3917_v29  ;;  %199 = vmatpush1.msra.mxu0 %v3882_v12  ;;  %v305_v43 = vsub.f32 %v3905_v24, %v6149_v34  ;;  %v311_v44 = vsub.f32 %v3911_v26, %v6147_v35  ;;  %v3963_v47 = vld [vmem:[#allocation7 + $0x1c8] sm:$0xff]  ;;  %v3973_v52 = vld [vmem:[#allocation7 + $0x1c0] sm:$0xff] }
  0x2e   :  { %6385 = vst [vmem:[#allocation12_spill] sm:$0xff] %v3928_v33  ;;  %6386 = vst [vmem:[#allocation13_spill] sm:$0xff] %v3937_v37  ;;  %v6144_v45 = vand.u32 4294901760, %v3934_v36  ;;  %v3961_v46 = vsub.f32 %v157_v13, %v3885_v16  ;;  %201 = vmatprep.subr.mxu0 %v3885_v16  ;;  %v300_v48 = vand.u32 4294901760, %v299_v39  ;;  %v317_v49 = vsub.f32 %v3925_v32, %v6145_v40  ;;  %v3980_v57 = vld [vmem:[#allocation7 + $0x188] sm:$0xff]  ;;  %v3992_v62 = vld [vmem:[#allocation7 + $0x180] sm:$0xff] }
  0x2f   :  { %6387 = vst [vmem:[#allocation14_spill] sm:$0xff] %v3950_v42  ;;  %v6142_v50 = vand.u32 4294901760, %v3947_v41  ;;  %v3971_v51 = vand.u32 4294901760, %v3939_v38  ;;  %203 = vmatpush1.msra.mxu0 %v3887_v17  ;;  %v306_v53 = vand.u32 4294901760, %v305_v43  ;;  %v312_v54 = vand.u32 4294901760, %v311_v44  ;;  %v4004_v7 = vld [vmem:[#allocation7 + $0x148] sm:$0xff] }
  0x30   :  { %v323_v55 = vsub.f32 %v3934_v36, %v6144_v45  ;;  %v6140_v56 = vand.u32 4294901760, %v3961_v46  ;;  %205 = vmatprep.subr.mxu0 %v3889_v18  ;;  %301 = vmatprep.subr.mxu1 %v300_v48  ;;  %v318_v58 = vand.u32 4294901760, %v317_v49  ;;  %v3987_v60 = vsub.f32 %v156_v14, %v3887_v17  ;;  %v4082_v45 = vld [vmem:[#allocation7 + $0xc0] sm:$0xff]  ;;  %v4095_v35 = vld [vmem:[#allocation7 + $0x88] sm:$0xff] }
  0x31   :  { %6388 = vst [vmem:[#allocation15_spill] sm:$0xff] %v3971_v51  ;;  %v329_v59 = vsub.f32 %v3947_v41, %v6142_v50  ;;  %v3990_v61 = vand.u32 4294901760, %v3963_v47  ;;  %207 = vmatpush1.msra.mxu0 %v3902_v23  ;;  %307 = vmatpush1.msra.mxu1 %v306_v53  ;;  %v3999_v2 = vsub.f32 %v149_v15, %v3889_v18  ;;  %v4002_v3 = vand.u32 4294901760, %v3973_v52  ;;  %v4015_v15 = vld [vmem:[#allocation7 + $0x140] sm:$0xff] }
  0x32   :  { %v324_v63 = vand.u32 4294901760, %v323_v55  ;;  %v335_v1 = vsub.f32 %v3961_v46, %v6140_v56  ;;  %209 = vmatprep.subr.mxu0 %v3908_v25  ;;  %313 = vmatprep.subr.mxu1 %v312_v54  ;;  %v6139_v9 = vand.u32 4294901760, %v3987_v60  ;;  %v4010_v13 = vsub.f32 %v3894_v20, %v3902_v23  ;;  %v4105_v34 = vld [vmem:[#allocation7 + $0x80] sm:$0xff] }
  0x33   :  { %6389 = vst [vmem:[#allocation16_spill] sm:$0xff] %v3990_v61  ;;  %6390 = vst [vmem:[#allocation17_spill] sm:$0xff] %v4002_v3  ;;  %v330_v8 = vand.u32 4294901760, %v329_v59  ;;  %v4013_v14 = vand.u32 4294901760, %v3980_v57  ;;  %211 = vmatpush1.msra.mxu0 %v3922_v31  ;;  %319 = vmatpush1.msra.mxu1 %v318_v58  ;;  %v6138_v43 = vand.u32 4294901760, %v3999_v2  ;;  %v4021_v44 = vsub.f32 %v3896_v21, %v3908_v25  ;;  %v4038_v21 = vld [vmem:[#allocation7 + $0x108] sm:$0xff] }
  0x34   :  { %v336_v39 = vand.u32 4294901760, %v335_v1  ;;  %v4024_v48 = vand.u32 4294901760, %v3992_v62  ;;  %213 = vmatprep.subr.mxu0 %v3928_v33  ;;  %325 = vmatprep.subr.mxu1 %v324_v63  ;;  %v341_v20 = vsub.f32 %v3987_v60, %v6139_v9  ;;  %v6141_v49 = vand.u32 4294901760, %v4010_v13  ;;  %v4061_v9 = vld [vmem:[#allocation7 + $0x100] sm:$0xff] }
  0x35   :  { %6391 = vst [vmem:[#allocation18_spill] sm:$0xff] %v4013_v14  ;;  %v4033_v53 = vsub.f32 %v3898_v22, %v3922_v31  ;;  %v4036_v54 = vand.u32 4294901760, %v4004_v7  ;;  %215 = vmatpush1.msra.mxu0 %v3937_v37  ;;  %331 = vmatpush1.msra.mxu1 %v330_v8  ;;  %v347_v55 = vsub.f32 %v3999_v2, %v6138_v43  ;;  %v6143_v58 = vand.u32 4294901760, %v4021_v44 }
  0x36   :  { %6392 = vst [vmem:[#allocation19_spill] sm:$0xff] %v4024_v48  ;;  %v4047_v59 = vsub.f32 %v3913_v27, %v3928_v33  ;;  %v4050_v22 = vand.u32 4294901760, %v4015_v15  ;;  %217 = vmatprep.subr.mxu0 %v3950_v42  ;;  %337 = vmatprep.subr.mxu1 %v336_v39  ;;  %v342_v63 = vand.u32 4294901760, %v341_v20  ;;  %v353_v1 = vsub.f32 %v4010_v13, %v6141_v49  ;;  %v4071_v49 = vld [vmem:[#allocation7 + $0xc8] sm:$0xff] }
  0x37   :  { %6393 = vst [vmem:[#allocation20_spill] sm:$0xff] %v4036_v54  ;;  %v6146_v8 = vand.u32 4294901760, %v4033_v53  ;;  %v4059_v43 = vsub.f32 %v3915_v28, %v3937_v37  ;;  %219 = vmatpush1.msra.mxu0 %v3971_v51  ;;  %v348_v27 = vand.u32 4294901760, %v347_v55  ;;  %v359_v39 = vsub.f32 %v4021_v44, %v6143_v58 }
  0x38   :  { %6394 = vst [vmem:[#allocation21_spill] sm:$0xff] %v4050_v22  ;;  %v6148_v20 = vand.u32 4294901760, %v4047_v59  ;;  %v4069_v56 = vand.u32 4294901760, %v4038_v21  ;;  %343 = vmatpush1.msra.mxu1 %v342_v63  ;;  %221 = vmatprep.subr.mxu0 %v3990_v61  ;;  %v354_v28 = vand.u32 4294901760, %v353_v1  ;;  %v4080_v58 = vsub.f32 %v3917_v29, %v3950_v42 }
  0x39   :  { %v365_v50 = vsub.f32 %v4033_v53, %v6146_v8  ;;  %v6151_v55 = vand.u32 4294901760, %v4059_v43  ;;  %349 = vmatprep.subr.mxu1 %v348_v27  ;;  %223 = vmatpush1.msra.mxu0 %v4002_v3  ;;  %v360_v40 = vand.u32 4294901760, %v359_v39  ;;  %v4089_v1 = vand.u32 4294901760, %v4061_v9 }
  0x3a   :  { %6395 = vst [vmem:[#allocation22_spill] sm:$0xff] %v4069_v56  ;;  %v371_v63 = vsub.f32 %v4047_v59, %v6148_v20  ;;  %v4093_v8 = vsub.f32 %v3939_v38, %v3971_v51  ;;  %355 = vmatpush1.msra.mxu1 %v354_v28  ;;  %225 = vmatprep.subr.mxu0 %v4013_v14  ;;  %v6156_v39 = vand.u32 4294901760, %v4080_v58  ;;  %v4103_v20 = vand.u32 4294901760, %v4071_v49 }
  0x3b   :  { %6396 = vst [vmem:[#allocation23_spill] sm:$0xff] %v4089_v1  ;;  %v366_v29 = vand.u32 4294901760, %v365_v50  ;;  %v377_v27 = vsub.f32 %v4059_v43, %v6151_v55  ;;  %361 = vmatprep.subr.mxu1 %v360_v40  ;;  %227 = vmatpush1.msra.mxu0 %v4024_v48  ;;  %v4111_v50 = vsub.f32 %v3963_v47, %v3990_v61  ;;  %v4114_v30 = vand.u32 4294901760, %v4082_v45  ;;  %v4116_v55 = vld [vmem:[#allocation7 + $0x48] sm:$0xff] }
  0x3c   :  { %6397 = vst [vmem:[#allocation24_spill] sm:$0xff] %v4103_v20  ;;  %v372_v38 = vand.u32 4294901760, %v371_v63  ;;  %v6159_v28 = vand.u32 4294901760, %v4093_v8  ;;  %229 = vmatprep.subr.mxu0 %v4036_v54  ;;  %v383_v40 = vsub.f32 %v4080_v58, %v6156_v39  ;;  %v4124_v63 = vsub.f32 %v3973_v52, %v4002_v3  ;;  %v4141_v52 = vld [vmem:[#allocation7 + $0x40] sm:$0xff] }
  0x3d   :  { %6398 = vst [vmem:[#allocation25_spill] sm:$0xff] %v4114_v30  ;;  %367 = vmatpush1.msra.mxu1 %v366_v29  ;;  %v378_v0 = vand.u32 4294901760, %v377_v27  ;;  %v4127_v47 = vand.u32 4294901760, %v4095_v35  ;;  %231 = vmatpush1.msra.mxu0 %v4050_v22  ;;  %v4136_v61 = vsub.f32 %v3980_v57, %v4013_v14  ;;  %v4139_v39 = vand.u32 4294901760, %v4105_v34  ;;  %v4152_v57 = vld [vmem:[#allocation7 + $0x8] sm:$0xff] }
  0x3e   :  { %373 = vmatprep.subr.mxu1 %v372_v38  ;;  %v389_v29 = vsub.f32 %v4093_v8, %v6159_v28  ;;  %233 = vmatprep.subr.mxu0 %v4069_v56  ;;  %v384_v38 = vand.u32 4294901760, %v383_v40  ;;  %v4147_v28 = vsub.f32 %v3992_v62, %v4024_v48  ;;  %v4150_v27 = vand.u32 4294901760, %v4116_v55  ;;  %v4175_v40 = vld [vmem:[#allocation7] sm:$0xff] }
  0x3f   :  { %6399 = vst [vmem:[#allocation26_spill] sm:$0xff] %v4127_v47  ;;  %6400 = vst [vmem:[#allocation27_spill] sm:$0xff] %v4139_v39  ;;  %379 = vmatpush1.msra.mxu1 %v378_v0  ;;  %235 = vmatpush1.msra.mxu0 %v4089_v1  ;;  %v6402_v51 = vand.u32 4294901760, %v4111_v50  ;;  %v4161_v3 = vsub.f32 %v4004_v7, %v4036_v54  ;;  %v6404_v62 = vand.u32 4294901760, %v4124_v63  ;;  %v4183_v42 = vand.u32 4294901760, %v4152_v57 }
  0x40   :  { %6401 = vst [vmem:[#allocation28_spill] sm:$0xff] %v4150_v27  ;;  %v390_v14 = vand.u32 4294901760, %v389_v29  ;;  %385 = vmatprep.subr.mxu1 %v384_v38  ;;  %237 = vmatprep.subr.mxu0 %v4103_v20  ;;  %v4169_v29 = vand.u32 4294901760, %v4141_v52  ;;  %v6405_v38 = vand.u32 4294901760, %v4136_v61 }
  0x41   :  { %v395_v0 = vsub.f32 %v4111_v50, %v6402_v51  ;;  %6403 = vst [vmem:[#allocation29_spill] sm:$0xff] %v4161_v3  ;;  %v401_v48 = vsub.f32 %v4124_v63, %v6404_v62  ;;  %v4173_v51 = vsub.f32 %v4015_v15, %v4050_v22  ;;  %239 = vmatpush1.msra.mxu0 %v4114_v30  ;;  %v6406_v15 = vand.u32 4294901760, %v4147_v28 }
  0x42   :  { %391 = vmatpush1.msra.mxu1 %v390_v14  ;;  %v407_v54 = vsub.f32 %v4136_v61, %v6405_v38  ;;  %241 = vmatprep.subr.mxu0 %v4127_v47  ;;  %v59_v38 = vld [vmem:[%s6135_s2] sm:$0x3]  ;;  %v4206_v14 = vsub.f32 %v4061_v9, %v4089_v1  ;;  %s3835_s2 = smov [#allocation8]  }
  0x43   :  { %v396_v7 = vand.u32 4294901760, %v395_v0  ;;  %v402_v37 = vand.u32 4294901760, %v401_v48  ;;  %v413_v22 = vsub.f32 %v4147_v28, %v6406_v15  ;;  %v4192_v0 = vsub.f32 %v4038_v21, %v4069_v56  ;;  %243 = vmatpush1.msra.mxu0 %v4139_v39  ;;  %s3712_s5 = sshll.u32 %s3835_s2, 4  ;;  %s3713_s5 = int_to_ptr.vmem [resolvable:$true] %s3712_s5 }
  0x44   :  { %v408_v62 = vand.u32 4294901760, %v407_v54  ;;  %v6407_v48 = vand.u32 4294901760, %v4161_v3  ;;  %v4202_v15 = vand.u32 4294901760, %v4175_v40  ;;  %245 = vmatprep.subr.mxu0 %v4150_v27  ;;  %v6183_v9 = vand.u32 4294901760, %v4206_v14  ;;  %s3802_s6 = scalar_lea.vmem %s3713_s5, 256  ;;  %p3807_p2 = scmp.lt.s32.totalorder %s3713_s5, %s3713_s5 }
  0x45   :  { %397 = vmatprep.subr.mxu1 %v396_v7  ;;  %v414_v21 = vand.u32 4294901760, %v413_v22  ;;  %v6408_v7 = vand.u32 4294901760, %v4173_v51  ;;  %v6180_v56 = vand.u32 4294901760, %v4192_v0  ;;  %247 = vmatpush1.msra.mxu0 %v4169_v29  ;;  %v4223_v22 = vsub.f32 %v4082_v45, %v4114_v30  ;;  %p3803_p1 = scmp.ne.s32.totalorder %s3713_s5, %s3802_s6  ;;  %p3808_p3 = scmp.lt.s32.totalorder %s3802_s6, %s3802_s6 }
  0x46   :  { %v419_v33 = vsub.f32 %v4161_v3, %v6407_v48  ;;  %403 = vmatpush1.msra.mxu1 %v402_v37  ;;  %v4215_v48 = vsub.f32 %v4071_v49, %v4103_v20  ;;  %v4219_v37 = vand.u32 4294901760, %v59_v38  ;;  %249 = vmatprep.subr.mxu0 %v4183_v42  ;;  %v437_v45 = vsub.f32 %v4206_v14, %v6183_v9 }
  0x47   :  { %v425_v54 = vsub.f32 %v4173_v51, %v6408_v7  ;;  %409 = vmatprep.subr.mxu1 %v408_v62  ;;  %v431_v49 = vsub.f32 %v4192_v0, %v6180_v56  ;;  %v4232_v62 = vsub.f32 %v4095_v35, %v4127_v47  ;;  %251 = vmatpush1.msra.mxu0 %v4202_v15  ;;  %p3809_p4 = por %p3808_p3, %p3807_p2 }
  0x48   :  { %v420_v3 = vand.u32 4294901760, %v419_v33  ;;  %6409 = vst [vmem:[#allocation30_spill] sm:$0xff] %v4219_v37  ;;  %415 = vmatpush1.msra.mxu1 %v414_v21  ;;  %v4239_v21 = vsub.f32 %v59_v38, %v4219_v37  ;;  %v4244_v56 = vsub.f32 %v4105_v34, %v4139_v39  ;;  %v6411_v35 = vand.u32 4294901760, %v4215_v48  ;;  %530 = vmatprep.subr.mxu0 %v3892_v19 }
  0x49   :  { %v426_v7 = vand.u32 4294901760, %v425_v54  ;;  %v432_v33 = vand.u32 4294901760, %v431_v49  ;;  %v6190_v47 = vand.u32 4294901760, %v4232_v62  ;;  %v4253_v38 = vsub.f32 %v4116_v55, %v4150_v27  ;;  %p3810_p5 = pnand %p3809_p4, %p3803_p1 }
  0x4a   :  { %421 = vmatprep.subr.mxu1 %v420_v3  ;;  %6410 = vst [vmem:[#allocation31_spill] sm:$0xff] %v4239_v21  ;;  %v443_v3 = vsub.f32 %v4215_v48, %v6411_v35  ;;  %v438_v9 = vand.u32 4294901760, %v437_v45  ;;  %v4256_v54 = vand.u32 4294901760, %v4239_v21  ;;  %v6413_v34 = vand.u32 4294901760, %v4223_v22 }
  0x4b   :  { %427 = vmatpush1.msra.mxu1 %v426_v7  ;;  %v6191_v49 = vand.u32 4294901760, %v4244_v56  ;;  %v455_v39 = vsub.f32 %v4232_v62, %v6190_v47  ;;  %v6197_v30 = vand.u32 4294901760, %v4253_v38  ;;  %v4268_v55 = vsub.f32 %v4141_v52, %v4169_v29 }
  0x4c   :  { %6412 = vst [vmem:[#allocation32_spill] sm:$0xff] %v4256_v54  ;;  %v449_v7 = vsub.f32 %v4223_v22, %v6413_v34  ;;  %433 = vmatprep.subr.mxu1 %v432_v33  ;;  %v444_v35 = vand.u32 4294901760, %v443_v3  ;;  %v288_v45 = vsub.f32 %v4239_v21, %v4256_v54  ;;  %v4277_v3 = vsub.f32 %v4152_v57, %v4183_v42 }
  0x4d   :  { %6414 = vst [vmem:[#allocation33_spill] sm:$0xff] %v4268_v55  ;;  %439 = vmatpush1.msra.mxu1 %v438_v9  ;;  %v461_v33 = vsub.f32 %v4244_v56, %v6191_v49  ;;  %v456_v34 = vand.u32 4294901760, %v455_v39  ;;  %v467_v52 = vsub.f32 %v4253_v38, %v6197_v30  ;;  %v6196_v9 = vand.u32 4294901760, %v4268_v55  ;;  %v6429_v30 = vld [vmem:[#allocation22_spill] sm:$0xff] }
  0x4e   :  { %v450_v27 = vand.u32 4294901760, %v449_v7  ;;  %445 = vmatprep.subr.mxu1 %v444_v35  ;;  %v4285_v47 = vsub.f32 %v4175_v40, %v4202_v15  ;;  %v4287_v7 = vand.u32 4294901760, %v288_v45  ;;  %v6195_v54 = vand.u32 4294901760, %v4277_v3 }
  0x4f   :  { %v462_v49 = vand.u32 4294901760, %v461_v33  ;;  %v468_v57 = vand.u32 4294901760, %v467_v52  ;;  %v473_v39 = vsub.f32 %v4268_v55, %v6196_v9  ;;  %v6418_v52 = vld [vmem:[#allocation12_spill] sm:$0xff]  ;;  %v6428_v9 = vld [vmem:[#allocation21_spill] sm:$0xff] }
  0x50   :  { %6415 = vst [vmem:[#allocation34_spill] sm:$0xff] %v4285_v47  ;;  %6416 = vst [vmem:[#allocation35_spill] sm:$0xff] %v4287_v7  ;;  %451 = vmatpush1.msra.mxu1 %v450_v27  ;;  %v6194_v35 = vand.u32 4294901760, %v4285_v47  ;;  %290 = vmatmul.mubr.f32.vlgmr.msra.gmra.mxu0 %v4287_v7  ;;  %v479_v40 = vsub.f32 %v4277_v3, %v6195_v54  ;;  %v6427_v54 = vld [vmem:[#allocation20_spill] sm:$0xff]  ;;  %v6430_v7 = vand.u32 4294901760, %v3892_v19  ;;  %v6438_v19 = vand.u32 4294901760, %v3934_v36 }
  0x51   :  { %457 = vmatprep.subr.mxu1 %v456_v34  ;;  %533 = vmatpush1.msra.mxu0 %v3905_v24  ;;  %v474_v27 = vand.u32 4294901760, %v473_v39  ;;  %v6417_v34 = vmov 0.0   ;;  %v6420_v39 = vld [vmem:[#allocation13_spill] sm:$0xff] }
  0x52   :  { %463 = vmatpush1.msra.mxu1 %v462_v49  ;;  %v485_v45 = vsub.f32 %v4285_v47, %v6194_v35  ;;  %536 = vmatprep.subr.mxu0 %v3911_v26  ;;  %v480_v33 = vand.u32 4294901760, %v479_v40  ;;  %v6421_v40 = vld [vmem:[#allocation14_spill] sm:$0xff]  ;;  %v6426_v35 = vld [vmem:[#allocation19_spill] sm:$0xff] }
  0x53   :  { %469 = vmatprep.subr.mxu1 %v468_v57  ;;  %656 = vmatprep.mubr.f32.mxu0 %v6417_v34  ;;  %v6419_v57 = vld [vmem:[#allocation29_spill] sm:$0xff] }
  0x54   :  { %539 = vmatpush1.msra.mxu0 %v3925_v32  ;;  %475 = vmatpush1.msra.mxu1 %v474_v27  ;;  %v486_v49 = vand.u32 4294901760, %v485_v45  ;;  %v6422_v27 = vld [vmem:[#allocation15_spill] sm:$0xff]  ;;  %v6423_v45 = vld [vmem:[#allocation16_spill] sm:$0xff] }
  0x55   :  { %542 = vmatprep.subr.mxu0 %v3934_v36  ;;  %481 = vmatprep.subr.mxu1 %v480_v33  ;;  %v6424_v33 = vld [vmem:[#allocation17_spill] sm:$0xff]  ;;  %v6443_v36 = vand.u32 4294901760, %v3999_v2 }
  0x56   :  { %545 = vmatpush1.msra.mxu0 %v3947_v41  ;;  %487 = vmatpush1.msra.mxu1 %v486_v49  ;;  %v6425_v49 = vld [vmem:[#allocation18_spill] sm:$0xff] }
  0x57   :  { %548 = vmatprep.subr.mxu0 %v3961_v46  ;;  %522 = vmatmul.mubr.f32.vlgmr.msra.gmra.mxu1 %v4219_v37  ;;  %v6431_v37 = vld [vmem:[#allocation25_spill] sm:$0xff] }
  0x58   :  { %551 = vmatpush1.msra.mxu0 %v3987_v60  ;;  %666 = vmatprep.subr.mxu1 %v3872_v4 }
  0x59   :  { %554 = vmatprep.subr.mxu0 %v3999_v2  ;;  %668 = vmatpush1.msra.mxu1 %v3874_v5  ;;  %v6447_v2 = vand.u32 4294901760, %v4047_v59 }
  0x5a   :  { %557 = vmatpush1.msra.mxu0 %v4010_v13  ;;  %670 = vmatprep.subr.mxu1 %v3876_v6 }
  0x5b   :  { %560 = vmatprep.subr.mxu0 %v4021_v44  ;;  %672 = vmatpush1.msra.mxu1 %v3878_v10 }
  0x5c   :  { %563 = vmatpush1.msra.mxu0 %v4033_v53  ;;  %674 = vmatprep.subr.mxu1 %v3880_v11 }
  0x5d   :  { %566 = vmatprep.subr.mxu0 %v4047_v59  ;;  %676 = vmatpush1.msra.mxu1 %v3882_v12  ;;  %v6454_v59 = vand.u32 4294901760, %v4147_v28 }
  0x5e   :  { %569 = vmatpush1.msra.mxu0 %v4059_v43  ;;  %678 = vmatprep.subr.mxu1 %v3885_v16 }
  0x5f   :  { %572 = vmatprep.subr.mxu0 %v4080_v58  ;;  %680 = vmatpush1.msra.mxu1 %v3887_v17 }
  0x60   :  { %575 = vmatpush1.msra.mxu0 %v4093_v8  ;;  %682 = vmatprep.subr.mxu1 %v3889_v18 }
  0x61   :  { %578 = vmatprep.subr.mxu0 %v4111_v50  ;;  %684 = vmatpush1.msra.mxu1 %v3902_v23 }
  0x62   :  { %581 = vmatpush1.msra.mxu0 %v4124_v63  ;;  %686 = vmatprep.subr.mxu1 %v3908_v25 }
  0x63   :  { %584 = vmatprep.subr.mxu0 %v4136_v61  ;;  %688 = vmatpush1.msra.mxu1 %v3922_v31 }
  0x64   :  { %587 = vmatpush1.msra.mxu0 %v4147_v28  ;;  %690 = vmatprep.subr.mxu1 %v6418_v52  ;;  %v158_v28 = vld [vmem:[#allocation7 + $0x310] sm:$0xff] }
  0x65   :  { %590 = vmatprep.subr.mxu0 %v6419_v57  ;;  %692 = vmatpush1.msra.mxu1 %v6420_v39 }
  0x66   :  { %593 = vmatpush1.msra.mxu0 %v4173_v51  ;;  %694 = vmatprep.subr.mxu1 %v6421_v40 }
  0x67   :  { %596 = vmatprep.subr.mxu0 %v4192_v0  ;;  %696 = vmatpush1.msra.mxu1 %v6422_v27 }
  0x68   :  { %599 = vmatpush1.msra.mxu0 %v4206_v14  ;;  %698 = vmatprep.subr.mxu1 %v6423_v45 }
  0x69   :  { %602 = vmatprep.subr.mxu0 %v4215_v48  ;;  %700 = vmatpush1.msra.mxu1 %v6424_v33 }
  0x6a   :  { %605 = vmatpush1.msra.mxu0 %v4223_v22  ;;  %702 = vmatprep.subr.mxu1 %v6425_v49 }
  0x6b   :  { %608 = vmatprep.subr.mxu0 %v4232_v62  ;;  %704 = vmatpush1.msra.mxu1 %v6426_v35 }
  0x6c   :  { %611 = vmatpush1.msra.mxu0 %v4244_v56  ;;  %706 = vmatprep.subr.mxu1 %v6427_v54 }
  0x6d   :  { %614 = vmatprep.subr.mxu0 %v4253_v38  ;;  %708 = vmatpush1.msra.mxu1 %v6428_v9  ;;  %v6432_v9 = vand.u32 4294901760, %v3905_v24  ;;  %v6439_v24 = vand.u32 4294901760, %v3947_v41  ;;  %v6444_v41 = vand.u32 4294901760, %v4010_v13  ;;  %v182_v13 = vld [vmem:[#allocation7 + $0x3d0] sm:$0xff] }
  0x6e   :  { %617 = vmatpush1.msra.mxu0 %v4268_v55  ;;  %710 = vmatprep.subr.mxu1 %v6429_v30  ;;  %v6433_v55 = vld [vmem:[#allocation26_spill] sm:$0xff]  ;;  %v6434_v30 = vand.u32 4294901760, %v3911_v26  ;;  %v6440_v26 = vand.u32 4294901760, %v3961_v46  ;;  %v6445_v46 = vand.u32 4294901760, %v4021_v44  ;;  %v6450_v44 = vand.u32 4294901760, %v4093_v8  ;;  %v166_v8 = vld [vmem:[#allocation7 + $0x350] sm:$0xff] }
  0x6f   :  { %620 = vmatprep.subr.mxu0 %v4277_v3  ;;  %712 = vmatpush1.msra.mxu1 %v4089_v1  ;;  %v6435_v1 = vld [vmem:[#allocation27_spill] sm:$0xff] }
  0x70   :  { %623 = vmatpush1.msra.mxu0 %v4285_v47  ;;  %714 = vmatprep.subr.mxu1 %v4103_v20  ;;  %v6436_v47 = vand.u32 4294901760, %v3925_v32  ;;  %v6437_v20 = vld [vmem:[#allocation28_spill] sm:$0xff] }
  0x71   :  { %659 = vmatmul.mubr.f32.vlgmr.msra.gmra.mxu0 %v4239_v21  ;;  %774 = vmatprep.subr.mxu0 %v6430_v7  ;;  %v6442_v32 = vld [vmem:[#allocation32_spill] sm:$0xff]  ;;  %v4452_v7 = vand.u32 4294901760, %v166_v8 }
  0x72   :  { %716 = vmatpush1.msra.mxu1 %v6431_v37  ;;  %778 = vmatpush1.msra.mxu0 %v6432_v9  ;;  %v6458_v9 = vand.u32 4294901760, %v4206_v14  ;;  %v151_v14 = vld [vmem:[#allocation7 + $0x2d8] sm:$0xff] }
  0x73   :  { %718 = vmatprep.subr.mxu1 %v6433_v55  ;;  %782 = vmatprep.subr.mxu0 %v6434_v30  ;;  %v6441_v30 = vand.u32 4294901760, %v3987_v60  ;;  %v6446_v60 = vand.u32 4294901760, %v4033_v53  ;;  %v6453_v53 = vand.u32 4294901760, %v4136_v61  ;;  %v6456_v61 = vand.u32 4294901760, %v4173_v51  ;;  %6459 = vst [vmem:[#allocation12_spill] sm:$0xff] %v4452_v7 }
  0x74   :  { %720 = vmatpush1.msra.mxu1 %v6435_v1  ;;  %786 = vmatpush1.msra.mxu0 %v6436_v47 }
  0x75   :  { %722 = vmatprep.subr.mxu1 %v6437_v20  ;;  %790 = vmatprep.subr.mxu0 %v6438_v19 }
  0x76   :  { %724 = vmatpush1.msra.mxu1 %v4169_v29  ;;  %794 = vmatpush1.msra.mxu0 %v6439_v24 }
  0x77   :  { %726 = vmatprep.subr.mxu1 %v4183_v42  ;;  %798 = vmatprep.subr.mxu0 %v6440_v26  ;;  %v6463_v26 = vand.u32 4294901760, %v4232_v62 }
  0x78   :  { %728 = vmatpush1.msra.mxu1 %v4202_v15  ;;  %761 = vmatprep.mubr.f32.mxu1 %v6417_v34 }
  0x79   :  { %802 = vmatpush1.msra.mxu0 %v6441_v30  ;;  %765 = vmatmul.mubr.f32.vlgmr.msra.gmra.mxu1 %v6442_v32 }
  0x7a   :  { %806 = vmatprep.subr.mxu0 %v6443_v36  ;;  %940 = vmatprep.subr.mxu1 %v3872_v4  ;;  %v6448_v4 = vand.u32 4294901760, %v4059_v43  ;;  %v6465_v36 = vand.u32 4294901760, %v4244_v56  ;;  %v134_v56 = vld [vmem:[#allocation7 + $0x250] sm:$0xff] }
  0x7b   :  { %810 = vmatpush1.msra.mxu0 %v6444_v41  ;;  %942 = vmatpush1.msra.mxu1 %v3874_v5  ;;  %v6449_v5 = vand.u32 4294901760, %v4080_v58  ;;  %v4480_v41 = vsub.f32 %v166_v8, %v4452_v7 }
  0x7c   :  { %814 = vmatprep.subr.mxu0 %v6445_v46  ;;  %944 = vmatprep.subr.mxu1 %v3876_v6  ;;  %v183_v6 = vld [vmem:[#allocation7 + $0x3d8] sm:$0xff] }
  0x7d   :  { %818 = vmatpush1.msra.mxu0 %v6446_v60  ;;  %946 = vmatpush1.msra.mxu1 %v3878_v10  ;;  %v174_v10 = vld [vmem:[#allocation7 + $0x390] sm:$0xff]  ;;  %v4415_v43 = vand.u32 4294901760, %v183_v6  ;;  %v4490_v60 = vand.u32 4294901760, %v151_v14  ;;  %v6206_v8 = vand.u32 4294901760, %v4480_v41 }
  0x7e   :  { %822 = vmatprep.subr.mxu0 %v6447_v2  ;;  %948 = vmatprep.subr.mxu1 %v3880_v11  ;;  %v6451_v11 = vand.u32 4294901760, %v4111_v50  ;;  %v4422_v58 = vand.u32 4294901760, %v174_v10 }
  0x7f   :  { %826 = vmatpush1.msra.mxu0 %v6448_v4  ;;  %950 = vmatpush1.msra.mxu1 %v3882_v12  ;;  %v6452_v12 = vand.u32 4294901760, %v4124_v63  ;;  %v6457_v63 = vand.u32 4294901760, %v4192_v0  ;;  %v4457_v0 = vand.u32 4294901760, %v158_v28  ;;  %6468 = vst [vmem:[#allocation15_spill] sm:$0xff] %v4490_v60  ;;  %v6470_v4 = vld [vmem:[#allocation33_spill] sm:$0xff] }
  0x80   :  { %830 = vmatprep.subr.mxu0 %v6449_v5  ;;  %952 = vmatprep.subr.mxu1 %v3885_v16  ;;  %v4417_v16 = vand.u32 4294901760, %v182_v13  ;;  %v4445_v47 = vsub.f32 %v174_v10, %v4422_v58  ;;  %v6472_v5 = vld [vmem:[#allocation21_spill] sm:$0xff]  ;;  %v6474_v10 = vand.u32 4294901760, %v4277_v3 }
  0x81   :  { %834 = vmatpush1.msra.mxu0 %v6450_v44  ;;  %954 = vmatpush1.msra.mxu1 %v3887_v17  ;;  %v175_v17 = vld [vmem:[#allocation7 + $0x398] sm:$0xff]  ;;  %6461 = vst [vmem:[#allocation29_spill] sm:$0xff] %v4457_v0  ;;  %v4488_v46 = vsub.f32 %v158_v28, %v4457_v0  ;;  %v6479_v28 = vld [vmem:[#allocation23_spill] sm:$0xff] }
  0x82   :  { %838 = vmatprep.subr.mxu0 %v6451_v11  ;;  %956 = vmatprep.subr.mxu1 %v3889_v18  ;;  %v167_v18 = vld [vmem:[#allocation7 + $0x358] sm:$0xff]  ;;  %v4436_v50 = vand.u32 4294901760, %v175_v17  ;;  %v6208_v30 = vand.u32 4294901760, %v4445_v47  ;;  %v6475_v11 = vld [vmem:[#allocation22_spill] sm:$0xff] }
  0x83   :  { %842 = vmatpush1.msra.mxu0 %v6452_v12  ;;  %958 = vmatpush1.msra.mxu1 %v3902_v23  ;;  %v6455_v23 = vand.u32 4294901760, %v6419_v57  ;;  %v4447_v51 = vand.u32 4294901760, %v167_v18  ;;  %v6460_v57 = vand.u32 4294901760, %v4215_v48  ;;  %v142_v48 = vld [vmem:[#allocation7 + $0x290] sm:$0xff]  ;;  %v135_v44 = vld [vmem:[#allocation7 + $0x258] sm:$0xff] }
  0x84   :  { %846 = vmatprep.subr.mxu0 %v6453_v53  ;;  %960 = vmatprep.subr.mxu1 %v3908_v25  ;;  %v4434_v25 = vsub.f32 %v182_v13, %v4417_v16  ;;  %v4465_v24 = vsub.f32 %v175_v17, %v4436_v50  ;;  %v4492_v2 = vand.u32 4294901760, %v142_v48  ;;  %v4516_v12 = vsub.f32 %v4445_v47, %v6208_v30 }
  0x85   :  { %850 = vmatpush1.msra.mxu0 %v6454_v59  ;;  %962 = vmatpush1.msra.mxu1 %v3922_v31  ;;  %v4439_v31 = vsub.f32 %v183_v6, %v4415_v43  ;;  %v6476_v59 = vld [vmem:[#allocation34_spill] sm:$0xff] }
  0x86   :  { %854 = vmatprep.subr.mxu0 %v6455_v23  ;;  %964 = vmatprep.subr.mxu1 %v6418_v52  ;;  %v159_v52 = vld [vmem:[#allocation7 + $0x318] sm:$0xff]  ;;  %6469 = vst [vmem:[#allocation16_spill] sm:$0xff] %v4492_v2  ;;  %v6209_v13 = vand.u32 4294901760, %v4465_v24  ;;  %v4528_v23 = vand.u32 4294901760, %v134_v56 }
  0x87   :  { %858 = vmatpush1.msra.mxu0 %v6456_v61  ;;  %966 = vmatpush1.msra.mxu1 %v6420_v39  ;;  %v150_v39 = vld [vmem:[#allocation7 + $0x2d0] sm:$0xff]  ;;  %v6212_v19 = vand.u32 4294901760, %v4439_v31  ;;  %v127_v61 = vld [vmem:[#allocation7 + $0x218] sm:$0xff] }
  0x88   :  { %862 = vmatprep.subr.mxu0 %v6457_v63  ;;  %968 = vmatprep.subr.mxu1 %v6421_v40  ;;  %v6462_v40 = vand.u32 4294901760, %v4223_v22  ;;  %v143_v22 = vld [vmem:[#allocation7 + $0x298] sm:$0xff]  ;;  %v4482_v62 = vand.u32 4294901760, %v150_v39  ;;  %6478 = vst [vmem:[#allocation18_spill] sm:$0xff] %v4528_v23  ;;  %v6480_v63 = vld [vmem:[#allocation30_spill] sm:$0xff] }
  0x89   :  { %866 = vmatpush1.msra.mxu0 %v6458_v9  ;;  %970 = vmatpush1.msra.mxu1 %v6422_v27  ;;  %v6211_v27 = vand.u32 4294901760, %v4434_v25  ;;  %v4507_v6 = vand.u32 4294901760, %v143_v22  ;;  %v4534_v9 = vsub.f32 %v142_v48, %v4492_v2  ;;  %v4549_v48 = vsub.f32 %v4465_v24, %v6209_v13 }
  0x8a   :  { %870 = vmatprep.subr.mxu0 %v6460_v57  ;;  %972 = vmatprep.subr.mxu1 %v6423_v45  ;;  %v4470_v45 = vand.u32 4294901760, %v159_v52  ;;  %6466 = vst [vmem:[#allocation14_spill] sm:$0xff] %v4482_v62  ;;  %v4526_v3 = vsub.f32 %v150_v39, %v4482_v62  ;;  %v126_v57 = vld [vmem:[#allocation7 + $0x210] sm:$0xff]  ;;  %v4540_v39 = vsub.f32 %v151_v14, %v4490_v60  ;;  %v103_v14 = vld [vmem:[#allocation7 + $0x158] sm:$0xff] }
  0x8b   :  { %874 = vmatpush1.msra.mxu0 %v6462_v40  ;;  %974 = vmatpush1.msra.mxu1 %v6424_v33  ;;  %v4474_v33 = vsub.f32 %v167_v18, %v4447_v51  ;;  %6473 = vst [vmem:[#allocation17_spill] sm:$0xff] %v4507_v6  ;;  %v6477_v18 = vand.u32 4294901760, %v6476_v59  ;;  %v6210_v40 = vand.u32 4294901760, %v4488_v46  ;;  %v4575_v59 = vand.u32 4294901760, %v126_v57 }
  0x8c   :  { %878 = vmatprep.subr.mxu0 %v6463_v26  ;;  %976 = vmatprep.subr.mxu1 %v6425_v49  ;;  %6464 = vst [vmem:[#allocation13_spill] sm:$0xff] %v4470_v45  ;;  %v6467_v49 = vand.u32 4294901760, %v4253_v38  ;;  %v4500_v38 = vsub.f32 %v4439_v31, %v6212_v19  ;;  %v4520_v17 = vsub.f32 %v159_v52, %v4470_v45  ;;  %v4536_v52 = vand.u32 4294901760, %v135_v44  ;;  %v6482_v26 = vld [vmem:[#allocation24_spill] sm:$0xff] }
  0x8d   :  { %882 = vmatpush1.msra.mxu0 %v6465_v36  ;;  %978 = vmatpush1.msra.mxu1 %v6426_v35  ;;  %v6471_v35 = vand.u32 4294901760, %v6470_v4  ;;  %v6207_v53 = vand.u32 4294901760, %v4474_v33  ;;  %v118_v4 = vld [vmem:[#allocation7 + $0x1d0] sm:$0xff]  ;;  %6484 = vst [vmem:[#allocation25_spill] sm:$0xff] %v4575_v59  ;;  %v4615_v19 = vsub.f32 %v126_v57, %v4575_v59  ;;  %v4654_v21 = vand.u32 4294901760, %v103_v14 }
  0x8e   :  { %886 = vmatprep.subr.mxu0 %v6467_v49  ;;  %980 = vmatprep.subr.mxu1 %v6427_v54  ;;  %v4505_v54 = vsub.f32 %v4434_v25, %v6211_v27  ;;  %6481 = vst [vmem:[#allocation19_spill] sm:$0xff] %v4536_v52  ;;  %v1155_v36 = vand.u32 4294901760, %v4500_v38  ;;  %v4562_v38 = vand.u32 4294901760, %v127_v61  ;;  %v94_v49 = vld [vmem:[#allocation7 + $0x110] sm:$0xff] }
  0x8f   :  { %890 = vmatpush1.msra.mxu0 %v6471_v35  ;;  %982 = vmatpush1.msra.mxu1 %v6472_v5  ;;  %v4552_v35 = vsub.f32 %v143_v22, %v4507_v6  ;;  %v4560_v5 = vsub.f32 %v4474_v33, %v6207_v53  ;;  %v4573_v22 = vsub.f32 %v4480_v41, %v6206_v8  ;;  %v111_v8 = vld [vmem:[#allocation7 + $0x198] sm:$0xff] }
  0x90   :  { %894 = vmatprep.subr.mxu0 %v6474_v10  ;;  %984 = vmatprep.subr.mxu1 %v6475_v11  ;;  %6483 = vst [vmem:[#allocation20_spill] sm:$0xff] %v4562_v38  ;;  %v6213_v10 = vand.u32 4294901760, %v4520_v17  ;;  %v110_v11 = vld [vmem:[#allocation7 + $0x190] sm:$0xff]  ;;  %v4589_v53 = vsub.f32 %v135_v44, %v4536_v52  ;;  %6489 = vst [vmem:[#allocation21_spill] sm:$0xff] %v4615_v19 }
  0x91   :  { %898 = vmatpush1.msra.mxu0 %v6477_v18  ;;  %931 = vmatprep.mubr.f32.mxu0 %v6417_v34  ;;  %v119_v18 = vld [vmem:[#allocation7 + $0x1d8] sm:$0xff]  ;;  %v6218_v30 = vand.u32 4294901760, %v4552_v35  ;;  %v4595_v13 = vand.u32 4294901760, %v110_v11  ;;  %v1179_v27 = vand.u32 4294901760, %v4560_v5  ;;  %6491 = vst [vmem:[#allocation34_spill] sm:$0xff] %v4654_v21 }
  0x92   :  { %986 = vmatpush1.msra.mxu1 %v6479_v28  ;;  %933 = vmatmul.mubr.f32.vlgmr.msra.gmra.mxu0 %v6480_v63  ;;  %v6214_v28 = vand.u32 4294901760, %v4526_v3  ;;  %v4606_v44 = vand.u32 4294901760, %v119_v18 }
  0x93   :  { %988 = vmatprep.subr.mxu1 %v6482_v26  ;;  %1044 = vmatprep.subr.mxu0 %v4415_v43  ;;  %v4586_v26 = vand.u32 4294901760, %v118_v4  ;;  %6486 = vst [vmem:[#allocation27_spill] sm:$0xff] %v4595_v13 }
  0x94   :  { %990 = vmatpush1.msra.mxu1 %v6431_v37  ;;  %1046 = vmatpush1.msra.mxu0 %v4417_v16  ;;  %v4568_v37 = vsub.f32 %v134_v56, %v4528_v23  ;;  %v6215_v56 = vand.u32 4294901760, %v4540_v39  ;;  %6487 = vst [vmem:[#allocation28_spill] sm:$0xff] %v4606_v44  ;;  %v4620_v5 = vsub.f32 %v4526_v3, %v6214_v28  ;;  %v102_v28 = vld [vmem:[#allocation7 + $0x150] sm:$0xff] }
  0x95   :  { %992 = vmatprep.subr.mxu1 %v6433_v55  ;;  %1048 = vmatprep.subr.mxu0 %v4436_v50  ;;  %v4583_v55 = vsub.f32 %v4488_v46, %v6210_v40  ;;  %6485 = vst [vmem:[#allocation26_spill] sm:$0xff] %v4586_v26  ;;  %v6221_v40 = vand.u32 4294901760, %v4534_v9  ;;  %v4633_v57 = vsub.f32 %v118_v4, %v4586_v26 }
  0x96   :  { %994 = vmatpush1.msra.mxu1 %v6435_v1  ;;  %1050 = vmatpush1.msra.mxu0 %v4422_v58  ;;  %v1167_v1 = vand.u32 4294901760, %v4549_v48  ;;  %v4609_v48 = vsub.f32 %v127_v61, %v4562_v38  ;;  %v4630_v61 = vsub.f32 %v4540_v39, %v6215_v56  ;;  %v1209_v56 = vand.u32 4294901760, %v4620_v5 }
  0x97   :  { %996 = vmatprep.subr.mxu1 %v6437_v20  ;;  %1052 = vmatprep.subr.mxu0 %v4447_v51  ;;  %v4604_v20 = vsub.f32 %v4520_v17, %v6213_v10  ;;  %v4622_v10 = vand.u32 4294901760, %v111_v8  ;;  %v4649_v4 = vsub.f32 %v4534_v9, %v6221_v40  ;;  %v6492_v40 = vand.u32 4294901760, %v4505_v54 }
  0x98   :  { %998 = vmatpush1.msra.mxu1 %v4169_v29  ;;  %1054 = vmatpush1.msra.mxu0 %v4452_v7  ;;  %6488 = vst [vmem:[#allocation33_spill] sm:$0xff] %v4609_v48  ;;  %v1185_v29 = vand.u32 4294901760, %v4573_v22  ;;  %v95_v22 = vld [vmem:[#allocation7 + $0x118] sm:$0xff]  ;;  %v6496_v5 = vand.u32 4294901760, %v4516_v12  ;;  %v78_v7 = vld [vmem:[#allocation7 + $0x90] sm:$0xff] }
  0x99   :  { %1000 = vmatprep.subr.mxu1 %v4183_v42  ;;  %1056 = vmatprep.subr.mxu0 %v4470_v45  ;;  %6490 = vst [vmem:[#allocation22_spill] sm:$0xff] %v4622_v10  ;;  %v1197_v42 = vand.u32 4294901760, %v4583_v55  ;;  %v4644_v55 = vsub.f32 %v110_v11, %v4595_v13  ;;  %v1191_v32 = vand.u32 4294901760, %v4604_v20  ;;  %v4658_v11 = vsub.f32 %v119_v18, %v4606_v44 }
  0x9a   :  { %1002 = vmatpush1.msra.mxu1 %v4202_v15  ;;  %1035 = vmatprep.mubr.f32.mxu1 %v6417_v34  ;;  %v4641_v15 = vsub.f32 %v4552_v35, %v6218_v30  ;;  %v4664_v45 = vand.u32 4294901760, %v102_v28  ;;  %v1203_v18 = vand.u32 4294901760, %v4630_v61  ;;  %v6495_v30 = vand.u32 4294901760, %v4589_v53 }
  0x9b   :  { %1058 = vmatpush1.msra.mxu0 %v4457_v0  ;;  %1037 = vmatmul.mubr.f32.vlgmr.msra.gmra.mxu1 %v6480_v63  ;;  %v86_v0 = vld [vmem:[#allocation7 + $0xd0] sm:$0xff]  ;;  %v4676_v54 = vand.u32 4294901760, %v95_v22  ;;  %v6497_v61 = vand.u32 4294901760, %v4568_v37 }
  0x9c   :  { %1060 = vmatprep.subr.mxu0 %v4490_v60  ;;  %1156 = vmatprep.subr.mxu1 %v1155_v36  ;;  %6493 = vst [vmem:[#allocation23_spill] sm:$0xff] %v4664_v45  ;;  %v4666_v36 = vand.u32 4294901760, %v94_v49  ;;  %v87_v60 = vld [vmem:[#allocation7 + $0xd8] sm:$0xff]  ;;  %v1215_v20 = vand.u32 4294901760, %v4641_v15 }
  0x9d   :  { %1062 = vmatpush1.msra.mxu0 %v4482_v62  ;;  %1162 = vmatpush1.msra.mxu1 %v6492_v40  ;;  %v4674_v62 = vsub.f32 %v4589_v53, %v6495_v30  ;;  %v4679_v40 = vsub.f32 %v111_v8, %v4622_v10  ;;  %v4691_v30 = vand.u32 4294901760, %v86_v0  ;;  %v6498_v8 = vand.u32 4294901760, %v4609_v48 }
  0x9e   :  { %6494 = vst [vmem:[#allocation24_spill] sm:$0xff] %v4666_v36  ;;  %1064 = vmatprep.subr.mxu0 %v4507_v6  ;;  %1168 = vmatprep.subr.mxu1 %v1167_v1  ;;  %v1221_v1 = vand.u32 4294901760, %v4649_v4  ;;  %v4689_v6 = vsub.f32 %v4568_v37, %v6497_v61  ;;  %v79_v4 = vld [vmem:[#allocation7 + $0x98] sm:$0xff]  ;;  %v4707_v61 = vsub.f32 %v102_v28, %v4664_v45 }
  0x9f   :  { %1066 = vmatpush1.msra.mxu0 %v4492_v2  ;;  %1174 = vmatpush1.msra.mxu1 %v6496_v5  ;;  %v4697_v12 = vsub.f32 %v4609_v48, %v6498_v8  ;;  %v4699_v5 = vand.u32 4294901760, %v87_v60  ;;  %v4703_v2 = vsub.f32 %v103_v14, %v4654_v21  ;;  %v6500_v8 = vand.u32 4294901760, %v4615_v19  ;;  %v71_v28 = vld [vmem:[#allocation7 + $0x58] sm:$0xff] }
  0xa0   :  { %1068 = vmatprep.subr.mxu0 %v4536_v52  ;;  %1180 = vmatprep.subr.mxu1 %v1179_v27  ;;  %v4710_v27 = vsub.f32 %v94_v49, %v4666_v36  ;;  %v1227_v14 = vand.u32 4294901760, %v4674_v62  ;;  %v1233_v49 = vand.u32 4294901760, %v4689_v6  ;;  %v4729_v48 = vand.u32 4294901760, %v79_v4  ;;  %v70_v62 = vld [vmem:[#allocation7 + $0x50] sm:$0xff]  ;;  %v63_v6 = vld [vmem:[#allocation7 + $0x18] sm:$0xff] }
  0xa1   :  { %1070 = vmatpush1.msra.mxu0 %v4528_v23  ;;  %1186 = vmatpush1.msra.mxu1 %v1185_v29  ;;  %v1244_v52 = vsub.f32 %v4615_v19, %v6500_v8  ;;  %v4719_v29 = vand.u32 4294901760, %v78_v7  ;;  %v4722_v23 = vsub.f32 %v95_v22, %v4676_v54  ;;  %v4727_v8 = vsub.f32 %v86_v0, %v4691_v30  ;;  %v62_v19 = vld [vmem:[#allocation7 + $0x10] sm:$0xff] }
  0xa2   :  { %6499 = vst [vmem:[#allocation36_spill] sm:$0xff] %v4710_v27  ;;  %1072 = vmatprep.subr.mxu0 %v4562_v38  ;;  %1192 = vmatprep.subr.mxu1 %v1191_v32  ;;  %v1239_v15 = vand.u32 4294901760, %v4697_v12  ;;  %v6501_v22 = vand.u32 4294901760, %v4658_v11  ;;  %v4739_v0 = vsub.f32 %v87_v60, %v4699_v5  ;;  %v6502_v38 = vand.u32 4294901760, %v4633_v57 }
  0xa3   :  { %1074 = vmatpush1.msra.mxu0 %v4575_v59  ;;  %1198 = vmatpush1.msra.mxu1 %v1197_v42  ;;  %v1245_v32 = vand.u32 4294901760, %v1244_v52  ;;  %v4753_v42 = vsub.f32 %v78_v7, %v4719_v29  ;;  %v4755_v52 = vand.u32 4294901760, %v70_v62 }
  0xa4   :  { %1076 = vmatprep.subr.mxu0 %v4606_v44  ;;  %1204 = vmatprep.subr.mxu1 %v1203_v18  ;;  %v1250_v59 = vsub.f32 %v4658_v11, %v6501_v22  ;;  %v1256_v18 = vsub.f32 %v4633_v57, %v6502_v38  ;;  %v4745_v44 = vand.u32 4294901760, %v71_v28  ;;  %v6503_v22 = vand.u32 4294901760, %v4679_v40 }
  0xa5   :  { %1078 = vmatpush1.msra.mxu0 %v4586_v26  ;;  %1210 = vmatpush1.msra.mxu1 %v1209_v56  ;;  %6504 = vst [vmem:[#allocation37_spill] sm:$0xff] %v4753_v42  ;;  %v6505_v38 = vand.u32 4294901760, %v4644_v55  ;;  %v6506_v56 = vand.u32 4294901760, %v4703_v2 }
  0xa6   :  { %1080 = vmatprep.subr.mxu0 %v4622_v10  ;;  %1216 = vmatprep.subr.mxu1 %v1215_v20  ;;  %v1262_v60 = vsub.f32 %v4679_v40, %v6503_v22  ;;  %v4762_v10 = vand.u32 4294901760, %v63_v6  ;;  %v4766_v22 = vsub.f32 %v79_v4, %v4729_v48  ;;  %v1251_v7 = vand.u32 4294901760, %v1250_v59 }
  0xa7   :  { %1082 = vmatpush1.msra.mxu0 %v4595_v13  ;;  %1222 = vmatpush1.msra.mxu1 %v1221_v1  ;;  %v1268_v12 = vsub.f32 %v4644_v55, %v6505_v38  ;;  %v1274_v13 = vsub.f32 %v4703_v2, %v6506_v56  ;;  %v4772_v1 = vand.u32 4294901760, %v62_v19  ;;  %v1257_v38 = vand.u32 4294901760, %v1256_v18 }
  0xa8   :  { %1084 = vmatprep.subr.mxu0 %v4654_v21  ;;  %1228 = vmatprep.subr.mxu1 %v1227_v14  ;;  %v6507_v20 = vand.u32 4294901760, %v4707_v61  ;;  %v4780_v21 = vsub.f32 %v71_v28, %v4745_v44  ;;  %v1263_v59 = vand.u32 4294901760, %v1262_v60  ;;  %v4784_v14 = vsub.f32 %v70_v62, %v4755_v52 }
  0xa9   :  { %1086 = vmatpush1.msra.mxu0 %v4664_v45  ;;  %1234 = vmatpush1.msra.mxu1 %v1233_v49  ;;  %v6508_v56 = vand.u32 4294901760, %v4722_v23  ;;  %v1269_v18 = vand.u32 4294901760, %v1268_v12  ;;  %v6509_v28 = vand.u32 4294901760, %v4710_v27  ;;  %v4796_v60 = vsub.f32 %v63_v6, %v4762_v10 }
  0xaa   :  { %v1280_v4 = vsub.f32 %v4707_v61, %v6507_v20  ;;  %1088 = vmatprep.subr.mxu0 %v4676_v54  ;;  %1240 = vmatprep.subr.mxu1 %v1239_v15  ;;  %v1275_v62 = vand.u32 4294901760, %v1274_v13  ;;  %v6511_v49 = vand.u32 4294901760, %v4739_v0  ;;  %v6258_v6 = vand.u32 4294901760, %v4780_v21 }
  0xab   :  { %v1286_v26 = vsub.f32 %v4722_v23, %v6508_v56  ;;  %1090 = vmatpush1.msra.mxu0 %v4666_v36  ;;  %1246 = vmatpush1.msra.mxu1 %v1245_v32  ;;  %v1292_v20 = vsub.f32 %v4710_v27, %v6509_v28  ;;  %v4800_v56 = vsub.f32 %v62_v19, %v4772_v1  ;;  %v6512_v13 = vand.u32 4294901760, %v4727_v8 }
  0xac   :  { %1092 = vmatprep.subr.mxu0 %v4699_v5  ;;  %1252 = vmatprep.subr.mxu1 %v1251_v7  ;;  %v1298_v32 = vsub.f32 %v4739_v0, %v6511_v49  ;;  %v1281_v28 = vand.u32 4294901760, %v1280_v4  ;;  %v6513_v12 = vand.u32 4294901760, %v4766_v22  ;;  %v6257_v4 = vand.u32 4294901760, %v4796_v60 }
  0xad   :  { %6510 = vst [vmem:[#allocation38_spill] sm:$0xff] %v4800_v56  ;;  %1094 = vmatpush1.msra.mxu0 %v4691_v30  ;;  %1258 = vmatpush1.msra.mxu1 %v1257_v38  ;;  %v1287_v7 = vand.u32 4294901760, %v1286_v26  ;;  %v1304_v19 = vsub.f32 %v4727_v8, %v6512_v13  ;;  %v1293_v49 = vand.u32 4294901760, %v1292_v20  ;;  %v6256_v15 = vand.u32 4294901760, %v4800_v56 }
  0xae   :  { %1096 = vmatprep.subr.mxu0 %v4729_v48  ;;  %1264 = vmatprep.subr.mxu1 %v1263_v59  ;;  %v1310_v38 = vsub.f32 %v4766_v22, %v6513_v12  ;;  %v1299_v26 = vand.u32 4294901760, %v1298_v32  ;;  %v6514_v59 = vand.u32 4294901760, %v4753_v42 }
  0xaf   :  { %1098 = vmatpush1.msra.mxu0 %v4719_v29  ;;  %1270 = vmatpush1.msra.mxu1 %v1269_v18  ;;  %v1322_v18 = vsub.f32 %v4780_v21, %v6258_v6  ;;  %v1305_v20 = vand.u32 4294901760, %v1304_v19  ;;  %v6516_v19 = vld [vmem:[#allocation35_spill] sm:$0xff]  ;;  %v6531_v6 = vld [vmem:[#allocation26_spill] sm:$0xff] }
  0xb0   :  { %1100 = vmatprep.subr.mxu0 %v4745_v44  ;;  %1276 = vmatprep.subr.mxu1 %v1275_v62  ;;  %v1316_v13 = vsub.f32 %v4753_v42, %v6514_v59  ;;  %v6515_v62 = vand.u32 4294901760, %v4784_v14  ;;  %v1311_v12 = vand.u32 4294901760, %v1310_v38 }
  0xb1   :  { %1102 = vmatpush1.msra.mxu0 %v4755_v52  ;;  %1282 = vmatpush1.msra.mxu1 %v1281_v28  ;;  %v1334_v28 = vsub.f32 %v4796_v60, %v6257_v4  ;;  %v6530_v4 = vld [vmem:[#allocation28_spill] sm:$0xff] }
  0xb2   :  { %1104 = vmatprep.subr.mxu0 %v4762_v10  ;;  %1288 = vmatprep.subr.mxu1 %v1287_v7  ;;  %v1328_v32 = vsub.f32 %v4784_v14, %v6515_v62  ;;  %v1317_v59 = vand.u32 4294901760, %v1316_v13  ;;  %v1340_v7 = vsub.f32 %v4800_v56, %v6256_v15  ;;  %v1323_v62 = vand.u32 4294901760, %v1322_v18  ;;  %v6517_v13 = vld [vmem:[#allocation12_spill] sm:$0xff]  ;;  %v6518_v18 = vld [vmem:[#allocation33_spill] sm:$0xff] }
  0xb3   :  { %1106 = vmatpush1.msra.mxu0 %v4772_v1  ;;  %1294 = vmatpush1.msra.mxu1 %v1293_v49  ;;  %v1335_v38 = vand.u32 4294901760, %v1334_v28  ;;  %v6522_v28 = vld [vmem:[#allocation15_spill] sm:$0xff]  ;;  %v6529_v15 = vld [vmem:[#allocation25_spill] sm:$0xff] }
  0xb4   :  { %1139 = vmatprep.mubr.f32.mxu0 %v6417_v34  ;;  %1300 = vmatprep.subr.mxu1 %v1299_v26  ;;  %v1329_v49 = vand.u32 4294901760, %v1328_v32  ;;  %v1341_v26 = vand.u32 4294901760, %v1340_v7  ;;  %v6520_v32 = vld [vmem:[#allocation21_spill] sm:$0xff] }
  0xb5   :  { %1385 = vmatprep.subr.mxu0 %v4439_v31  ;;  %1145 = vmatmul.mubr.f32.vlgmr.msra.gmra.mxu0 %v6516_v19  ;;  %v6524_v7 = vld [vmem:[#allocation17_spill] sm:$0xff]  ;;  %v6532_v19 = vld [vmem:[#allocation22_spill] sm:$0xff] }
  0xb6   :  { %1306 = vmatpush1.msra.mxu1 %v1305_v20  ;;  %1388 = vmatpush1.msra.mxu0 %v4434_v25  ;;  %v6519_v20 = vld [vmem:[#allocation13_spill] sm:$0xff] }
  0xb7   :  { %1312 = vmatprep.subr.mxu1 %v1311_v12  ;;  %1391 = vmatprep.subr.mxu0 %v4465_v24  ;;  %v6521_v12 = vld [vmem:[#allocation29_spill] sm:$0xff] }
  0xb8   :  { %1318 = vmatpush1.msra.mxu1 %v1317_v59  ;;  %1394 = vmatpush1.msra.mxu0 %v4445_v47  ;;  %v6523_v59 = vld [vmem:[#allocation14_spill] sm:$0xff] }
  0xb9   :  { %1324 = vmatprep.subr.mxu1 %v1323_v62  ;;  %1397 = vmatprep.subr.mxu0 %v4474_v33  ;;  %v6525_v62 = vld [vmem:[#allocation16_spill] sm:$0xff] }
  0xba   :  { %1330 = vmatpush1.msra.mxu1 %v1329_v49  ;;  %1400 = vmatpush1.msra.mxu0 %v4480_v41  ;;  %v6526_v49 = vld [vmem:[#allocation19_spill] sm:$0xff] }
  0xbb   :  { %1336 = vmatprep.subr.mxu1 %v1335_v38  ;;  %1403 = vmatprep.subr.mxu0 %v4520_v17  ;;  %v6527_v38 = vld [vmem:[#allocation18_spill] sm:$0xff] }
  0xbc   :  { %1342 = vmatpush1.msra.mxu1 %v1341_v26  ;;  %1375 = vmatprep.mubr.f32.mxu1 %v6417_v34  ;;  %v6528_v26 = vld [vmem:[#allocation20_spill] sm:$0xff] }
  0xbd   :  { %1406 = vmatpush1.msra.mxu0 %v4488_v46  ;;  %1377 = vmatmul.mubr.f32.vlgmr.msra.gmra.mxu1 %v6480_v63  ;;  %v6533_v63 = vld [vmem:[#allocation27_spill] sm:$0xff] }
  0xbe   :  { %1409 = vmatprep.subr.mxu0 %v4540_v39  ;;  %1521 = vmatprep.subr.mxu1 %v4415_v43 }
  0xbf   :  { %1412 = vmatpush1.msra.mxu0 %v4526_v3  ;;  %1523 = vmatpush1.msra.mxu1 %v4417_v16 }
  0xc0   :  { %1415 = vmatprep.subr.mxu0 %v4552_v35  ;;  %1525 = vmatprep.subr.mxu1 %v4436_v50 }
  0xc1   :  { %1418 = vmatpush1.msra.mxu0 %v4534_v9  ;;  %1527 = vmatpush1.msra.mxu1 %v4422_v58 }
  0xc2   :  { %1421 = vmatprep.subr.mxu0 %v4589_v53  ;;  %1529 = vmatprep.subr.mxu1 %v4447_v51 }
  0xc3   :  { %1424 = vmatpush1.msra.mxu0 %v4568_v37  ;;  %1531 = vmatpush1.msra.mxu1 %v6517_v13 }
  0xc4   :  { %1427 = vmatprep.subr.mxu0 %v6518_v18  ;;  %1533 = vmatprep.subr.mxu1 %v6519_v20 }
  0xc5   :  { %1430 = vmatpush1.msra.mxu0 %v6520_v32  ;;  %1535 = vmatpush1.msra.mxu1 %v6521_v12 }
  0xc6   :  { %1433 = vmatprep.subr.mxu0 %v4658_v11  ;;  %1537 = vmatprep.subr.mxu1 %v6522_v28 }
  0xc7   :  { %1436 = vmatpush1.msra.mxu0 %v4633_v57  ;;  %1539 = vmatpush1.msra.mxu1 %v6523_v59 }
  0xc8   :  { %1439 = vmatprep.subr.mxu0 %v4679_v40  ;;  %1541 = vmatprep.subr.mxu1 %v6524_v7 }
  0xc9   :  { %1442 = vmatpush1.msra.mxu0 %v4644_v55  ;;  %1543 = vmatpush1.msra.mxu1 %v6525_v62 }
  0xca   :  { %1445 = vmatprep.subr.mxu0 %v4703_v2  ;;  %1545 = vmatprep.subr.mxu1 %v6526_v49 }
  0xcb   :  { %1448 = vmatpush1.msra.mxu0 %v4707_v61  ;;  %1547 = vmatpush1.msra.mxu1 %v6527_v38 }
  0xcc   :  { %1451 = vmatprep.subr.mxu0 %v4722_v23  ;;  %1549 = vmatprep.subr.mxu1 %v6528_v26 }
  0xcd   :  { %1454 = vmatpush1.msra.mxu0 %v4710_v27  ;;  %1551 = vmatpush1.msra.mxu1 %v6529_v15  ;;  %v6534_v27 = vld [vmem:[#allocation34_spill] sm:$0xff] }
  0xce   :  { %1457 = vmatprep.subr.mxu0 %v4739_v0  ;;  %1553 = vmatprep.subr.mxu1 %v6530_v4 }
  0xcf   :  { %1460 = vmatpush1.msra.mxu0 %v4727_v8  ;;  %1555 = vmatpush1.msra.mxu1 %v6531_v6 }
  0xd0   :  { %1463 = vmatprep.subr.mxu0 %v4766_v22  ;;  %1557 = vmatprep.subr.mxu1 %v6532_v19 }
  0xd1   :  { %1466 = vmatpush1.msra.mxu0 %v4753_v42  ;;  %1559 = vmatpush1.msra.mxu1 %v6533_v63  ;;  %v6535_v42 = vld [vmem:[#allocation31_spill] sm:$0xff] }
  0xd2   :  { %1469 = vmatprep.subr.mxu0 %v4780_v21  ;;  %1561 = vmatprep.subr.mxu1 %v6534_v27  ;;  %v6536_v27 = vand.u32 4294901760, %v4439_v31  ;;  %v6540_v31 = vand.u32 4294901760, %v4474_v33  ;;  %v6545_v33 = vand.u32 4294901760, %v4540_v39  ;;  %v6549_v39 = vand.u32 4294901760, %v4589_v53  ;;  %v184_v53 = vld [vmem:[#allocation7 + $0x3e0] sm:$0xff] }
  0xd3   :  { %1472 = vmatpush1.msra.mxu0 %v4784_v14  ;;  %1563 = vmatpush1.msra.mxu1 %v4664_v45  ;;  %v6537_v45 = vand.u32 4294901760, %v4434_v25  ;;  %v6541_v25 = vand.u32 4294901760, %v4480_v41  ;;  %v6546_v41 = vand.u32 4294901760, %v4526_v3  ;;  %v6553_v3 = vand.u32 4294901760, %v4658_v11 }
  0xd4   :  { %1475 = vmatprep.subr.mxu0 %v4796_v60  ;;  %1565 = vmatprep.subr.mxu1 %v4676_v54  ;;  %v6556_v11 = vand.u32 4294901760, %v4644_v55  ;;  %v161_v55 = vld [vmem:[#allocation7 + $0x328] sm:$0xff] }
  0xd5   :  { %1478 = vmatpush1.msra.mxu0 %v4800_v56  ;;  %1511 = vmatprep.mubr.f32.mxu0 %v6417_v34  ;;  %v6538_v56 = vand.u32 4294901760, %v4465_v24  ;;  %v6542_v24 = vand.u32 4294901760, %v4520_v17  ;;  %v6547_v17 = vand.u32 4294901760, %v4552_v35  ;;  %v176_v35 = vld [vmem:[#allocation7 + $0x3a0] sm:$0xff] }
  0xd6   :  { %1567 = vmatpush1.msra.mxu1 %v4666_v36  ;;  %1514 = vmatmul.mubr.f32.vlgmr.msra.gmra.mxu0 %v6535_v42  ;;  %v6539_v36 = vand.u32 4294901760, %v4445_v47  ;;  %v6543_v47 = vand.u32 4294901760, %v4488_v46  ;;  %v6548_v46 = vand.u32 4294901760, %v4534_v9  ;;  %v177_v9 = vld [vmem:[#allocation7 + $0x3a8] sm:$0xff] }
  0xd7   :  { %1569 = vmatprep.subr.mxu1 %v4699_v5  ;;  %1629 = vmatprep.subr.mxu0 %v6536_v27  ;;  %v4961_v27 = vand.u32 4294901760, %v184_v53 }
  0xd8   :  { %1571 = vmatpush1.msra.mxu1 %v4691_v30  ;;  %1633 = vmatpush1.msra.mxu0 %v6537_v45  ;;  %v6544_v45 = vld [vmem:[#allocation32_spill] sm:$0xff] }
  0xd9   :  { %1573 = vmatprep.subr.mxu1 %v4729_v48  ;;  %1637 = vmatprep.subr.mxu0 %v6538_v56  ;;  %v6557_v56 = vand.u32 4294901760, %v4703_v2  ;;  %v4980_v2 = vsub.f32 %v184_v53, %v4961_v27 }
  0xda   :  { %1575 = vmatpush1.msra.mxu1 %v4719_v29  ;;  %1641 = vmatpush1.msra.mxu0 %v6539_v36 }
  0xdb   :  { %1577 = vmatprep.subr.mxu1 %v4745_v44  ;;  %1645 = vmatprep.subr.mxu0 %v6540_v31  ;;  %v153_v31 = vld [vmem:[#allocation7 + $0x2e8] sm:$0xff] }
  0xdc   :  { %1579 = vmatpush1.msra.mxu1 %v4755_v52  ;;  %1649 = vmatpush1.msra.mxu0 %v6541_v25 }
  0xdd   :  { %1581 = vmatprep.subr.mxu1 %v4762_v10  ;;  %1653 = vmatprep.subr.mxu0 %v6542_v24  ;;  %v6565_v24 = vand.u32 4294901760, %v4727_v8 }
  0xde   :  { %1583 = vmatpush1.msra.mxu1 %v4772_v1  ;;  %1616 = vmatprep.mubr.f32.mxu1 %v6417_v34 }
  0xdf   :  { %1657 = vmatpush1.msra.mxu0 %v6543_v47  ;;  %1620 = vmatmul.mubr.f32.vlgmr.msra.gmra.mxu1 %v6544_v45 }
  0xe0   :  { %1661 = vmatprep.subr.mxu0 %v6545_v33  ;;  %1795 = vmatprep.subr.mxu1 %v4415_v43  ;;  %v6550_v43 = vand.u32 4294901760, %v4568_v37  ;;  %v6555_v37 = vand.u32 4294901760, %v4679_v40  ;;  %v4971_v40 = vand.u32 4294901760, %v176_v35  ;;  %v6272_v33 = vand.u32 4294901760, %v4980_v2 }
  0xe1   :  { %1665 = vmatpush1.msra.mxu0 %v6546_v41  ;;  %1797 = vmatpush1.msra.mxu1 %v4417_v16  ;;  %v6551_v16 = vand.u32 4294901760, %v6518_v18  ;;  %v168_v18 = vld [vmem:[#allocation7 + $0x360] sm:$0xff]  ;;  %v145_v41 = vld [vmem:[#allocation7 + $0x2a8] sm:$0xff] }
  0xe2   :  { %1669 = vmatprep.subr.mxu0 %v6547_v17  ;;  %1799 = vmatprep.subr.mxu1 %v4436_v50  ;;  %v6552_v50 = vand.u32 4294901760, %v6520_v32  ;;  %v6559_v32 = vand.u32 4294901760, %v4722_v23  ;;  %v152_v23 = vld [vmem:[#allocation7 + $0x2e0] sm:$0xff] }
  0xe3   :  { %1673 = vmatpush1.msra.mxu0 %v6548_v46  ;;  %1801 = vmatpush1.msra.mxu1 %v4422_v58  ;;  %v185_v58 = vld [vmem:[#allocation7 + $0x3e8] sm:$0xff]  ;;  %v5012_v47 = vand.u32 4294901760, %v152_v23  ;;  %v144_v17 = vld [vmem:[#allocation7 + $0x2a0] sm:$0xff]  ;;  %v6569_v46 = vld [vmem:[#allocation37_spill] sm:$0xff] }
  0xe4   :  { %1677 = vmatprep.subr.mxu0 %v6549_v39  ;;  %1803 = vmatprep.subr.mxu1 %v4447_v51  ;;  %v6554_v51 = vand.u32 4294901760, %v4633_v57  ;;  %v4959_v36 = vand.u32 4294901760, %v185_v58  ;;  %v169_v57 = vld [vmem:[#allocation7 + $0x368] sm:$0xff]  ;;  %v6572_v39 = vand.u32 4294901760, %v4780_v21  ;;  %v5040_v21 = vand.u32 4294901760, %v145_v41 }
  0xe5   :  { %1681 = vmatpush1.msra.mxu0 %v6550_v43  ;;  %1805 = vmatpush1.msra.mxu1 %v6517_v13  ;;  %v4969_v13 = vand.u32 4294901760, %v177_v9  ;;  %6568 = vst [vmem:[#allocation21_spill] sm:$0xff] %v5012_v47  ;;  %v6573_v43 = vld [vmem:[#allocation34_spill] sm:$0xff] }
  0xe6   :  { %1685 = vmatprep.subr.mxu0 %v6551_v16  ;;  %1807 = vmatprep.subr.mxu1 %v6519_v20  ;;  %v6558_v20 = vand.u32 4294901760, %v4707_v61  ;;  %6576 = vst [vmem:[#allocation15_spill] sm:$0xff] %v5040_v21 }
  0xe7   :  { %1689 = vmatpush1.msra.mxu0 %v6552_v50  ;;  %1809 = vmatpush1.msra.mxu1 %v6521_v12  ;;  %v4982_v12 = vand.u32 4294901760, %v169_v57  ;;  %v5001_v25 = vsub.f32 %v177_v9, %v4969_v13  ;;  %v5042_v9 = vand.u32 4294901760, %v144_v17 }
  0xe8   :  { %1693 = vmatprep.subr.mxu0 %v6553_v3  ;;  %1811 = vmatprep.subr.mxu1 %v6522_v28  ;;  %v160_v28 = vld [vmem:[#allocation7 + $0x320] sm:$0xff]  ;;  %v6575_v3 = vld [vmem:[#allocation23_spill] sm:$0xff] }
  0xe9   :  { %1697 = vmatpush1.msra.mxu0 %v6554_v51  ;;  %1813 = vmatpush1.msra.mxu1 %v6523_v59  ;;  %v4985_v59 = vsub.f32 %v185_v58, %v4959_v36  ;;  %v5016_v8 = vsub.f32 %v169_v57, %v4982_v12  ;;  %v6270_v16 = vand.u32 4294901760, %v5001_v25  ;;  %v136_v58 = vld [vmem:[#allocation7 + $0x260] sm:$0xff]  ;;  %6577 = vst [vmem:[#allocation14_spill] sm:$0xff] %v5042_v9 }
  0xea   :  { %1701 = vmatprep.subr.mxu0 %v6555_v37  ;;  %1815 = vmatprep.subr.mxu1 %v6524_v7  ;;  %v6560_v7 = vld [vmem:[#allocation36_spill] sm:$0xff]  ;;  %v6578_v37 = vand.u32 4294901760, %v4796_v60  ;;  %v5058_v57 = vsub.f32 %v4980_v2, %v6272_v33  ;;  %v6579_v60 = vld [vmem:[#allocation38_spill] sm:$0xff] }
  0xeb   :  { %1705 = vmatpush1.msra.mxu0 %v6556_v11  ;;  %1817 = vmatpush1.msra.mxu1 %v6525_v62  ;;  %v6561_v61 = vand.u32 4294901760, %v6560_v7  ;;  %v4990_v62 = vand.u32 4294901760, %v168_v18  ;;  %v5053_v11 = vsub.f32 %v152_v23, %v5012_v47  ;;  %v6583_v7 = vld [vmem:[#allocation30_spill] sm:$0xff] }
  0xec   :  { %1709 = vmatprep.subr.mxu0 %v6557_v56  ;;  %1819 = vmatprep.subr.mxu1 %v6526_v49  ;;  %v6563_v49 = vand.u32 4294901760, %v4739_v0  ;;  %v6567_v0 = vand.u32 4294901760, %v4766_v22  ;;  %v6268_v56 = vand.u32 4294901760, %v5016_v8 }
  0xed   :  { %1713 = vmatpush1.msra.mxu0 %v6558_v20  ;;  %1821 = vmatpush1.msra.mxu1 %v6527_v38  ;;  %6562 = vst [vmem:[#allocation12_spill] sm:$0xff] %v4990_v62  ;;  %v4996_v38 = vsub.f32 %v176_v35, %v4971_v40  ;;  %v5022_v22 = vsub.f32 %v168_v18, %v4990_v62  ;;  %v137_v35 = vld [vmem:[#allocation7 + $0x268] sm:$0xff]  ;;  %v128_v18 = vld [vmem:[#allocation7 + $0x220] sm:$0xff]  ;;  %v6580_v20 = vand.u32 4294901760, %v6579_v60 }
  0xee   :  { %1717 = vmatprep.subr.mxu0 %v6559_v32  ;;  %1823 = vmatprep.subr.mxu1 %v6528_v26  ;;  %v4998_v26 = vand.u32 4294901760, %v161_v55 }
  0xef   :  { %1721 = vmatpush1.msra.mxu0 %v6561_v61  ;;  %1825 = vmatpush1.msra.mxu1 %v6529_v15  ;;  %v5006_v15 = vand.u32 4294901760, %v160_v28  ;;  %v6269_v50 = vand.u32 4294901760, %v4996_v38  ;;  %v5075_v61 = vsub.f32 %v5001_v25, %v6270_v16 }
  0xf0   :  { %1725 = vmatprep.subr.mxu0 %v6563_v49  ;;  %1827 = vmatprep.subr.mxu1 %v6530_v4  ;;  %6564 = vst [vmem:[#allocation33_spill] sm:$0xff] %v4998_v26  ;;  %v6274_v4 = vand.u32 4294901760, %v4985_v59  ;;  %v5032_v53 = vsub.f32 %v161_v55, %v4998_v26  ;;  %v6266_v55 = vand.u32 4294901760, %v5022_v22  ;;  %v5082_v49 = vand.u32 4294901760, %v137_v35 }
  0xf1   :  { %1729 = vmatpush1.msra.mxu0 %v6565_v24  ;;  %1829 = vmatpush1.msra.mxu1 %v6531_v6  ;;  %6566 = vst [vmem:[#allocation13_spill] sm:$0xff] %v5006_v15  ;;  %v6570_v6 = vand.u32 4294901760, %v6569_v46  ;;  %v5038_v51 = vsub.f32 %v160_v28, %v5006_v15  ;;  %v6582_v28 = vld [vmem:[#allocation24_spill] sm:$0xff]  ;;  %v5080_v23 = vsub.f32 %v4996_v38, %v6269_v50  ;;  %v129_v24 = vld [vmem:[#allocation7 + $0x228] sm:$0xff]  ;;  %v5090_v46 = vand.u32 4294901760, %v128_v18 }
  0xf2   :  { %1733 = vmatprep.subr.mxu0 %v6567_v0  ;;  %1831 = vmatprep.subr.mxu1 %v6532_v19  ;;  %v5024_v19 = vand.u32 4294901760, %v153_v31  ;;  %6584 = vst [vmem:[#allocation16_spill] sm:$0xff] %v5082_v49  ;;  %v5088_v0 = vsub.f32 %v144_v17, %v5042_v9  ;;  %v5103_v17 = vsub.f32 %v5016_v8, %v6268_v56 }
  0xf3   :  { %1737 = vmatpush1.msra.mxu0 %v6570_v6  ;;  %1833 = vmatpush1.msra.mxu1 %v6533_v63  ;;  %v6574_v63 = vand.u32 4294901760, %v4784_v14  ;;  %v5050_v14 = vsub.f32 %v4985_v59, %v6274_v4  ;;  %6585 = vst [vmem:[#allocation19_spill] sm:$0xff] %v5090_v46  ;;  %v6267_v6 = vand.u32 4294901760, %v5038_v51  ;;  %v97_v4 = vld [vmem:[#allocation7 + $0x128] sm:$0xff] }
  0xf4   :  { %6571 = vst [vmem:[#allocation29_spill] sm:$0xff] %v5024_v19  ;;  %1741 = vmatprep.subr.mxu0 %v6572_v39  ;;  %1835 = vmatprep.subr.mxu1 %v6573_v43  ;;  %v5068_v32 = vsub.f32 %v153_v31, %v5024_v19  ;;  %v6265_v31 = vand.u32 4294901760, %v5032_v53  ;;  %v5094_v39 = vsub.f32 %v145_v41, %v5040_v21 }
  0xf5   :  { %1745 = vmatpush1.msra.mxu0 %v6574_v63  ;;  %1837 = vmatpush1.msra.mxu1 %v6575_v3  ;;  %v2010_v43 = vand.u32 4294901760, %v5050_v14  ;;  %v6271_v63 = vand.u32 4294901760, %v5053_v11  ;;  %v5116_v3 = vand.u32 4294901760, %v129_v24 }
  0xf6   :  { %1749 = vmatprep.subr.mxu0 %v6578_v37  ;;  %1839 = vmatprep.subr.mxu1 %v4676_v54  ;;  %v5064_v54 = vand.u32 4294901760, %v136_v58  ;;  %v121_v37 = vld [vmem:[#allocation7 + $0x1e8] sm:$0xff]  ;;  %v6273_v14 = vand.u32 4294901760, %v5068_v32  ;;  %v5126_v60 = vsub.f32 %v5032_v53, %v6265_v31  ;;  %v112_v31 = vld [vmem:[#allocation7 + $0x1a0] sm:$0xff] }
  0xf7   :  { %1753 = vmatpush1.msra.mxu0 %v6580_v20  ;;  %1786 = vmatprep.mubr.f32.mxu0 %v6417_v34  ;;  %6586 = vst [vmem:[#allocation18_spill] sm:$0xff] %v5116_v3  ;;  %v5129_v20 = vsub.f32 %v137_v35, %v5082_v49  ;;  %v5146_v35 = vand.u32 4294901760, %v121_v37  ;;  %v5165_v16 = vsub.f32 %v129_v24, %v5116_v3 }
  0xf8   :  { %6581 = vst [vmem:[#allocation17_spill] sm:$0xff] %v5064_v54  ;;  %1841 = vmatpush1.msra.mxu1 %v6582_v28  ;;  %1788 = vmatmul.mubr.f32.vlgmr.msra.gmra.mxu0 %v6583_v7  ;;  %v5109_v41 = vsub.f32 %v136_v58, %v5064_v54  ;;  %v2028_v58 = vand.u32 4294901760, %v5080_v23  ;;  %v5139_v28 = vsub.f32 %v5038_v51, %v6267_v6  ;;  %v6275_v23 = vand.u32 4294901760, %v5094_v39 }
  0xf9   :  { %1843 = vmatprep.subr.mxu1 %v4699_v5  ;;  %1899 = vmatprep.subr.mxu0 %v4959_v36  ;;  %v2016_v5 = vand.u32 4294901760, %v5058_v57  ;;  %v120_v57 = vld [vmem:[#allocation7 + $0x1e0] sm:$0xff]  ;;  %6588 = vst [vmem:[#allocation25_spill] sm:$0xff] %v5146_v35  ;;  %v5153_v6 = vsub.f32 %v5053_v11, %v6271_v63  ;;  %v5197_v42 = vsub.f32 %v121_v37, %v5146_v35 }
  0xfa   :  { %1845 = vmatpush1.msra.mxu1 %v4691_v30  ;;  %1901 = vmatpush1.msra.mxu0 %v4961_v27  ;;  %v5114_v30 = vsub.f32 %v5022_v22, %v6266_v55  ;;  %v6276_v55 = vand.u32 4294901760, %v5088_v0  ;;  %v2052_v24 = vand.u32 4294901760, %v5139_v28 }
  0xfb   :  { %1847 = vmatprep.subr.mxu1 %v4729_v48  ;;  %1903 = vmatprep.subr.mxu0 %v4969_v13  ;;  %v2022_v48 = vand.u32 4294901760, %v5075_v61  ;;  %v113_v61 = vld [vmem:[#allocation7 + $0x1a8] sm:$0xff]  ;;  %v2064_v28 = vand.u32 4294901760, %v5153_v6 }
  0xfc   :  { %1849 = vmatpush1.msra.mxu1 %v4719_v29  ;;  %1905 = vmatpush1.msra.mxu0 %v4971_v40  ;;  %v5134_v29 = vsub.f32 %v128_v18, %v5090_v46  ;;  %v5148_v18 = vand.u32 4294901760, %v120_v57  ;;  %v2040_v56 = vand.u32 4294901760, %v5114_v30  ;;  %v5170_v63 = vand.u32 4294901760, %v113_v61 }
  0xfd   :  { %1851 = vmatprep.subr.mxu1 %v4745_v44  ;;  %1907 = vmatprep.subr.mxu0 %v4982_v12  ;;  %v2034_v44 = vand.u32 4294901760, %v5103_v17  ;;  %v105_v17 = vld [vmem:[#allocation7 + $0x168] sm:$0xff]  ;;  %v5172_v30 = vand.u32 4294901760, %v112_v31 }
  0xfe   :  { %6587 = vst [vmem:[#allocation20_spill] sm:$0xff] %v5134_v29  ;;  %1853 = vmatpush1.msra.mxu1 %v4755_v52  ;;  %1909 = vmatpush1.msra.mxu0 %v4990_v62  ;;  %6589 = vst [vmem:[#allocation28_spill] sm:$0xff] %v5148_v18  ;;  %v5161_v52 = vsub.f32 %v5068_v32, %v6273_v14  ;;  %v104_v14 = vld [vmem:[#allocation7 + $0x160] sm:$0xff]  ;;  %v5191_v50 = vsub.f32 %v120_v57, %v5148_v18  ;;  %v5194_v45 = vand.u32 4294901760, %v105_v17 }
  0xff   :  { %1855 = vmatprep.subr.mxu1 %v4762_v10  ;;  %1911 = vmatprep.subr.mxu0 %v4998_v26  ;;  %v2046_v10 = vand.u32 4294901760, %v5126_v60  ;;  %6590 = vst [vmem:[#allocation26_spill] sm:$0xff] %v5170_v63  ;;  %6591 = vst [vmem:[#allocation22_spill] sm:$0xff] %v5172_v30  ;;  %v5186_v60 = vsub.f32 %v5088_v0, %v6276_v55  ;;  %v5201_v33 = vand.u32 4294901760, %v104_v14  ;;  %v6601_v62 = vand.u32 4294901760, %v5197_v42 }
 0x100   :  { %1857 = vmatpush1.msra.mxu1 %v4772_v1  ;;  %1890 = vmatprep.mubr.f32.mxu1 %v6417_v34  ;;  %v5181_v1 = vsub.f32 %v5094_v39, %v6275_v23  ;;  %6592 = vst [vmem:[#allocation27_spill] sm:$0xff] %v5194_v45  ;;  %v96_v23 = vld [vmem:[#allocation7 + $0x120] sm:$0xff]  ;;  %v2058_v55 = vand.u32 4294901760, %v5161_v52  ;;  %v5211_v37 = vsub.f32 %v112_v31, %v5172_v30  ;;  %v6598_v31 = vand.u32 4294901760, %v5134_v29 }
 0x101   :  { %1913 = vmatpush1.msra.mxu0 %v5006_v15  ;;  %1892 = vmatmul.mubr.f32.vlgmr.msra.gmra.mxu1 %v6583_v7  ;;  %6593 = vst [vmem:[#allocation36_spill] sm:$0xff] %v5201_v33  ;;  %v88_v15 = vld [vmem:[#allocation7 + $0xe0] sm:$0xff] }
 0x102   :  { %1915 = vmatprep.subr.mxu0 %v5024_v19  ;;  %2011 = vmatprep.subr.mxu1 %v2010_v43  ;;  %v6594_v43 = vand.u32 4294901760, %v5109_v41  ;;  %v89_v19 = vld [vmem:[#allocation7 + $0xe8] sm:$0xff]  ;;  %v2070_v6 = vand.u32 4294901760, %v5181_v1  ;;  %v5231_v26 = vsub.f32 %v5134_v29, %v6598_v31  ;;  %v5244_v31 = vsub.f32 %v104_v14, %v5201_v33 }
 0x103   :  { %1917 = vmatpush1.msra.mxu0 %v5012_v47  ;;  %2017 = vmatpush1.msra.mxu1 %v2016_v5  ;;  %v6595_v5 = vand.u32 4294901760, %v5129_v20  ;;  %v5218_v47 = vand.u32 4294901760, %v97_v4  ;;  %v81_v1 = vld [vmem:[#allocation7 + $0xa8] sm:$0xff] }
 0x104   :  { %v5206_v57 = vsub.f32 %v5109_v41, %v6594_v43  ;;  %1919 = vmatprep.subr.mxu0 %v5040_v21  ;;  %2023 = vmatprep.subr.mxu1 %v2022_v48  ;;  %v5221_v43 = vsub.f32 %v113_v61, %v5170_v63  ;;  %v2076_v48 = vand.u32 4294901760, %v5186_v60  ;;  %v5226_v21 = vand.u32 4294901760, %v96_v23 }
 0x105   :  { %v5216_v52 = vsub.f32 %v5129_v20, %v6595_v5  ;;  %1921 = vmatpush1.msra.mxu0 %v5042_v9  ;;  %2029 = vmatpush1.msra.mxu1 %v2028_v58  ;;  %v80_v5 = vld [vmem:[#allocation7 + $0xa0] sm:$0xff]  ;;  %v5234_v61 = vand.u32 4294901760, %v89_v19  ;;  %v5237_v58 = vand.u32 4294901760, %v88_v15  ;;  %v5240_v60 = vsub.f32 %v105_v17, %v5194_v45 }
 0x106   :  { %6596 = vst [vmem:[#allocation37_spill] sm:$0xff] %v5221_v43  ;;  %6597 = vst [vmem:[#allocation34_spill] sm:$0xff] %v5226_v21  ;;  %1923 = vmatprep.subr.mxu0 %v5082_v49  ;;  %2035 = vmatprep.subr.mxu1 %v2034_v44  ;;  %v2088_v29 = vand.u32 4294901760, %v5206_v57  ;;  %v6599_v44 = vand.u32 4294901760, %v5165_v16  ;;  %v5257_v14 = vsub.f32 %v97_v4, %v5218_v47  ;;  %v5264_v9 = vand.u32 4294901760, %v81_v1 }
 0x107   :  { %1925 = vmatpush1.msra.mxu0 %v5064_v54  ;;  %2041 = vmatpush1.msra.mxu1 %v2040_v56  ;;  %v2082_v17 = vand.u32 4294901760, %v5216_v52  ;;  %v5254_v54 = vand.u32 4294901760, %v80_v5  ;;  %v73_v56 = vld [vmem:[#allocation7 + $0x68] sm:$0xff]  ;;  %v5261_v57 = vsub.f32 %v96_v23, %v5226_v21  ;;  %v72_v52 = vld [vmem:[#allocation7 + $0x60] sm:$0xff]  ;;  %v2105_v4 = vsub.f32 %v5197_v42, %v6601_v62 }
 0x108   :  { %v2093_v49 = vsub.f32 %v5165_v16, %v6599_v44  ;;  %1927 = vmatprep.subr.mxu0 %v5116_v3  ;;  %2047 = vmatprep.subr.mxu1 %v2046_v10  ;;  %v2100_v44 = vand.u32 4294901760, %v5231_v26  ;;  %v5276_v26 = vsub.f32 %v89_v19, %v5234_v61  ;;  %v5282_v3 = vand.u32 4294901760, %v73_v56 }
 0x109   :  { %1929 = vmatpush1.msra.mxu0 %v5090_v46  ;;  %2053 = vmatpush1.msra.mxu1 %v2052_v24  ;;  %6600 = vst [vmem:[#allocation23_spill] sm:$0xff] %v5261_v57  ;;  %v5272_v46 = vsub.f32 %v88_v15, %v5237_v58  ;;  %v65_v24 = vld [vmem:[#allocation7 + $0x28] sm:$0xff]  ;;  %v64_v15 = vld [vmem:[#allocation7 + $0x20] sm:$0xff]  ;;  %v6603_v23 = vand.u32 4294901760, %v5221_v43 }
 0x10a   :  { %1931 = vmatprep.subr.mxu0 %v5146_v35  ;;  %2059 = vmatprep.subr.mxu1 %v2058_v55  ;;  %v2094_v10 = vand.u32 4294901760, %v2093_v49  ;;  %v6602_v35 = vand.u32 4294901760, %v5191_v50  ;;  %v5292_v49 = vand.u32 4294901760, %v72_v52 }
 0x10b   :  { %1933 = vmatpush1.msra.mxu0 %v5148_v18  ;;  %2065 = vmatpush1.msra.mxu1 %v2064_v28  ;;  %v2117_v19 = vsub.f32 %v5221_v43, %v6603_v23  ;;  %v5290_v18 = vsub.f32 %v80_v5, %v5254_v54  ;;  %v5303_v23 = vsub.f32 %v81_v1, %v5264_v9  ;;  %v2106_v5 = vand.u32 4294901760, %v2105_v4 }
 0x10c   :  { %v2111_v55 = vsub.f32 %v5191_v50, %v6602_v35  ;;  %1935 = vmatprep.subr.mxu0 %v5170_v63  ;;  %2071 = vmatprep.subr.mxu1 %v2070_v6  ;;  %v6605_v35 = vand.u32 4294901760, %v5211_v37  ;;  %v5299_v63 = vand.u32 4294901760, %v65_v24  ;;  %v6606_v28 = vand.u32 4294901760, %v5240_v60 }
 0x10d   :  { %6604 = vst [vmem:[#allocation38_spill] sm:$0xff] %v5290_v18  ;;  %1937 = vmatpush1.msra.mxu0 %v5172_v30  ;;  %2077 = vmatpush1.msra.mxu1 %v2076_v48  ;;  %v5309_v48 = vand.u32 4294901760, %v64_v15  ;;  %v6607_v6 = vand.u32 4294901760, %v5244_v31  ;;  %v5321_v4 = vsub.f32 %v72_v52, %v5292_v49 }
 0x10e   :  { %v2123_v62 = vsub.f32 %v5211_v37, %v6605_v35  ;;  %1939 = vmatprep.subr.mxu0 %v5194_v45  ;;  %2083 = vmatprep.subr.mxu1 %v2082_v17  ;;  %v2129_v30 = vsub.f32 %v5240_v60, %v6606_v28  ;;  %v2112_v35 = vand.u32 4294901760, %v2111_v55  ;;  %v5317_v45 = vsub.f32 %v73_v56, %v5282_v3 }
 0x10f   :  { %1941 = vmatpush1.msra.mxu0 %v5201_v33  ;;  %2089 = vmatpush1.msra.mxu1 %v2088_v29  ;;  %v2135_v1 = vsub.f32 %v5244_v31, %v6607_v6  ;;  %v2118_v17 = vand.u32 4294901760, %v2117_v19  ;;  %v6608_v28 = vand.u32 4294901760, %v5257_v14  ;;  %v6609_v56 = vand.u32 4294901760, %v5261_v57 }
 0x110   :  { %1943 = vmatprep.subr.mxu0 %v5218_v47  ;;  %2095 = vmatprep.subr.mxu1 %v2094_v10  ;;  %v2124_v55 = vand.u32 4294901760, %v2123_v62  ;;  %v5333_v19 = vsub.f32 %v65_v24, %v5299_v63  ;;  %v2130_v52 = vand.u32 4294901760, %v2129_v30  ;;  %v6611_v29 = vand.u32 4294901760, %v5276_v26 }
 0x111   :  { %v2141_v43 = vsub.f32 %v5257_v14, %v6608_v28  ;;  %1945 = vmatpush1.msra.mxu0 %v5226_v21  ;;  %2101 = vmatpush1.msra.mxu1 %v2100_v44  ;;  %v2147_v6 = vsub.f32 %v5261_v57, %v6609_v56  ;;  %v5337_v28 = vsub.f32 %v64_v15, %v5309_v48  ;;  %v2136_v56 = vand.u32 4294901760, %v2135_v1 }
 0x112   :  { %1947 = vmatprep.subr.mxu0 %v5234_v61  ;;  %2107 = vmatprep.subr.mxu1 %v2106_v5  ;;  %v2153_v44 = vsub.f32 %v5276_v26, %v6611_v29  ;;  %v6315_v24 = vand.u32 4294901760, %v5317_v45  ;;  %v6612_v30 = vand.u32 4294901760, %v5272_v46  ;;  %v6613_v62 = vand.u32 4294901760, %v5303_v23 }
 0x113   :  { %6610 = vst [vmem:[#allocation24_spill] sm:$0xff] %v5337_v28  ;;  %1949 = vmatpush1.msra.mxu0 %v5237_v58  ;;  %2113 = vmatpush1.msra.mxu1 %v2112_v35  ;;  %v2142_v5 = vand.u32 4294901760, %v2141_v43  ;;  %v2148_v29 = vand.u32 4294901760, %v2147_v6  ;;  %v6314_v1 = vand.u32 4294901760, %v5333_v19  ;;  %v6313_v10 = vand.u32 4294901760, %v5337_v28 }
 0x114   :  { %1951 = vmatprep.subr.mxu0 %v5264_v9  ;;  %2119 = vmatprep.subr.mxu1 %v2118_v17  ;;  %v2159_v15 = vsub.f32 %v5272_v46, %v6612_v30  ;;  %v2165_v35 = vsub.f32 %v5303_v23, %v6613_v62  ;;  %v2154_v43 = vand.u32 4294901760, %v2153_v44  ;;  %v6614_v17 = vand.u32 4294901760, %v5290_v18 }
 0x115   :  { %1953 = vmatpush1.msra.mxu0 %v5254_v54  ;;  %2125 = vmatpush1.msra.mxu1 %v2124_v55  ;;  %v2177_v55 = vsub.f32 %v5317_v45, %v6315_v24  ;;  %v6631_v24 = vld [vmem:[#allocation28_spill] sm:$0xff] }
 0x116   :  { %1955 = vmatprep.subr.mxu0 %v5282_v3  ;;  %2131 = vmatprep.subr.mxu1 %v2130_v52  ;;  %v2171_v30 = vsub.f32 %v5290_v18, %v6614_v17  ;;  %v2160_v6 = vand.u32 4294901760, %v2159_v15  ;;  %v6615_v52 = vand.u32 4294901760, %v5321_v4  ;;  %v2166_v62 = vand.u32 4294901760, %v2165_v35  ;;  %v6616_v15 = vld [vmem:[#allocation35_spill] sm:$0xff] }
 0x117   :  { %1957 = vmatpush1.msra.mxu0 %v5292_v49  ;;  %2137 = vmatpush1.msra.mxu1 %v2136_v56  ;;  %v2189_v56 = vsub.f32 %v5333_v19, %v6314_v1  ;;  %v6630_v1 = vld [vmem:[#allocation25_spill] sm:$0xff] }
 0x118   :  { %1959 = vmatprep.subr.mxu0 %v5299_v63  ;;  %2143 = vmatprep.subr.mxu1 %v2142_v5  ;;  %v2183_v44 = vsub.f32 %v5321_v4, %v6615_v52  ;;  %v2172_v17 = vand.u32 4294901760, %v2171_v30  ;;  %v2195_v5 = vsub.f32 %v5337_v28, %v6313_v10  ;;  %v2178_v52 = vand.u32 4294901760, %v2177_v55  ;;  %v6617_v30 = vld [vmem:[#allocation12_spill] sm:$0xff]  ;;  %v6618_v55 = vld [vmem:[#allocation33_spill] sm:$0xff]  ;;  %v6629_v10 = vld [vmem:[#allocation19_spill] sm:$0xff] }
 0x119   :  { %1961 = vmatpush1.msra.mxu0 %v5309_v48  ;;  %2149 = vmatpush1.msra.mxu1 %v2148_v29  ;;  %v2190_v35 = vand.u32 4294901760, %v2189_v56  ;;  %v6622_v56 = vld [vmem:[#allocation21_spill] sm:$0xff] }
 0x11a   :  { %1994 = vmatprep.mubr.f32.mxu0 %v6417_v34  ;;  %2155 = vmatprep.subr.mxu1 %v2154_v43  ;;  %v2184_v29 = vand.u32 4294901760, %v2183_v44  ;;  %v2196_v43 = vand.u32 4294901760, %v2195_v5  ;;  %v6620_v44 = vld [vmem:[#allocation13_spill] sm:$0xff]  ;;  %v6624_v5 = vld [vmem:[#allocation15_spill] sm:$0xff] }
 0x11b   :  { %2240 = vmatprep.subr.mxu0 %v4985_v59  ;;  %2000 = vmatmul.mubr.f32.vlgmr.msra.gmra.mxu0 %v6616_v15  ;;  %v6632_v15 = vld [vmem:[#allocation26_spill] sm:$0xff] }
 0x11c   :  { %2161 = vmatpush1.msra.mxu1 %v2160_v6  ;;  %2243 = vmatpush1.msra.mxu0 %v4980_v2  ;;  %v6619_v6 = vld [vmem:[#allocation20_spill] sm:$0xff] }
 0x11d   :  { %2167 = vmatprep.subr.mxu1 %v2166_v62  ;;  %2246 = vmatprep.subr.mxu0 %v5001_v25  ;;  %v6621_v62 = vld [vmem:[#allocation29_spill] sm:$0xff] }
 0x11e   :  { %2173 = vmatpush1.msra.mxu1 %v2172_v17  ;;  %2249 = vmatpush1.msra.mxu0 %v4996_v38  ;;  %v6623_v17 = vld [vmem:[#allocation37_spill] sm:$0xff] }
 0x11f   :  { %2179 = vmatprep.subr.mxu1 %v2178_v52  ;;  %2252 = vmatprep.subr.mxu0 %v5016_v8  ;;  %v6625_v52 = vld [vmem:[#allocation14_spill] sm:$0xff] }
 0x120   :  { %2185 = vmatpush1.msra.mxu1 %v2184_v29  ;;  %2255 = vmatpush1.msra.mxu0 %v5022_v22  ;;  %v6626_v29 = vld [vmem:[#allocation16_spill] sm:$0xff] }
 0x121   :  { %2191 = vmatprep.subr.mxu1 %v2190_v35  ;;  %2258 = vmatprep.subr.mxu0 %v5032_v53  ;;  %v6627_v35 = vld [vmem:[#allocation17_spill] sm:$0xff] }
 0x122   :  { %2197 = vmatpush1.msra.mxu1 %v2196_v43  ;;  %2230 = vmatprep.mubr.f32.mxu1 %v6417_v34  ;;  %v6628_v43 = vld [vmem:[#allocation18_spill] sm:$0xff] }
 0x123   :  { %2261 = vmatpush1.msra.mxu0 %v5038_v51  ;;  %2232 = vmatmul.mubr.f32.vlgmr.msra.gmra.mxu1 %v6583_v7  ;;  %v6633_v7 = vld [vmem:[#allocation22_spill] sm:$0xff] }
 0x124   :  { %2264 = vmatprep.subr.mxu0 %v5068_v32  ;;  %2376 = vmatprep.subr.mxu1 %v4959_v36 }
 0x125   :  { %2267 = vmatpush1.msra.mxu0 %v5053_v11  ;;  %2378 = vmatpush1.msra.mxu1 %v4961_v27 }
 0x126   :  { %2270 = vmatprep.subr.mxu0 %v5094_v39  ;;  %2380 = vmatprep.subr.mxu1 %v4969_v13 }
 0x127   :  { %2273 = vmatpush1.msra.mxu0 %v5088_v0  ;;  %2382 = vmatpush1.msra.mxu1 %v4971_v40 }
 0x128   :  { %2276 = vmatprep.subr.mxu0 %v5129_v20  ;;  %2384 = vmatprep.subr.mxu1 %v4982_v12 }
 0x129   :  { %2279 = vmatpush1.msra.mxu0 %v5109_v41  ;;  %2386 = vmatpush1.msra.mxu1 %v6617_v30 }
 0x12a   :  { %2282 = vmatprep.subr.mxu0 %v5165_v16  ;;  %2388 = vmatprep.subr.mxu1 %v6618_v55 }
 0x12b   :  { %2285 = vmatpush1.msra.mxu0 %v6619_v6  ;;  %2390 = vmatpush1.msra.mxu1 %v6620_v44 }
 0x12c   :  { %2288 = vmatprep.subr.mxu0 %v5197_v42  ;;  %2392 = vmatprep.subr.mxu1 %v6621_v62 }
 0x12d   :  { %2291 = vmatpush1.msra.mxu0 %v5191_v50  ;;  %2394 = vmatpush1.msra.mxu1 %v6622_v56 }
 0x12e   :  { %2294 = vmatprep.subr.mxu0 %v6623_v17  ;;  %2396 = vmatprep.subr.mxu1 %v6624_v5 }
 0x12f   :  { %2297 = vmatpush1.msra.mxu0 %v5211_v37  ;;  %2398 = vmatpush1.msra.mxu1 %v6625_v52 }
 0x130   :  { %2300 = vmatprep.subr.mxu0 %v5240_v60  ;;  %2400 = vmatprep.subr.mxu1 %v6626_v29 }
 0x131   :  { %2303 = vmatpush1.msra.mxu0 %v5244_v31  ;;  %2402 = vmatpush1.msra.mxu1 %v6627_v35 }
 0x132   :  { %2306 = vmatprep.subr.mxu0 %v5257_v14  ;;  %2404 = vmatprep.subr.mxu1 %v6628_v43 }
 0x133   :  { %2309 = vmatpush1.msra.mxu0 %v5261_v57  ;;  %2406 = vmatpush1.msra.mxu1 %v6629_v10  ;;  %v6634_v57 = vld [vmem:[#allocation27_spill] sm:$0xff] }
 0x134   :  { %2312 = vmatprep.subr.mxu0 %v5276_v26  ;;  %2408 = vmatprep.subr.mxu1 %v6630_v1 }
 0x135   :  { %2315 = vmatpush1.msra.mxu0 %v5272_v46  ;;  %2410 = vmatpush1.msra.mxu1 %v6631_v24 }
 0x136   :  { %2318 = vmatprep.subr.mxu0 %v5303_v23  ;;  %2412 = vmatprep.subr.mxu1 %v6632_v15 }
 0x137   :  { %2321 = vmatpush1.msra.mxu0 %v5290_v18  ;;  %2414 = vmatpush1.msra.mxu1 %v6633_v7  ;;  %v6635_v18 = vld [vmem:[#allocation31_spill] sm:$0xff] }
 0x138   :  { %2324 = vmatprep.subr.mxu0 %v5317_v45  ;;  %2416 = vmatprep.subr.mxu1 %v6634_v57  ;;  %v6636_v57 = vand.u32 4294901760, %v4985_v59  ;;  %v6640_v59 = vand.u32 4294901760, %v5016_v8  ;;  %v6645_v8 = vand.u32 4294901760, %v5068_v32  ;;  %v6653_v32 = vand.u32 4294901760, %v5197_v42  ;;  %v171_v42 = vld [vmem:[#allocation7 + $0x378] sm:$0xff] }
 0x139   :  { %2327 = vmatpush1.msra.mxu0 %v5321_v4  ;;  %2418 = vmatpush1.msra.mxu1 %v5201_v33  ;;  %v6637_v33 = vand.u32 4294901760, %v4980_v2  ;;  %v6641_v2 = vand.u32 4294901760, %v5022_v22  ;;  %v6646_v22 = vand.u32 4294901760, %v5053_v11  ;;  %v6652_v11 = vand.u32 4294901760, %v6619_v6 }
 0x13a   :  { %2330 = vmatprep.subr.mxu0 %v5333_v19  ;;  %2420 = vmatprep.subr.mxu1 %v5218_v47  ;;  %v6658_v6 = vand.u32 4294901760, %v5244_v31  ;;  %v6661_v31 = vld [vmem:[#allocation23_spill] sm:$0xff] }
 0x13b   :  { %2333 = vmatpush1.msra.mxu0 %v5337_v28  ;;  %2366 = vmatprep.mubr.f32.mxu0 %v6417_v34  ;;  %v6638_v28 = vand.u32 4294901760, %v5001_v25  ;;  %v6642_v25 = vand.u32 4294901760, %v5032_v53  ;;  %v6647_v53 = vand.u32 4294901760, %v5094_v39  ;;  %v178_v39 = vld [vmem:[#allocation7 + $0x3b0] sm:$0xff] }
 0x13c   :  { %2422 = vmatpush1.msra.mxu1 %v5226_v21  ;;  %2369 = vmatmul.mubr.f32.vlgmr.msra.gmra.mxu0 %v6635_v18  ;;  %v6639_v21 = vand.u32 4294901760, %v4996_v38  ;;  %v6643_v38 = vand.u32 4294901760, %v5038_v51  ;;  %v6648_v51 = vand.u32 4294901760, %v5088_v0  ;;  %v6654_v0 = vand.u32 4294901760, %v5191_v50 }
 0x13d   :  { %2424 = vmatprep.subr.mxu1 %v5234_v61  ;;  %2484 = vmatprep.subr.mxu0 %v6636_v57  ;;  %v6656_v57 = vand.u32 4294901760, %v5211_v37  ;;  %v163_v37 = vld [vmem:[#allocation7 + $0x338] sm:$0xff] }
 0x13e   :  { %2426 = vmatpush1.msra.mxu1 %v5237_v58  ;;  %2488 = vmatpush1.msra.mxu0 %v6637_v33  ;;  %v6644_v33 = vld [vmem:[#allocation32_spill] sm:$0xff] }
 0x13f   :  { %2428 = vmatprep.subr.mxu1 %v5264_v9  ;;  %2492 = vmatprep.subr.mxu0 %v6638_v28  ;;  %v170_v28 = vld [vmem:[#allocation7 + $0x370] sm:$0xff] }
 0x140   :  { %2430 = vmatpush1.msra.mxu1 %v5254_v54  ;;  %2496 = vmatpush1.msra.mxu0 %v6639_v21  ;;  %v6649_v21 = vand.u32 4294901760, %v5129_v20 }
 0x141   :  { %2432 = vmatprep.subr.mxu1 %v5282_v3  ;;  %2500 = vmatprep.subr.mxu0 %v6640_v59  ;;  %v6663_v59 = vand.u32 4294901760, %v5276_v26 }
 0x142   :  { %2434 = vmatpush1.msra.mxu1 %v5292_v49  ;;  %2504 = vmatpush1.msra.mxu0 %v6641_v2 }
 0x143   :  { %2436 = vmatprep.subr.mxu1 %v5299_v63  ;;  %2508 = vmatprep.subr.mxu0 %v6642_v25  ;;  %v6666_v25 = vand.u32 4294901760, %v5272_v46 }
 0x144   :  { %2438 = vmatpush1.msra.mxu1 %v5309_v48  ;;  %2471 = vmatprep.mubr.f32.mxu1 %v6417_v34 }
 0x145   :  { %2512 = vmatpush1.msra.mxu0 %v6643_v38  ;;  %2475 = vmatmul.mubr.f32.vlgmr.msra.gmra.mxu1 %v6644_v33 }
 0x146   :  { %2516 = vmatprep.subr.mxu0 %v6645_v8  ;;  %2650 = vmatprep.subr.mxu1 %v4959_v36  ;;  %v6650_v36 = vand.u32 4294901760, %v5109_v41  ;;  %v6655_v41 = vand.u32 4294901760, %v6623_v17  ;;  %v6659_v17 = vand.u32 4294901760, %v5257_v14 }
 0x147   :  { %2520 = vmatpush1.msra.mxu0 %v6646_v22  ;;  %2652 = vmatpush1.msra.mxu1 %v4961_v27  ;;  %v6651_v27 = vand.u32 4294901760, %v5165_v16 }
 0x148   :  { %2524 = vmatprep.subr.mxu0 %v6647_v53  ;;  %2654 = vmatprep.subr.mxu1 %v4969_v13  ;;  %v187_v13 = vld [vmem:[#allocation7 + $0x3f8] sm:$0xff]  ;;  %v6669_v53 = vld [vmem:[#allocation38_spill] sm:$0xff] }
 0x149   :  { %2528 = vmatpush1.msra.mxu0 %v6648_v51  ;;  %2656 = vmatpush1.msra.mxu1 %v4971_v40  ;;  %v186_v40 = vld [vmem:[#allocation7 + $0x3f0] sm:$0xff]  ;;  %v5493_v16 = vand.u32 4294901760, %v187_v13  ;;  %v147_v51 = vld [vmem:[#allocation7 + $0x2b8] sm:$0xff] }
 0x14a   :  { %2532 = vmatprep.subr.mxu0 %v6649_v21  ;;  %2658 = vmatprep.subr.mxu1 %v4982_v12  ;;  %v179_v12 = vld [vmem:[#allocation7 + $0x3b8] sm:$0xff]  ;;  %v5498_v20 = vand.u32 4294901760, %v186_v40 }
 0x14b   :  { %2536 = vmatpush1.msra.mxu0 %v6650_v36  ;;  %2660 = vmatpush1.msra.mxu1 %v6617_v30  ;;  %v5503_v50 = vand.u32 4294901760, %v179_v12  ;;  %v6657_v30 = vand.u32 4294901760, %v5240_v60  ;;  %v6672_v36 = vld [vmem:[#allocation27_spill] sm:$0xff] }
 0x14c   :  { %2540 = vmatprep.subr.mxu0 %v6651_v27  ;;  %2662 = vmatprep.subr.mxu1 %v6618_v55  ;;  %v5508_v55 = vand.u32 4294901760, %v178_v39  ;;  %v5522_v60 = vsub.f32 %v186_v40, %v5498_v20  ;;  %v138_v40 = vld [vmem:[#allocation7 + $0x270] sm:$0xff] }
 0x14d   :  { %2544 = vmatpush1.msra.mxu0 %v6652_v11  ;;  %2664 = vmatpush1.msra.mxu1 %v6620_v44  ;;  %v5513_v44 = vand.u32 4294901760, %v171_v42 }
 0x14e   :  { %2548 = vmatprep.subr.mxu0 %v6653_v32  ;;  %2666 = vmatprep.subr.mxu1 %v6621_v62  ;;  %v162_v62 = vld [vmem:[#allocation7 + $0x330] sm:$0xff]  ;;  %v5536_v14 = vsub.f32 %v178_v39, %v5508_v55  ;;  %v6329_v46 = vand.u32 4294901760, %v5522_v60  ;;  %v6676_v39 = vand.u32 4294901760, %v5333_v19 }
 0x14f   :  { %2552 = vmatpush1.msra.mxu0 %v6654_v0  ;;  %2668 = vmatpush1.msra.mxu1 %v6622_v56  ;;  %v5516_v56 = vsub.f32 %v187_v13, %v5493_v16  ;;  %v5540_v2 = vand.u32 4294901760, %v162_v62  ;;  %v5547_v26 = vsub.f32 %v171_v42, %v5513_v44  ;;  %v146_v13 = vld [vmem:[#allocation7 + $0x2b0] sm:$0xff]  ;;  %v5594_v42 = vand.u32 4294901760, %v147_v51 }
 0x150   :  { %2556 = vmatprep.subr.mxu0 %v6655_v41  ;;  %2670 = vmatprep.subr.mxu1 %v6624_v5  ;;  %v5524_v5 = vand.u32 4294901760, %v170_v28  ;;  %v6326_v11 = vand.u32 4294901760, %v5536_v14  ;;  %v5605_v19 = vand.u32 4294901760, %v146_v13 }
 0x151   :  { %2560 = vmatpush1.msra.mxu0 %v6656_v57  ;;  %2672 = vmatpush1.msra.mxu1 %v6625_v52  ;;  %v6662_v52 = vand.u32 4294901760, %v6661_v31  ;;  %6665 = vst [vmem:[#allocation20_spill] sm:$0xff] %v5540_v2  ;;  %v6330_v38 = vand.u32 4294901760, %v5516_v56  ;;  %v6325_v0 = vand.u32 4294901760, %v5547_v26  ;;  %6677 = vst [vmem:[#allocation21_spill] sm:$0xff] %v5594_v42  ;;  %v139_v57 = vld [vmem:[#allocation7 + $0x278] sm:$0xff] }
 0x152   :  { %2564 = vmatprep.subr.mxu0 %v6657_v30  ;;  %2674 = vmatprep.subr.mxu1 %v6626_v29  ;;  %6660 = vst [vmem:[#allocation12_spill] sm:$0xff] %v5524_v5  ;;  %v154_v29 = vld [vmem:[#allocation7 + $0x2f0] sm:$0xff]  ;;  %v5553_v8 = vsub.f32 %v170_v28, %v5524_v5  ;;  %v131_v30 = vld [vmem:[#allocation7 + $0x238] sm:$0xff]  ;;  %6680 = vst [vmem:[#allocation37_spill] sm:$0xff] %v5605_v19 }
 0x153   :  { %2568 = vmatpush1.msra.mxu0 %v6658_v6  ;;  %2676 = vmatpush1.msra.mxu1 %v6627_v35  ;;  %v5530_v35 = vsub.f32 %v179_v12, %v5503_v50  ;;  %v5555_v22 = vand.u32 4294901760, %v154_v29  ;;  %v6675_v12 = vld [vmem:[#allocation36_spill] sm:$0xff]  ;;  %v6683_v31 = vld [vmem:[#allocation30_spill] sm:$0xff] }
 0x154   :  { %2572 = vmatprep.subr.mxu0 %v6659_v17  ;;  %2678 = vmatprep.subr.mxu1 %v6628_v43  ;;  %v5538_v43 = vand.u32 4294901760, %v163_v37  ;;  %v6323_v28 = vand.u32 4294901760, %v5553_v8  ;;  %v6678_v6 = vld [vmem:[#allocation24_spill] sm:$0xff]  ;;  %v6682_v17 = vld [vmem:[#allocation34_spill] sm:$0xff] }
 0x155   :  { %2576 = vmatpush1.msra.mxu0 %v6662_v52  ;;  %2680 = vmatpush1.msra.mxu1 %v6629_v10  ;;  %v155_v10 = vld [vmem:[#allocation7 + $0x2f8] sm:$0xff]  ;;  %6668 = vst [vmem:[#allocation13_spill] sm:$0xff] %v5555_v22  ;;  %v6327_v21 = vand.u32 4294901760, %v5530_v35  ;;  %v5587_v41 = vsub.f32 %v154_v29, %v5555_v22  ;;  %v5614_v52 = vsub.f32 %v5536_v14, %v6326_v11 }
 0x156   :  { %2580 = vmatprep.subr.mxu0 %v6663_v59  ;;  %2682 = vmatprep.subr.mxu1 %v6630_v1  ;;  %6664 = vst [vmem:[#allocation33_spill] sm:$0xff] %v5538_v43  ;;  %v6667_v1 = vand.u32 4294901760, %v5303_v23  ;;  %v6671_v23 = vand.u32 4294901760, %v5317_v45  ;;  %v5568_v27 = vand.u32 4294901760, %v155_v10  ;;  %v5572_v32 = vsub.f32 %v163_v37, %v5538_v43  ;;  %v130_v59 = vld [vmem:[#allocation7 + $0x230] sm:$0xff]  ;;  %v107_v11 = vld [vmem:[#allocation7 + $0x178] sm:$0xff] }
 0x157   :  { %2584 = vmatpush1.msra.mxu0 %v6666_v25  ;;  %2684 = vmatpush1.msra.mxu1 %v6631_v24  ;;  %v6670_v24 = vand.u32 4294901760, %v6669_v53  ;;  %v5580_v45 = vsub.f32 %v5516_v56, %v6330_v38  ;;  %v6679_v37 = vand.u32 4294901760, %v6678_v6  ;;  %v5654_v6 = vand.u32 4294901760, %v130_v59  ;;  %v98_v38 = vld [vmem:[#allocation7 + $0x130] sm:$0xff] }
 0x158   :  { %2588 = vmatprep.subr.mxu0 %v6667_v1  ;;  %2686 = vmatprep.subr.mxu1 %v6632_v15  ;;  %v5566_v15 = vsub.f32 %v162_v62, %v5540_v2  ;;  %6673 = vst [vmem:[#allocation29_spill] sm:$0xff] %v5568_v27  ;;  %v5607_v62 = vand.u32 4294901760, %v138_v40  ;;  %v6322_v29 = vand.u32 4294901760, %v5572_v32  ;;  %v5619_v1 = vsub.f32 %v155_v10, %v5568_v27 }
 0x159   :  { %2592 = vmatpush1.msra.mxu0 %v6670_v24  ;;  %2688 = vmatpush1.msra.mxu1 %v6633_v7  ;;  %v6674_v7 = vand.u32 4294901760, %v5321_v4  ;;  %v5592_v4 = vsub.f32 %v5522_v60, %v6329_v46  ;;  %v2865_v53 = vand.u32 4294901760, %v5580_v45  ;;  %v5624_v24 = vand.u32 4294901760, %v139_v57  ;;  %6686 = vst [vmem:[#allocation17_spill] sm:$0xff] %v5654_v6 }
 0x15a   :  { %2596 = vmatprep.subr.mxu0 %v6671_v23  ;;  %2690 = vmatprep.subr.mxu1 %v6672_v36  ;;  %6681 = vst [vmem:[#allocation15_spill] sm:$0xff] %v5607_v62  ;;  %v6324_v25 = vand.u32 4294901760, %v5566_v15  ;;  %v5629_v23 = vsub.f32 %v5547_v26, %v6325_v0  ;;  %v5631_v36 = vand.u32 4294901760, %v131_v30  ;;  %v5643_v45 = vsub.f32 %v147_v51, %v5594_v42 }
 0x15b   :  { %2600 = vmatpush1.msra.mxu0 %v6674_v7  ;;  %2692 = vmatpush1.msra.mxu1 %v6675_v12  ;;  %6684 = vst [vmem:[#allocation14_spill] sm:$0xff] %v5624_v24  ;;  %v2871_v10 = vand.u32 4294901760, %v5592_v4  ;;  %v122_v7 = vld [vmem:[#allocation7 + $0x1f0] sm:$0xff]  ;;  %v6328_v12 = vand.u32 4294901760, %v5587_v41  ;;  %v5652_v4 = vsub.f32 %v138_v40, %v5607_v62  ;;  %v2883_v51 = vand.u32 4294901760, %v5614_v52  ;;  %v115_v52 = vld [vmem:[#allocation7 + $0x1b8] sm:$0xff] }
 0x15c   :  { %2604 = vmatprep.subr.mxu0 %v6676_v39  ;;  %2694 = vmatprep.subr.mxu1 %v5218_v47  ;;  %v5603_v47 = vsub.f32 %v5530_v35, %v6327_v21  ;;  %6685 = vst [vmem:[#allocation16_spill] sm:$0xff] %v5631_v36  ;;  %v5649_v39 = vsub.f32 %v146_v13, %v5605_v19  ;;  %v6331_v40 = vand.u32 4294901760, %v5619_v1  ;;  %v6332_v0 = vand.u32 4294901760, %v5643_v45  ;;  %v90_v21 = vld [vmem:[#allocation7 + $0xf0] sm:$0xff] }
 0x15d   :  { %2608 = vmatpush1.msra.mxu0 %v6679_v37  ;;  %2641 = vmatprep.mubr.f32.mxu0 %v6417_v34  ;;  %v123_v37 = vld [vmem:[#allocation7 + $0x1f8] sm:$0xff]  ;;  %v5667_v13 = vsub.f32 %v5566_v15, %v6324_v25  ;;  %v5710_v46 = vand.u32 4294901760, %v115_v52  ;;  %v5728_v18 = vand.u32 4294901760, %v107_v11 }
 0x15e   :  { %2696 = vmatpush1.msra.mxu1 %v6682_v17  ;;  %2643 = vmatmul.mubr.f32.vlgmr.msra.gmra.mxu0 %v6683_v31  ;;  %v5673_v17 = vand.u32 4294901760, %v122_v7  ;;  %v5726_v33 = vsub.f32 %v5643_v45, %v6332_v0  ;;  %v6697_v0 = vand.u32 4294901760, %v5652_v4 }
 0x15f   :  { %2698 = vmatprep.subr.mxu1 %v5234_v61  ;;  %2754 = vmatprep.subr.mxu0 %v5493_v16  ;;  %v5639_v61 = vsub.f32 %v5553_v8, %v6323_v28  ;;  %v5679_v28 = vsub.f32 %v131_v30, %v5631_v36  ;;  %6691 = vst [vmem:[#allocation26_spill] sm:$0xff] %v5710_v46  ;;  %6694 = vst [vmem:[#allocation38_spill] sm:$0xff] %v5728_v18 }
 0x160   :  { %2700 = vmatpush1.msra.mxu1 %v5237_v58  ;;  %2756 = vmatpush1.msra.mxu0 %v5498_v20  ;;  %v2877_v58 = vand.u32 4294901760, %v5603_v47  ;;  %v114_v47 = vld [vmem:[#allocation7 + $0x1b0] sm:$0xff]  ;;  %6687 = vst [vmem:[#allocation18_spill] sm:$0xff] %v5673_v17 }
 0x161   :  { %2702 = vmatprep.subr.mxu1 %v5264_v9  ;;  %2758 = vmatprep.subr.mxu0 %v5503_v50  ;;  %v5662_v9 = vsub.f32 %v5572_v32, %v6322_v29  ;;  %v5676_v29 = vsub.f32 %v139_v57, %v5624_v24  ;;  %6688 = vst [vmem:[#allocation19_spill] sm:$0xff] %v5679_v28  ;;  %v2895_v25 = vand.u32 4294901760, %v5639_v61  ;;  %v106_v57 = vld [vmem:[#allocation7 + $0x170] sm:$0xff]  ;;  %v5697_v30 = vand.u32 4294901760, %v114_v47 }
 0x162   :  { %2704 = vmatpush1.msra.mxu1 %v5254_v54  ;;  %2760 = vmatpush1.msra.mxu0 %v5508_v55  ;;  %v2889_v54 = vand.u32 4294901760, %v5629_v23  ;;  %v5689_v23 = vsub.f32 %v5587_v41, %v6328_v12 }
 0x163   :  { %2706 = vmatprep.subr.mxu1 %v5282_v3  ;;  %2762 = vmatprep.subr.mxu0 %v5513_v44  ;;  %v5684_v3 = vand.u32 4294901760, %v123_v37  ;;  %6690 = vst [vmem:[#allocation28_spill] sm:$0xff] %v5697_v30  ;;  %v2901_v12 = vand.u32 4294901760, %v5662_v9  ;;  %v5718_v9 = vand.u32 4294901760, %v106_v57  ;;  %v5735_v61 = vsub.f32 %v114_v47, %v5697_v30 }
 0x164   :  { %2708 = vmatpush1.msra.mxu1 %v5292_v49  ;;  %2764 = vmatpush1.msra.mxu0 %v5524_v5  ;;  %v5695_v49 = vsub.f32 %v130_v59, %v5654_v6  ;;  %v5708_v59 = vsub.f32 %v5619_v1, %v6331_v40  ;;  %v2919_v40 = vand.u32 4294901760, %v5689_v23 }
 0x165   :  { %6689 = vst [vmem:[#allocation25_spill] sm:$0xff] %v5684_v3  ;;  %2710 = vmatprep.subr.mxu1 %v5299_v63  ;;  %2766 = vmatprep.subr.mxu0 %v5538_v43  ;;  %v2907_v63 = vand.u32 4294901760, %v5667_v13  ;;  %6693 = vst [vmem:[#allocation23_spill] sm:$0xff] %v5718_v9  ;;  %v99_v13 = vld [vmem:[#allocation7 + $0x138] sm:$0xff]  ;;  %v5762_v5 = vsub.f32 %v106_v57, %v5718_v9  ;;  %v5777_v57 = vsub.f32 %v107_v11, %v5728_v18 }
 0x166   :  { %2712 = vmatpush1.msra.mxu1 %v5309_v48  ;;  %2745 = vmatprep.mubr.f32.mxu1 %v6417_v34  ;;  %v5715_v48 = vsub.f32 %v122_v7, %v5673_v17  ;;  %v5731_v7 = vsub.f32 %v123_v37, %v5684_v3  ;;  %v91_v37 = vld [vmem:[#allocation7 + $0xf8] sm:$0xff]  ;;  %v5751_v47 = vand.u32 4294901760, %v99_v13 }
 0x167   :  { %2768 = vmatpush1.msra.mxu0 %v5540_v2  ;;  %2747 = vmatmul.mubr.f32.vlgmr.msra.gmra.mxu1 %v6683_v31  ;;  %v5747_v2 = vand.u32 4294901760, %v98_v38 }
 0x168   :  { %6692 = vst [vmem:[#allocation22_spill] sm:$0xff] %v5715_v48  ;;  %2770 = vmatprep.subr.mxu0 %v5568_v27  ;;  %2866 = vmatprep.subr.mxu1 %v2865_v53  ;;  %6695 = vst [vmem:[#allocation27_spill] sm:$0xff] %v5731_v7  ;;  %v6696_v53 = vand.u32 4294901760, %v5649_v39  ;;  %v5745_v27 = vsub.f32 %v5652_v4, %v6697_v0  ;;  %v6700_v0 = vand.u32 4294901760, %v5676_v29 }
 0x169   :  { %2772 = vmatpush1.msra.mxu0 %v5555_v22  ;;  %2872 = vmatpush1.msra.mxu1 %v2871_v10  ;;  %6698 = vst [vmem:[#allocation36_spill] sm:$0xff] %v5747_v2  ;;  %v2913_v10 = vand.u32 4294901760, %v5708_v59  ;;  %6699 = vst [vmem:[#allocation24_spill] sm:$0xff] %v5751_v47  ;;  %v6703_v22 = vand.u32 4294901760, %v5695_v49 }
 0x16a   :  { %v5740_v23 = vsub.f32 %v5649_v39, %v6696_v53  ;;  %2774 = vmatprep.subr.mxu0 %v5594_v42  ;;  %2878 = vmatprep.subr.mxu1 %v2877_v58  ;;  %v5755_v53 = vsub.f32 %v115_v52, %v5710_v46  ;;  %v2936_v43 = vsub.f32 %v5676_v29, %v6700_v0  ;;  %v6701_v58 = vand.u32 4294901760, %v5679_v28  ;;  %v83_v0 = vld [vmem:[#allocation7 + $0xb8] sm:$0xff] }
 0x16b   :  { %2776 = vmatpush1.msra.mxu0 %v5605_v19  ;;  %2884 = vmatpush1.msra.mxu1 %v2883_v51  ;;  %v5769_v42 = vand.u32 4294901760, %v90_v21  ;;  %v2925_v52 = vand.u32 4294901760, %v5726_v33  ;;  %v5773_v51 = vand.u32 4294901760, %v91_v37  ;;  %v2943_v19 = vand.u32 4294901760, %v5745_v27 }
 0x16c   :  { %v5767_v59 = vsub.f32 %v5679_v28, %v6701_v58  ;;  %2778 = vmatprep.subr.mxu0 %v5624_v24  ;;  %2890 = vmatprep.subr.mxu1 %v2889_v54  ;;  %v2931_v58 = vand.u32 4294901760, %v5740_v23  ;;  %v5783_v24 = vsub.f32 %v98_v38, %v5747_v2  ;;  %v82_v54 = vld [vmem:[#allocation7 + $0xb0] sm:$0xff]  ;;  %v2954_v11 = vsub.f32 %v5695_v49, %v6703_v22  ;;  %v75_v23 = vld [vmem:[#allocation7 + $0x78] sm:$0xff] }
 0x16d   :  { %6702 = vst [vmem:[#allocation34_spill] sm:$0xff] %v5773_v51  ;;  %2780 = vmatpush1.msra.mxu0 %v5607_v62  ;;  %2896 = vmatpush1.msra.mxu1 %v2895_v25  ;;  %v74_v28 = vld [vmem:[#allocation7 + $0x70] sm:$0xff]  ;;  %v5793_v27 = vsub.f32 %v99_v13, %v5751_v47  ;;  %v2937_v38 = vand.u32 4294901760, %v2936_v43  ;;  %v6705_v22 = vand.u32 4294901760, %v5731_v7  ;;  %v5806_v13 = vand.u32 4294901760, %v82_v54 }
 0x16e   :  { %2782 = vmatprep.subr.mxu0 %v5631_v36  ;;  %2902 = vmatprep.subr.mxu1 %v2901_v12  ;;  %v2949_v33 = vand.u32 4294901760, %v5767_v59  ;;  %v5798_v12 = vsub.f32 %v90_v21, %v5769_v42  ;;  %v5800_v36 = vand.u32 4294901760, %v83_v0  ;;  %v66_v43 = vld [vmem:[#allocation7 + $0x30] sm:$0xff]  ;;  %v5810_v59 = vsub.f32 %v91_v37, %v5773_v51 }
 0x16f   :  { %6704 = vst [vmem:[#allocation39_spill] sm:$0xff] %v5793_v27  ;;  %2784 = vmatpush1.msra.mxu0 %v5654_v6  ;;  %2908 = vmatpush1.msra.mxu1 %v2907_v63  ;;  %v2960_v25 = vsub.f32 %v5731_v7, %v6705_v22  ;;  %v67_v63 = vld [vmem:[#allocation7 + $0x38] sm:$0xff]  ;;  %v6706_v21 = vand.u32 4294901760, %v5715_v48  ;;  %v5818_v6 = vand.u32 4294901760, %v74_v28  ;;  %v2955_v62 = vand.u32 4294901760, %v2954_v11 }
 0x170   :  { %2786 = vmatprep.subr.mxu0 %v5684_v3  ;;  %2914 = vmatprep.subr.mxu1 %v2913_v10  ;;  %v5816_v3 = vand.u32 4294901760, %v75_v23  ;;  %v6707_v37 = vand.u32 4294901760, %v5755_v53  ;;  %v5832_v22 = vand.u32 4294901760, %v66_v43  ;;  %v5836_v11 = vsub.f32 %v83_v0, %v5800_v36 }
 0x171   :  { %2788 = vmatpush1.msra.mxu0 %v5673_v17  ;;  %2920 = vmatpush1.msra.mxu1 %v2919_v40  ;;  %v2966_v10 = vsub.f32 %v5715_v48, %v6706_v21  ;;  %v6708_v40 = vand.u32 4294901760, %v5735_v61  ;;  %v5830_v48 = vand.u32 4294901760, %v67_v63  ;;  %v6710_v21 = vand.u32 4294901760, %v5777_v57 }
 0x172   :  { %2790 = vmatprep.subr.mxu0 %v5710_v46  ;;  %2926 = vmatprep.subr.mxu1 %v2925_v52  ;;  %v2972_v7 = vsub.f32 %v5755_v53, %v6707_v37  ;;  %6709 = vst [vmem:[#allocation40_spill] sm:$0xff] %v5836_v11  ;;  %v2961_v37 = vand.u32 4294901760, %v2960_v25  ;;  %v5848_v0 = vsub.f32 %v74_v28, %v5818_v6 }
 0x173   :  { %v2978_v17 = vsub.f32 %v5735_v61, %v6708_v40  ;;  %2792 = vmatpush1.msra.mxu0 %v5697_v30  ;;  %2932 = vmatpush1.msra.mxu1 %v2931_v58  ;;  %v5840_v40 = vsub.f32 %v82_v54, %v5806_v13  ;;  %v2984_v58 = vsub.f32 %v5777_v57, %v6710_v21  ;;  %v2967_v52 = vand.u32 4294901760, %v2966_v10 }
 0x174   :  { %2794 = vmatprep.subr.mxu0 %v5728_v18  ;;  %2938 = vmatprep.subr.mxu1 %v2937_v38  ;;  %v6711_v18 = vand.u32 4294901760, %v5762_v5  ;;  %v5854_v54 = vsub.f32 %v75_v23, %v5816_v3  ;;  %v5856_v38 = vld [vmem:[#allocation2] sm:$0xff]  ;;  %v2973_v21 = vand.u32 4294901760, %v2972_v7  ;;  %v6716_v23 = vand.u32 4294901760, %v5783_v24 }
 0x175   :  { %2796 = vmatpush1.msra.mxu0 %v5718_v9  ;;  %2944 = vmatpush1.msra.mxu1 %v2943_v19  ;;  %6713 = vst [vmem:[#allocation42_spill] sm:$0xff] %v5856_v38  ;;  %v2979_v30 = vand.u32 4294901760, %v2978_v17  ;;  %v6714_v19 = vand.u32 4294901760, %v5793_v27  ;;  %v5872_v17 = vsub.f32 %v67_v63, %v5830_v48  ;;  %v2985_v7 = vand.u32 4294901760, %v2984_v58 }
 0x176   :  { %v2990_v25 = vsub.f32 %v5762_v5, %v6711_v18  ;;  %6712 = vst [vmem:[#allocation41_spill] sm:$0xff] %v5854_v54  ;;  %2798 = vmatprep.subr.mxu0 %v5751_v47  ;;  %2950 = vmatprep.subr.mxu1 %v2949_v33  ;;  %v5865_v18 = vsub.f32 %v66_v43, %v5832_v22  ;;  %v3608_v28 = vand.u32 2147483647, %v5856_v38  ;;  %v6720_v38 = vand.u32 4294901760, %v5836_v11 }
 0x177   :  { %v2996_v10 = vsub.f32 %v5793_v27, %v6714_v19  ;;  %2800 = vmatpush1.msra.mxu0 %v5747_v2  ;;  %2956 = vmatpush1.msra.mxu1 %v2955_v62  ;;  %v3002_v9 = vsub.f32 %v5783_v24, %v6716_v23  ;;  %6717 = vst [vmem:[#allocation44_spill] sm:$0xff] %v5872_v17  ;;  %v6718_v19 = vand.u32 4294901760, %v5810_v59 }
 0x178   :  { %6715 = vst [vmem:[#allocation43_spill] sm:$0xff] %v5865_v18  ;;  %2802 = vmatprep.subr.mxu0 %v5773_v51  ;;  %2962 = vmatprep.subr.mxu1 %v2961_v37  ;;  %v2991_v23 = vand.u32 4294901760, %v2990_v25  ;;  %v6719_v37 = vand.u32 4294901760, %v5798_v12  ;;  %v6374_v25 = vand.u32 4294901760, %v5872_v17  ;;  %v3610_v33 = vsub.f32 0.0, %v3608_v28 }
 0x179   :  { %v3008_v62 = vsub.f32 %v5810_v59, %v6718_v19  ;;  %2804 = vmatpush1.msra.mxu0 %v5769_v42  ;;  %2968 = vmatpush1.msra.mxu1 %v2967_v52  ;;  %v2997_v63 = vand.u32 4294901760, %v2996_v10  ;;  %v3003_v43 = vand.u32 4294901760, %v3002_v9  ;;  %v3020_v52 = vsub.f32 %v5836_v11, %v6720_v38 }
 0x17a   :  { %2806 = vmatprep.subr.mxu0 %v5800_v36  ;;  %2974 = vmatprep.subr.mxu1 %v2973_v21  ;;  %v3014_v58 = vsub.f32 %v5798_v12, %v6719_v37  ;;  %v6721_v10 = vand.u32 4294901760, %v5840_v40  ;;  %v6373_v19 = vand.u32 4294901760, %v5865_v18  ;;  %v3044_v28 = vsub.f32 %v5872_v17, %v6374_v25  ;;  %v6739_v25 = vld [vmem:[#allocation25_spill] sm:$0xff] }
 0x17b   :  { %2808 = vmatpush1.msra.mxu0 %v5806_v13  ;;  %2980 = vmatpush1.msra.mxu1 %v2979_v30  ;;  %v3009_v21 = vand.u32 4294901760, %v3008_v62  ;;  %v6722_v30 = vand.u32 4294901760, %v5854_v54 }
 0x17c   :  { %2810 = vmatprep.subr.mxu0 %v5816_v3  ;;  %2986 = vmatprep.subr.mxu1 %v2985_v7  ;;  %v3026_v37 = vsub.f32 %v5840_v40, %v6721_v10  ;;  %v3015_v38 = vand.u32 4294901760, %v3014_v58  ;;  %v6723_v7 = vand.u32 4294901760, %v5848_v0  ;;  %v3021_v10 = vand.u32 4294901760, %v3020_v52 }
 0x17d   :  { %2812 = vmatpush1.msra.mxu0 %v5818_v6  ;;  %2992 = vmatpush1.msra.mxu1 %v2991_v23  ;;  %v3032_v9 = vsub.f32 %v5854_v54, %v6722_v30  ;;  %v3612_v58 = vmul.f32 1.442695, %v3610_v33  ;;  %v6724_v30 = vld [vmem:[#allocation35_spill] sm:$0xff]  ;;  %v3045_v52 = vand.u32 4294901760, %v3044_v28  ;;  %v6725_v33 = vld [vmem:[#allocation12_spill] sm:$0xff]  ;;  %v6730_v28 = vld [vmem:[#allocation29_spill] sm:$0xff] }
 0x17e   :  { %2814 = vmatprep.subr.mxu0 %v5830_v48  ;;  %2998 = vmatprep.subr.mxu1 %v2997_v63  ;;  %v3038_v62 = vsub.f32 %v5848_v0, %v6723_v7  ;;  %v3027_v23 = vand.u32 4294901760, %v3026_v37  ;;  %v3050_v63 = vsub.f32 %v5865_v18, %v6373_v19  ;;  %v6726_v37 = vld [vmem:[#allocation19_spill] sm:$0xff]  ;;  %v6738_v19 = vld [vmem:[#allocation17_spill] sm:$0xff] }
 0x17f   :  { %2816 = vmatpush1.msra.mxu0 %v5832_v22  ;;  %3004 = vmatpush1.msra.mxu1 %v3003_v43  ;;  %v3033_v7 = vand.u32 4294901760, %v3032_v9  ;;  %3730 = vpow2.f32 %v3612_v58  ;;  %v6727_v9 = vld [vmem:[#allocation33_spill] sm:$0xff] }
 0x180   :  { %2849 = vmatprep.mubr.f32.mxu0 %v6417_v34  ;;  %3010 = vmatprep.subr.mxu1 %v3009_v21  ;;  %v3039_v43 = vand.u32 4294901760, %v3038_v62  ;;  %v3051_v21 = vand.u32 4294901760, %v3050_v63  ;;  %v6728_v62 = vld [vmem:[#allocation20_spill] sm:$0xff]  ;;  %v6732_v63 = vld [vmem:[#allocation13_spill] sm:$0xff] }
 0x181   :  { %3095 = vmatprep.subr.mxu0 %v5516_v56  ;;  %2855 = vmatmul.mubr.f32.vlgmr.msra.gmra.mxu0 %v6724_v30  ;;  %v6733_v58 = vld [vmem:[#allocation21_spill] sm:$0xff] }
 0x182   :  { %3016 = vmatpush1.msra.mxu1 %v3015_v38  ;;  %3098 = vmatpush1.msra.mxu0 %v5522_v60 }
 0x183   :  { %3022 = vmatprep.subr.mxu1 %v3021_v10  ;;  %3101 = vmatprep.subr.mxu0 %v5530_v35  ;;  %v6729_v10 = vld [vmem:[#allocation27_spill] sm:$0xff] }
 0x184   :  { %3028 = vmatpush1.msra.mxu1 %v3027_v23  ;;  %3104 = vmatpush1.msra.mxu0 %v5536_v14  ;;  %v6731_v23 = vld [vmem:[#allocation22_spill] sm:$0xff] }
 0x185   :  { %3034 = vmatprep.subr.mxu1 %v3033_v7  ;;  %3107 = vmatprep.subr.mxu0 %v5547_v26  ;;  %v6734_v7 = vld [vmem:[#allocation37_spill] sm:$0xff] }
 0x186   :  { %3040 = vmatpush1.msra.mxu1 %v3039_v43  ;;  %3110 = vmatpush1.msra.mxu0 %v5553_v8  ;;  %v6735_v43 = vld [vmem:[#allocation14_spill] sm:$0xff] }
 0x187   :  { %3046 = vmatprep.subr.mxu1 %v3045_v52  ;;  %3113 = vmatprep.subr.mxu0 %v5572_v32  ;;  %v6736_v52 = vld [vmem:[#allocation15_spill] sm:$0xff] }
 0x188   :  { %3052 = vmatpush1.msra.mxu1 %v3051_v21  ;;  %3085 = vmatprep.mubr.f32.mxu1 %v6417_v34  ;;  %v6737_v21 = vld [vmem:[#allocation16_spill] sm:$0xff] }
 0x189   :  { %3116 = vmatpush1.msra.mxu0 %v5566_v15  ;;  %3087 = vmatmul.mubr.f32.vlgmr.msra.gmra.mxu1 %v6683_v31  ;;  %v6740_v31 = vld [vmem:[#allocation18_spill] sm:$0xff] }
 0x18a   :  { %3119 = vmatprep.subr.mxu0 %v5619_v1  ;;  %3231 = vmatprep.subr.mxu1 %v5493_v16 }
 0x18b   :  { %3122 = vmatpush1.msra.mxu0 %v5587_v41  ;;  %3233 = vmatpush1.msra.mxu1 %v5498_v20 }
 0x18c   :  { %3125 = vmatprep.subr.mxu0 %v5643_v45  ;;  %3235 = vmatprep.subr.mxu1 %v5503_v50  ;;  %v3731_v38 = vpop.eup %3730 }
 0x18d   :  { %3128 = vmatpush1.msra.mxu0 %v5649_v39  ;;  %3237 = vmatpush1.msra.mxu1 %v5508_v55  ;;  %v5946_v30 = vadd.f32 1.0, %v3731_v38 }
 0x18e   :  { %3131 = vmatprep.subr.mxu0 %v5676_v29  ;;  %3239 = vmatprep.subr.mxu1 %v5513_v44 }
 0x18f   :  { %3134 = vmatpush1.msra.mxu0 %v5652_v4  ;;  %3241 = vmatpush1.msra.mxu1 %v6725_v33  ;;  %3732 = vrcp.f32 %v5946_v30 }
 0x190   :  { %3137 = vmatprep.subr.mxu0 %v6726_v37  ;;  %3243 = vmatprep.subr.mxu1 %v6727_v9  ;;  %3734 = vlog2.f32 %v5946_v30  ;;  %v6767_v30 = vand.u32 4294901760, %v5777_v57 }
 0x191   :  { %3140 = vmatpush1.msra.mxu0 %v5695_v49  ;;  %3245 = vmatpush1.msra.mxu1 %v6728_v62 }
 0x192   :  { %3143 = vmatprep.subr.mxu0 %v6729_v10  ;;  %3247 = vmatprep.subr.mxu1 %v6730_v28 }
 0x193   :  { %3146 = vmatpush1.msra.mxu0 %v6731_v23  ;;  %3249 = vmatpush1.msra.mxu1 %v6732_v63 }
 0x194   :  { %3149 = vmatprep.subr.mxu0 %v5755_v53  ;;  %3251 = vmatprep.subr.mxu1 %v6733_v58 }
 0x195   :  { %3152 = vmatpush1.msra.mxu0 %v5735_v61  ;;  %3253 = vmatpush1.msra.mxu1 %v6734_v7 }
 0x196   :  { %3155 = vmatprep.subr.mxu0 %v5777_v57  ;;  %3255 = vmatprep.subr.mxu1 %v6735_v43 }
 0x197   :  { %3158 = vmatpush1.msra.mxu0 %v5762_v5  ;;  %3257 = vmatpush1.msra.mxu1 %v6736_v52 }
 0x198   :  { %3161 = vmatprep.subr.mxu0 %v5793_v27  ;;  %3259 = vmatprep.subr.mxu1 %v6737_v21  ;;  %v5965_v27 = vpop.f32.mrf.mxu0  ;;  %v6741_v21 = vld [vmem:[#allocation28_spill] sm:$0xff] }
 0x199   :  { %3164 = vmatpush1.msra.mxu0 %v5783_v24  ;;  %3261 = vmatpush1.msra.mxu1 %v6738_v19  ;;  %v6742_v19 = vld [vmem:[#allocation38_spill] sm:$0xff] }
 0x19a   :  { %3167 = vmatprep.subr.mxu0 %v5810_v59  ;;  %3263 = vmatprep.subr.mxu1 %v6739_v25  ;;  %v6743_v25 = vld [vmem:[#allocation23_spill] sm:$0xff] }
 0x19b   :  { %3170 = vmatpush1.msra.mxu0 %v5798_v12  ;;  %3265 = vmatpush1.msra.mxu1 %v6740_v31 }
 0x19c   :  { %3173 = vmatprep.subr.mxu0 %v5836_v11  ;;  %3267 = vmatprep.subr.mxu1 %v5710_v46  ;;  %v5975_v11 = vpop.f32.mrf.mxu0  ;;  %v5977_v46 = vpop.f32.mrf.mxu1 }
 0x19d   :  { %3176 = vmatpush1.msra.mxu0 %v5840_v40  ;;  %3269 = vmatpush1.msra.mxu1 %v6741_v21 }
 0x19e   :  { %3179 = vmatprep.subr.mxu0 %v5854_v54  ;;  %3271 = vmatprep.subr.mxu1 %v6742_v19  ;;  %v6744_v54 = vld [vmem:[#allocation31_spill] sm:$0xff]  ;;  %v5983_v19 = vpop.f32.mrf.mxu0 }
 0x19f   :  { %3182 = vmatpush1.msra.mxu0 %v5848_v0  ;;  %3273 = vmatpush1.msra.mxu1 %v6743_v25  ;;  %v3733_v25 = vpop.eup %3732 }
 0x1a0   :  { %3185 = vmatprep.subr.mxu0 %v5872_v17  ;;  %3275 = vmatprep.subr.mxu1 %v5751_v47  ;;  %v6745_v17 = vand.u32 4294901760, %v5516_v56  ;;  %v6746_v47 = vand.u32 4294901760, %v5522_v60  ;;  %v6749_v60 = vand.u32 4294901760, %v5547_v26 }
 0x1a1   :  { %3188 = vmatpush1.msra.mxu0 %v5865_v18  ;;  %3221 = vmatprep.mubr.f32.mxu0 %v6417_v34  ;;  %v525_v18 = vpop.f32.mrf.mxu1 }
 0x1a2   :  { %3277 = vmatpush1.msra.mxu1 %v5747_v2  ;;  %3224 = vmatmul.mubr.f32.vlgmr.msra.gmra.mxu0 %v6744_v54  ;;  %v6747_v2 = vand.u32 4294901760, %v5530_v35  ;;  %v6748_v54 = vand.u32 4294901760, %v5536_v14  ;;  %v3624_v35 = vmul.f32 %v3733_v25, %v3731_v38  ;;  %v6751_v14 = vand.u32 4294901760, %v5572_v32 }
 0x1a3   :  { %3279 = vmatprep.subr.mxu1 %v5773_v51  ;;  %3339 = vmatprep.subr.mxu0 %v6745_v17  ;;  %v5997_v51 = vpop.f32.mrf.mxu0  ;;  %v5999_v56 = vpop.f32.mrf.mxu1  ;;  %v6752_v17 = vld [vmem:[#allocation42_spill] sm:$0xff]  ;;  %v6755_v38 = vand.u32 4294901760, %v5619_v1  ;;  %v6758_v1 = vand.u32 4294901760, %v5649_v39  ;;  %v6762_v39 = vand.u32 4294901760, %v5695_v49 }
 0x1a4   :  { %3281 = vmatpush1.msra.mxu1 %v5769_v42  ;;  %3343 = vmatpush1.msra.mxu0 %v6746_v47  ;;  %v6750_v47 = vand.u32 4294901760, %v5553_v8  ;;  %vm3622_vm0 = vcmp.ge.f32.partialorder %v6752_v17, 0.0  ;;  %v6754_v8 = vld [vmem:[#allocation32_spill] sm:$0xff] }
 0x1a5   :  { %3283 = vmatprep.subr.mxu1 %v5800_v36  ;;  %3347 = vmatprep.subr.mxu0 %v6747_v2  ;;  %v6007_v2 = vpop.f32.mrf.mxu0  ;;  %v6015_v26 = vpop.f32.mrf.mxu1  ;;  %v3626_v32 = vsel %vm3622_vm0, %v3733_v25, %v3624_v35  ;;  %v6759_v25 = vand.u32 4294901760, %v5676_v29  ;;  %v6763_v29 = vand.u32 4294901760, %v6729_v10 }
 0x1a6   :  { %3285 = vmatpush1.msra.mxu1 %v5806_v13  ;;  %3351 = vmatpush1.msra.mxu0 %v6748_v54  ;;  %v6753_v54 = vand.u32 4294901760, %v5566_v15  ;;  %v6757_v15 = vand.u32 4294901760, %v5643_v45 }
 0x1a7   :  { %3287 = vmatprep.subr.mxu1 %v5816_v3  ;;  %3355 = vmatprep.subr.mxu0 %v6749_v60  ;;  %v6023_v60 = vpop.f32.mrf.mxu0 }
 0x1a8   :  { %3289 = vmatpush1.msra.mxu1 %v5818_v6  ;;  %3359 = vmatpush1.msra.mxu0 %v6750_v47  ;;  %v6025_v47 = vpop.f32.mrf.mxu1 }
 0x1a9   :  { %3291 = vmatprep.subr.mxu1 %v5830_v48  ;;  %3363 = vmatprep.subr.mxu0 %v6751_v14  ;;  %v6756_v14 = vand.u32 4294901760, %v5587_v41  ;;  %v6760_v41 = vand.u32 4294901760, %v5652_v4  ;;  %v57_v4 = vld [vmem:[#allocation5] sm:$0xff] }
 0x1aa   :  { %3293 = vmatpush1.msra.mxu1 %v5832_v22  ;;  %3326 = vmatprep.mubr.f32.mxu1 %v6417_v34 }
 0x1ab   :  { %3367 = vmatpush1.msra.mxu0 %v6753_v54  ;;  %3330 = vmatmul.mubr.f32.vlgmr.msra.gmra.mxu1 %v6754_v8  ;;  %v1146_v54 = vpop.f32.mrf.mxu0 }
 0x1ac   :  { %3371 = vmatprep.subr.mxu0 %v6755_v38  ;;  %3505 = vmatprep.subr.mxu1 %v5493_v16  ;;  %v3628_v16 = vmul.f32 2.0, %v3626_v32  ;;  %v6773_v38 = vld [vmem:[#allocation17_spill] sm:$0xff] }
 0x1ad   :  { %3375 = vmatpush1.msra.mxu0 %v6756_v14  ;;  %3507 = vmatpush1.msra.mxu1 %v5498_v20  ;;  %v6040_v20 = vpop.f32.mrf.mxu1 }
 0x1ae   :  { %3379 = vmatprep.subr.mxu0 %v6757_v15  ;;  %3509 = vmatprep.subr.mxu1 %v5503_v50  ;;  %v6761_v50 = vand.u32 4294901760, %v6726_v37  ;;  %v6764_v37 = vand.u32 4294901760, %v6731_v23  ;;  %v3834_v23 = vmov 1983009808   ;;  %v3644_v15 = vmax.f32 %v6752_v17, 0.0 }
 0x1af   :  { %3383 = vmatpush1.msra.mxu0 %v6758_v1  ;;  %3511 = vmatpush1.msra.mxu1 %v5508_v55  ;;  %v1148_v55 = vpop.f32.mrf.mxu0  ;;  %v1378_v45 = vpop.f32.mrf.mxu1 }
 0x1b0   :  { %3387 = vmatprep.subr.mxu0 %v6759_v25  ;;  %3513 = vmatprep.subr.mxu1 %v5513_v44  ;;  %v3630_v44 = vsub.f32 1.0, %v3628_v16  ;;  %v1379_v16 = vadd.f32 %v1378_v45, %v1146_v54 }
 0x1b1   :  { %3391 = vmatpush1.msra.mxu0 %v6760_v41  ;;  %3515 = vmatpush1.msra.mxu1 %v6725_v33  ;;  %v1515_v33 = vpop.f32.mrf.mxu0  ;;  %v1380_v49 = vpop.f32.mrf.mxu1  ;;  %v6774_v41 = vand.u32 4294901760, %v5810_v59  ;;  %v6779_v59 = vld [vmem:[#allocation26_spill] sm:$0xff] }
 0x1b2   :  { %3395 = vmatprep.subr.mxu0 %v6761_v50  ;;  %3517 = vmatprep.subr.mxu1 %v6727_v9  ;;  %v6765_v9 = vand.u32 4294901760, %v5755_v53  ;;  %v3632_v10 = vmul.f32 %v3630_v44, %v57_v4  ;;  %v524_v53 = vadd.f32 %v5977_v46, %v5965_v27  ;;  %v6772_v27 = vand.u32 4294901760, %v5783_v24 }
 0x1b3   :  { %3399 = vmatpush1.msra.mxu0 %v6762_v39  ;;  %3519 = vmatpush1.msra.mxu1 %v6728_v62  ;;  %v6766_v62 = vand.u32 4294901760, %v5735_v61  ;;  %v1517_v35 = vpop.f32.mrf.mxu0  ;;  %v1621_v8 = vpop.f32.mrf.mxu1  ;;  %v6768_v61 = vand.u32 4294901760, %v5762_v5  ;;  %v1381_v25 = vadd.f32 %v1380_v49, %v1148_v55  ;;  %v6777_v55 = vld [vmem:[#allocation40_spill] sm:$0xff] }
 0x1b4   :  { %3403 = vmatprep.subr.mxu0 %v6763_v29  ;;  %3521 = vmatprep.subr.mxu1 %v6730_v28  ;;  %v526_v28 = vadd.f32 %v525_v18, %v5975_v11  ;;  %v6769_v18 = vld [vmem:[#allocation39_spill] sm:$0xff]  ;;  %v661_v46 = vadd.f32 %v5983_v19, %v524_v53  ;;  %v3634_v5 = vadd.f32 %v3632_v10, %v3626_v32  ;;  %v6775_v19 = vld [vmem:[#allocation25_spill] sm:$0xff]  ;;  %v6776_v32 = vand.u32 4294901760, %v5798_v12  ;;  %v6786_v53 = vld [vmem:[#allocation44_spill] sm:$0xff] }
 0x1b5   :  { %3407 = vmatpush1.msra.mxu0 %v6764_v37  ;;  %3523 = vmatpush1.msra.mxu1 %v6732_v63  ;;  %v3669_v63 = vunpack.c.l.s4 %v3834_v23  ;;  %v6770_v57 = vand.u32 4294901760, %v6769_v18  ;;  %v1623_v44 = vpop.f32.mrf.mxu1  ;;  %v1518_v54 = vadd.f32 %v1517_v35, %v1381_v25  ;;  %v6778_v45 = vand.u32 4294901760, %v6777_v55 }
 0x1b6   :  { %3411 = vmatprep.subr.mxu0 %v6765_v9  ;;  %3525 = vmatprep.subr.mxu1 %v6733_v58  ;;  %v3671_v58 = vlaneseq  ;;  %v663_v11 = vadd.f32 %v5997_v51, %v526_v28  ;;  %v3735_v51 = vpop.eup %3734  ;;  %v767_v24 = vadd.f32 %v5999_v56, %v661_v46  ;;  %v3640_v37 = vmul.f32 %v3634_v5, %v3634_v5  ;;  %v6783_v28 = vld [vmem:[#allocation38_spill] sm:$0xff] }
 0x1b7   :  { %3415 = vmatpush1.msra.mxu0 %v6766_v62  ;;  %3527 = vmatpush1.msra.mxu1 %v6734_v7  ;;  %v6771_v7 = vld [vmem:[#allocation16_spill] sm:$0xff]  ;;  %v3670_v50 = vunpack.c.0.s8 %v3669_v63  ;;  %v3651_v9 = vmul.f32 0.6931472, %v3735_v51  ;;  %v1624_v49 = vadd.f32 %v1623_v44, %v1518_v54  ;;  %v6781_v62 = vld [vmem:[#allocation41_spill] sm:$0xff]  ;;  %v6787_v23 = vand.u32 4294901760, %v6786_v53 }
 0x1b8   :  { %3419 = vmatprep.subr.mxu0 %v6767_v30  ;;  %3529 = vmatprep.subr.mxu1 %v6735_v43  ;;  %v3636_v43 = vmul.f32 -0.5, %v57_v4  ;;  %v1789_v14 = vpop.f32.mrf.mxu0  ;;  %v769_v1 = vadd.f32 %v6015_v26, %v663_v11  ;;  %v3672_v39 = vshrl.u32 %v3671_v58, 7  ;;  %v1516_v26 = vadd.f32 %v1515_v33, %v1379_v16  ;;  %v6788_v63 = vld [vmem:[#allocation24_spill] sm:$0xff] }
 0x1b9   :  { %3423 = vmatpush1.msra.mxu0 %v6768_v61  ;;  %3531 = vmatpush1.msra.mxu1 %v6736_v52  ;;  %v3646_v52 = vmul.f32 %v57_v4, %v6752_v17  ;;  %v935_v56 = vadd.f32 %v6007_v2, %v767_v24  ;;  %v6780_v4 = vand.u32 4294901760, %v5840_v40  ;;  %v6782_v10 = vand.u32 4294901760, %v6781_v62  ;;  %v6785_v40 = vld [vmem:[#allocation23_spill] sm:$0xff] }
 0x1ba   :  { %3427 = vmatprep.subr.mxu0 %v6770_v57  ;;  %3533 = vmatprep.subr.mxu1 %v6771_v7  ;;  %v937_v17 = vadd.f32 %v6023_v60, %v769_v1  ;;  %v3638_v29 = vadd.f32 0.75, %v3636_v43  ;;  %v1791_v12 = vpop.f32.mrf.mxu0  ;;  %v1622_v33 = vadd.f32 %v1621_v8, %v1516_v26  ;;  %v6784_v2 = vand.u32 4294901760, %v5848_v0  ;;  %v6789_v8 = vld [vmem:[#allocation43_spill] sm:$0xff]  ;;  %v6791_v7 = vld [vmem:[#allocation36_spill] sm:$0xff] }
 0x1bb   :  { %3431 = vmatpush1.msra.mxu0 %v6772_v27  ;;  %3535 = vmatpush1.msra.mxu1 %v6773_v38  ;;  %v1792_v58 = vadd.f32 %v1791_v12, %v1624_v49  ;;  %v6109_v35 = vsub.s32 %v3670_v50, %v3672_v39  ;;  %v6790_v61 = vand.u32 4294901760, %v6789_v8  ;;  %v6793_v27 = vld [vmem:[#allocation34_spill] sm:$0xff] }
 0x1bc   :  { %3435 = vmatprep.subr.mxu0 %v6774_v41  ;;  %3537 = vmatprep.subr.mxu1 %v6775_v19  ;;  %v1041_v60 = vadd.f32 %v6040_v20, %v937_v17  ;;  %v1790_v20 = vadd.f32 %v1789_v14, %v1622_v33  ;;  %v3642_v11 = vmul.f32 %v3640_v37, %v3638_v29 }
 0x1bd   :  { %3439 = vmatpush1.msra.mxu0 %v6776_v32  ;;  %3539 = vmatpush1.msra.mxu1 %v6740_v31  ;;  %v3648_v31 = vsub.f32 %v3644_v15, %v3646_v52 }
 0x1be   :  { %3443 = vmatprep.subr.mxu0 %v6778_v45  ;;  %3541 = vmatprep.subr.mxu1 %v6779_v59 }
 0x1bf   :  { %3447 = vmatpush1.msra.mxu0 %v6780_v4  ;;  %3543 = vmatpush1.msra.mxu1 %v6741_v21  ;;  %v1039_v21 = vadd.f32 %v6025_v47, %v935_v56  ;;  %v3654_v18 = vadd.f32 %v3651_v9, %v3648_v31  ;;  %v6792_v47 = vld [vmem:[#allocation30_spill] sm:$0xff]  ;;  %v58_v4 = vld [vmem:[#allocation5 + $0x8] sm:$0xff] }
 0x1c0   :  { %3451 = vmatprep.subr.mxu0 %v6782_v10  ;;  %3545 = vmatprep.subr.mxu1 %v6783_v28 }
 0x1c1   :  { %3455 = vmatpush1.msra.mxu0 %v6784_v2  ;;  %3547 = vmatpush1.msra.mxu1 %v6785_v40  ;;  %v1893_v30 = vpop.f32.mrf.mxu1  ;;  %v3666_v57 = vcombine.low %v1039_v21, %v1041_v60  ;;  %v3656_v15 = vmul.f32 %v3654_v18, %v3642_v11  ;;  %v3637_v2 = vmul.f32 -0.5, %v58_v4 }
 0x1c2   :  { %3459 = vmatprep.subr.mxu0 %v6787_v23  ;;  %3549 = vmatprep.subr.mxu1 %v6788_v63  ;;  %v1894_v43 = vadd.f32 %v1893_v30, %v1790_v20 }
 0x1c3   :  { %3463 = vmatpush1.msra.mxu0 %v6790_v61  ;;  %3496 = vmatprep.mubr.f32.mxu0 %v6417_v34  ;;  %v1895_v0 = vpop.f32.mrf.mxu1  ;;  %v3674_v14 = vrot.slane %v3666_v57, %v6109_v35  ;;  %v3639_v57 = vadd.f32 0.75, %v3637_v2 }
 0x1c4   :  { %3551 = vmatpush1.msra.mxu1 %v6791_v7  ;;  %3498 = vmatmul.mubr.f32.vlgmr.msra.gmra.mxu0 %v6792_v47  ;;  %v1896_v46 = vadd.f32 %v1895_v0, %v1792_v58 }
 0x1c5   :  { %3553 = vmatprep.subr.mxu1 %v6793_v27  ;;  %3600 = vmatprep.mubr.f32.mxu1 %v6417_v34 }
 0x1c6   :  { %3555 = vmatpush1.msra.mxu1 %v5769_v42  ;;  %v3667_v38 = vcombine.low %v1894_v43, %v1896_v46  ;;  %v56_v42 = vld [vmem:[#allocation2 + $0x8] sm:$0xff] }
 0x1c7   :  { %3557 = vmatprep.subr.mxu1 %v5800_v36  ;;  %v3609_v36 = vand.u32 2147483647, %v56_v42  ;;  %vm3623_vm1 = vcmp.ge.f32.partialorder %v56_v42, 0.0  ;;  %v3645_v40 = vmax.f32 %v56_v42, 0.0  ;;  %v3647_v30 = vmul.f32 %v58_v4, %v56_v42 }
 0x1c8   :  { %3559 = vmatpush1.msra.mxu1 %v5806_v13  ;;  %v3681_v5 = vrot.slane %v3667_v38, %v6109_v35 }
 0x1c9   :  { %3561 = vmatprep.subr.mxu1 %v5816_v3  ;;  %v3611_v51 = vsub.f32 0.0, %v3609_v36 }
 0x1ca   :  { %3563 = vmatpush1.msra.mxu1 %v5818_v6  ;;  %v3682_v52 = vcombine.low %v3674_v14, %v3681_v5 }
 0x1cb   :  { %3565 = vmatprep.subr.mxu1 %v5830_v48  ;;  %v3614_v13 = vmul.f32 1.442695, %v3611_v51 }
 0x1cc   :  { %3567 = vmatpush1.msra.mxu1 %v5832_v22  ;;  %v3702_v34 = vmul.f32 %v3682_v52, %v3656_v15 }
 0x1cd   :  { %3602 = vmatmul.mubr.f32.vlgmr.msra.gmra.mxu1 %v6792_v47  ;;  %3736 = vpow2.f32 %v3614_v13  ;;  %v3649_v47 = vsub.f32 %v3645_v40, %v3647_v30 }
 0x1ce   :  { %3704 = vst [vmem:[#allocation8] sm:$0xff] %v3702_v34 }
 0x1da   :  { %v3737_v1 = vpop.eup %3736 }
 0x1db   :  { %v3617_v16 = vadd.f32 1.0, %v3737_v1  ;;  %v2001_v3 = vpop.f32.mrf.mxu0 }
 0x1dd   :  { %3738 = vrcp.f32 %v3617_v16  ;;  %v2003_v25 = vpop.f32.mrf.mxu0 }
 0x1de   :  { %3740 = vlog2.f32 %v3617_v16 }
 0x1e3   :  { %v2233_v6 = vpop.f32.mrf.mxu1 }
 0x1e4   :  { %v2234_v49 = vadd.f32 %v2233_v6, %v2001_v3 }
 0x1e5   :  { %v2235_v48 = vpop.f32.mrf.mxu1 }
 0x1e6   :  { %v2236_v9 = vadd.f32 %v2235_v48, %v2003_v25 }
 0x1ea   :  { %v3739_v19 = vpop.eup %3738 }
 0x1eb   :  { %v3625_v50 = vmul.f32 %v3739_v19, %v3737_v1  ;;  %v3741_v21 = vpop.eup %3740 }
 0x1ec   :  { %v3653_v43 = vmul.f32 0.6931472, %v3741_v21 }
 0x1ed   :  { %v3627_v32 = vsel %vm3623_vm1, %v3739_v19, %v3625_v50 }
 0x1ee   :  { %v3629_v55 = vmul.f32 2.0, %v3627_v32  ;;  %v3655_v16 = vadd.f32 %v3653_v43, %v3649_v47 }
 0x1f0   :  { %v3631_v56 = vsub.f32 1.0, %v3629_v55 }
 0x1f2   :  { %v3633_v31 = vmul.f32 %v3631_v56, %v58_v4 }
 0x1f4   :  { %v3635_v28 = vadd.f32 %v3633_v31, %v3627_v32 }
 0x1f6   :  { %v3641_v7 = vmul.f32 %v3635_v28, %v3635_v28 }
 0x1f8   :  { %v3643_v36 = vmul.f32 %v3641_v7, %v3639_v57 }
 0x1fc   :  { %v2370_v41 = vpop.f32.mrf.mxu0 }
 0x1fd   :  { %v2371_v53 = vadd.f32 %v2370_v41, %v2234_v49  ;;  %v3657_v41 = vmul.f32 %v3655_v16, %v3643_v36 }
 0x1fe   :  { %v2372_v24 = vpop.f32.mrf.mxu0 }
 0x1ff   :  { %v2373_v62 = vadd.f32 %v2372_v24, %v2236_v9 }
 0x205   :  { %v2476_v22 = vpop.f32.mrf.mxu1 }
 0x206   :  { %v2477_v8 = vadd.f32 %v2476_v22, %v2371_v53 }
 0x207   :  { %v2478_v44 = vpop.f32.mrf.mxu1 }
 0x208   :  { %v2479_v23 = vadd.f32 %v2478_v44, %v2373_v62 }
 0x21e   :  { %v2644_v39 = vpop.f32.mrf.mxu0 }
 0x21f   :  { %v2645_v46 = vadd.f32 %v2644_v39, %v2477_v8 }
 0x220   :  { %v2646_v17 = vpop.f32.mrf.mxu0 }
 0x221   :  { %v2647_v61 = vadd.f32 %v2646_v17, %v2479_v23 }
 0x227   :  { %v2748_v26 = vpop.f32.mrf.mxu1 }
 0x228   :  { %v2749_v15 = vadd.f32 %v2748_v26, %v2645_v46 }
 0x229   :  { %v2750_v45 = vpop.f32.mrf.mxu1 }
 0x22a   :  { %v2751_v27 = vadd.f32 %v2750_v45, %v2647_v61 }
 0x22c   :  { %v3683_v51 = vcombine.low %v2749_v15, %v2751_v27 }
 0x22e   :  { %v3691_v25 = vrot.slane %v3683_v51, %v6109_v35 }
 0x241   :  { %v2856_v54 = vpop.f32.mrf.mxu0 }
 0x243   :  { %v2858_v59 = vpop.f32.mrf.mxu0 }
 0x249   :  { %v3088_v29 = vpop.f32.mrf.mxu1 }
 0x24a   :  { %v3089_v63 = vadd.f32 %v3088_v29, %v2856_v54 }
 0x24b   :  { %v3090_v37 = vpop.f32.mrf.mxu1 }
 0x24c   :  { %v3091_v20 = vadd.f32 %v3090_v37, %v2858_v59 }
 0x262   :  { %v3225_v12 = vpop.f32.mrf.mxu0 }
 0x263   :  { %v3226_v0 = vadd.f32 %v3225_v12, %v3089_v63 }
 0x264   :  { %v3227_v60 = vpop.f32.mrf.mxu0 }
 0x265   :  { %v3228_v11 = vadd.f32 %v3227_v60, %v3091_v20 }
 0x26b   :  { %v3331_v33 = vpop.f32.mrf.mxu1 }
 0x26c   :  { %v3332_v38 = vadd.f32 %v3331_v33, %v3226_v0 }
 0x26d   :  { %v3333_v58 = vpop.f32.mrf.mxu1 }
 0x26e   :  { %v3334_v14 = vadd.f32 %v3333_v58, %v3228_v11 }
 0x284   :  { %v3499_v10 = vpop.f32.mrf.mxu0 }
 0x285   :  { %v3500_v52 = vadd.f32 %v3499_v10, %v3332_v38 }
 0x286   :  { %v3501_v18 = vpop.f32.mrf.mxu0 }
 0x287   :  { %v3502_v34 = vadd.f32 %v3501_v18, %v3334_v14 }
 0x28d   :  { %v3603_v5 = vpop.f32.mrf.mxu1 }
 0x28e   :  { %v3604_v13 = vadd.f32 %v3603_v5, %v3500_v52 }
 0x28f   :  { %v3605_v42 = vpop.f32.mrf.mxu1 }
 0x290   :  { %v3606_v1 = vadd.f32 %v3605_v42, %v3502_v34 }
 0x292   :  { %v3684_v3 = vcombine.low %v3604_v13, %v3606_v1 }
 0x294   :  { %v3698_v6 = vrot.slane %v3684_v3, %v6109_v35 }
 0x296   :  { %v3699_v19 = vcombine.low %v3691_v25, %v3698_v6 }
 0x298   :  { %v3703_v48 = vmul.f32 %v3699_v19, %v3657_v41 }
 0x29a   :  { %3705 = vst [vmem:[#allocation8 + $0x8] sm:$0xff] %v3703_v48 }
 0x29b   :  { %3813 = shalt.err (!%p3810_p5)
}
 0x29c   :  { %3715 = dma.vmem_to_hbm [thread:$0]  %s3713_s5, 256, %s6137_s4, [#allocation4]  }
 0x29d   :  { %3826 = dma.done.wait [#allocation4], 256  }
 0x29e   :  { %3827 = vsyncadd [#allocation4], 4294967040 }
 0x29f   :  { %3719 = vsyncpa [#allocation3], 1 }
 0x2a0   :  { %3720 = vsyncpa [#allocation6], 1 }
 0x2a1   :  { %3721 = vsyncpa [#allocation4], 1 }

</bundles_post_ra>
